<compile_context>
chip_gen: v6e
topology: v6e:2x2x1
jax: 0.10.0
libtpu: 0.0.40
codegen_flags: <defaults>
</compile_context>

<pallas_src>
import functools

import jax
import jax.numpy as jnp
from jax.experimental import pallas as pl
from jax.experimental.pallas import tpu as pltpu

HIDDEN = 256


def _round_up(x, m):
    return ((x + m - 1) // m) * m


# ---------------------------------------------------------------------------
# Pallas kernel 1: tiled fused matmul + bias + activation (used by the convs)
# ---------------------------------------------------------------------------
def _matmul_bias_act_kernel(x_ref, w_ref, b_ref, o_ref, *, act):
    acc = jnp.dot(x_ref[...].astype(jnp.bfloat16), w_ref[...],
                  preferred_element_type=jnp.float32)
    acc = acc + b_ref[...]                      # (1, N) bias broadcasts over rows
    if act == "relu":
        acc = jnp.maximum(acc, 0.0)
    elif act == "tanh":
        acc = jnp.tanh(acc)
    o_ref[...] = acc.astype(o_ref.dtype)


def _pick_tile_m(M):
    """Pick an M tile (multiple of 8) and the padded M extent."""
    M8 = _round_up(M, 8)
    if M8 <= 512:
        return M8, M8
    for cand in (256, 200, 192, 160, 128):
        if M8 % cand == 0:
            return cand, M8
    return 256, _round_up(M8, 256)


def matmul_bias_act(x, w_pad, b_pad, act="none"):
    """x: (M, K) f32; w_pad: (Kp, Np) bf16 (pre-padded at init); b_pad: (1, Np) f32.
    Returns padded (Mp, Np) f32 output (caller slices rows/cols as needed)."""
    M, K = x.shape
    Kp, Np = w_pad.shape
    tm, Mp = _pick_tile_m(M)
    x = jnp.pad(x.astype(jnp.float32), ((0, Mp - M), (0, Kp - K)))

    return pl.pallas_call(
        functools.partial(_matmul_bias_act_kernel, act=act),
        out_shape=jax.ShapeDtypeStruct((Mp, Np), jnp.float32),
        grid=(Mp // tm,),
        in_specs=[
            pl.BlockSpec((tm, Kp), lambda i: (i, 0)),
            pl.BlockSpec((Kp, Np), lambda i: (0, 0)),
            pl.BlockSpec((1, Np), lambda i: (0, 0)),
        ],
        out_specs=pl.BlockSpec((tm, Np), lambda i: (i, 0)),
        compiler_params=pltpu.CompilerParams(
            dimension_semantics=("parallel",)),
    )(x, w_pad, b_pad)


# ---------------------------------------------------------------------------
# Pallas kernel 2: fused post-conv MLP
#   vision fc + state encoder + (concat) action head, all intermediates in VMEM.
# ---------------------------------------------------------------------------
def _mlp_head_kernel(h_ref, s_ref,
                     vfc_w_ref, vfc_b_ref,
                     st1_w_ref, st1_b_ref,
                     st2_w_ref, st2_b_ref,
                     am1_wv_ref, am1_ws_ref, am1_b_ref,
                     am2_w_ref, am2_b_ref,
                     am3_w_ref, am3_b_ref,
                     o_ref):
    f32, bf16 = jnp.float32, jnp.bfloat16

    # vision fc: Linear(3136 -> 256)  (K padded to 3200)
    vision_f = jnp.dot(h_ref[...].astype(bf16), vfc_w_ref[...],
                       preferred_element_type=f32) + vfc_b_ref[...]

    # state encoder: Linear(3 -> 128) -> ReLU -> Linear(128 -> 256)
    s1 = jnp.dot(s_ref[...].astype(bf16), st1_w_ref[...],
                 preferred_element_type=f32) + st1_b_ref[...]
    s1 = jnp.maximum(s1, 0.0)
    state_f = jnp.dot(s1.astype(bf16), st2_w_ref[...],
                      preferred_element_type=f32) + st2_b_ref[...]

    # action head layer 1 over concat([vision_f, command_f, state_f]).
    # command_f is a constant row (all-zero command embedding => cmd bias only),
    # already folded into am1_b at init, so only the vision/state partials remain.
    m1 = (jnp.dot(vision_f.astype(bf16), am1_wv_ref[...], preferred_element_type=f32)
          + jnp.dot(state_f.astype(bf16), am1_ws_ref[...], preferred_element_type=f32)
          + am1_b_ref[...])
    m1 = jnp.maximum(m1, 0.0)

    m2 = jnp.dot(m1.astype(bf16), am2_w_ref[...],
                 preferred_element_type=f32) + am2_b_ref[...]
    m2 = jnp.maximum(m2, 0.0)

    mean = jnp.tanh(jnp.dot(m2.astype(bf16), am3_w_ref[...],
                            preferred_element_type=f32) + am3_b_ref[...])
    o_ref[...] = mean.astype(o_ref.dtype)


# ---------------------------------------------------------------------------
# Conv2d (VALID, square stride) as NHWC im2col + Pallas matmul, fused ReLU
# ---------------------------------------------------------------------------
def conv2d_relu(x, w_pad, b_pad, kh, kw, stride, cout):
    """x: NHWC (B, H, W, C) f32; w_pad: (Kp, Np) bf16 with HWC-major K rows.
    Returns NHWC (B, Ho, Wo, cout) f32."""
    B, H, W, C = x.shape
    Ho = (H - kh) // stride + 1
    Wo = (W - kw) // stride + 1
    rows = (jnp.arange(Ho) * stride)[:, None] + jnp.arange(kh)[None, :]   # (Ho, kh)
    cols = (jnp.arange(Wo) * stride)[:, None] + jnp.arange(kw)[None, :]   # (Wo, kw)
    # NHWC gather -> (B, Ho, Wo, kh, kw, C): already in weight row order, no transpose.
    patches = x[:, rows[:, None, :, None], cols[None, :, None, :], :]
    patches = patches.reshape(B * Ho * Wo, kh * kw * C)
    # TODO(synk): replace the XLA-materialized im2col with an in-kernel
    # shifted-matmul conv to keep patch expansion in VMEM at large batch sizes.
    y = matmul_bias_act(patches, w_pad, b_pad, act="relu")
    return y[:B * Ho * Wo, :cout].reshape(B, Ho, Wo, cout)


# ---------------------------------------------------------------------------
# Deterministic parameter init (PyTorch-default-like uniform bounds),
# with one-time padding / permutation / bf16 conversion.
# ---------------------------------------------------------------------------
def _uniform(key, shape, fan_in):
    bound = 1.0 / jnp.sqrt(jnp.float32(fan_in))
    return jax.random.uniform(key, shape, jnp.float32, -bound, bound)


def _pad_w(w, kp, np_):
    k, n = w.shape
    return jnp.pad(w, ((0, kp - k), (0, np_ - n))).astype(jnp.bfloat16)


def _pad_b(b, np_):
    return jnp.pad(b, (0, np_ - b.shape[0]))[None, :].astype(jnp.float32)


def init_params(key):
    ks = jax.random.split(key, 22)
    p = {}

    def conv_prep(w, b, kp, np_):
        cout, cin, kh, kw = w.shape
        wm = jnp.transpose(w, (2, 3, 1, 0)).reshape(kh * kw * cin, cout)   # HWC-major rows
        return _pad_w(wm, kp, np_), _pad_b(b, np_)

    # vision encoder convs (PyTorch layout (Cout, Cin, kh, kw))
    p["conv1_w"], p["conv1_b"] = conv_prep(
        _uniform(ks[0], (32, 3, 8, 8), 3 * 8 * 8),
        _uniform(ks[1], (32,), 3 * 8 * 8), 256, 128)      # K 192 -> 256
    p["conv2_w"], p["conv2_b"] = conv_prep(
        _uniform(ks[2], (64, 32, 4, 4), 32 * 4 * 4),
        _uniform(ks[3], (64,), 32 * 4 * 4), 512, 128)     # K 512
    p["conv3_w"], p["conv3_b"] = conv_prep(
        _uniform(ks[4], (64, 64, 3, 3), 64 * 3 * 3),
        _uniform(ks[5], (64,), 64 * 3 * 3), 640, 128)     # K 576 -> 640

    # vision fc Linear(64*7*7 -> 256): permute rows from NCHW-flatten order to the
    # NHWC (h, w, c) flatten order used by this pipeline, then pad K 3136 -> 3200.
    vfc_w = _uniform(ks[6], (64 * 7 * 7, HIDDEN), 64 * 7 * 7)
    vfc_b = _uniform(ks[7], (HIDDEN,), 64 * 7 * 7)
    vfc_w = vfc_w.reshape(64, 7, 7, HIDDEN).transpose(1, 2, 0, 3).reshape(64 * 7 * 7, HIDDEN)
    p["vfc_w"] = _pad_w(vfc_w, 3200, HIDDEN)
    p["vfc_b"] = _pad_b(vfc_b, HIDDEN)

    # command encoder Linear(768 -> 256): RobotBrain always feeds zeros, so
    # command_features == cmd_b; cmd_w is dead and never materialized.
    cmd_b = _uniform(ks[9], (HIDDEN,), 768)

    # state encoder
    p["st1_w"] = _pad_w(_uniform(ks[10], (3, HIDDEN // 2), 3), 128, 128)
    p["st1_b"] = _pad_b(_uniform(ks[11], (HIDDEN // 2,), 3), 128)
    p["st2_w"] = _pad_w(_uniform(ks[12], (HIDDEN // 2, HIDDEN), HIDDEN // 2), 128, HIDDEN)
    p["st2_b"] = _pad_b(_uniform(ks[13], (HIDDEN,), HIDDEN // 2), HIDDEN)

    # action mean head: 768 -> 256 -> 128 -> 4 (tanh)
    am1_w = _uniform(ks[14], (HIDDEN * 3, HIDDEN), HIDDEN * 3)
    am1_b = _uniform(ks[15], (HIDDEN,), HIDDEN * 3)
    # split am1 K-rows by concat block; fold constant command contribution into bias.
    p["am1_wv"] = _pad_w(am1_w[:HIDDEN], HIDDEN, HIDDEN)
    p["am1_ws"] = _pad_w(am1_w[2 * HIDDEN:], HIDDEN, HIDDEN)
    p["am1_b"] = _pad_b(am1_b + cmd_b @ am1_w[HIDDEN:2 * HIDDEN], HIDDEN)
    p["am2_w"] = _pad_w(_uniform(ks[16], (HIDDEN, HIDDEN // 2), HIDDEN), HIDDEN, 128)
    p["am2_b"] = _pad_b(_uniform(ks[17], (HIDDEN // 2,), HIDDEN), 128)
    p["am3_w"] = _pad_w(_uniform(ks[18], (HIDDEN // 2, 4), HIDDEN // 2), 128, 128)
    p["am3_b"] = _pad_b(_uniform(ks[19], (4,), HIDDEN // 2), 128)

    p["action_log_std"] = jnp.zeros((1, 4), jnp.float32)
    return p


# ---------------------------------------------------------------------------
# Forward pass (array-only, jitted) + python wrapper adding the mode string
# ---------------------------------------------------------------------------
def _forward_arrays(params, vision, robot_state):
    B = vision.shape[0]
    x = jnp.transpose(vision, (0, 2, 3, 1)).astype(jnp.float32)   # NCHW -> NHWC once

    h = conv2d_relu(x, params["conv1_w"], params["conv1_b"], 8, 8, 4, 32)   # (B,20,20,32)
    h = conv2d_relu(h, params["conv2_w"], params["conv2_b"], 4, 4, 2, 64)   # (B, 9, 9,64)
    h = conv2d_relu(h, params["conv3_w"], params["conv3_b"], 3, 3, 1, 64)   # (B, 7, 7,64)
    h = h.reshape(B, -1)                                                    # (B, 3136) HWC flatten

    Mp = _round_up(B, 8)
    h_pad = jnp.pad(h, ((0, Mp - B), (0, 3200 - h.shape[1])))
    s_pad = jnp.pad(robot_state.astype(jnp.float32),
                    ((0, Mp - B), (0, 128 - robot_state.shape[1])))

    mean_pad = pl.pallas_call(
        _mlp_head_kernel,
        out_shape=jax.ShapeDtypeStruct((Mp, 128), jnp.float32),
    )(h_pad, s_pad,
      params["vfc_w"], params["vfc_b"],
      params["st1_w"], params["st1_b"],
      params["st2_w"], params["st2_b"],
      params["am1_wv"], params["am1_ws"], params["am1_b"],
      params["am2_w"], params["am2_b"],
      params["am3_w"], params["am3_b"])

    mean = mean_pad[:B, :4]
    std = jnp.exp(params["action_log_std"])          # (1, 4)
    # TODO(synk): training-mode dist.rsample() (reparameterized Normal sampling) not
    # implemented; eval-mode semantics used (action = mean). dist returned as (mean, std).
    action = mean
    return mean, std, action


_forward_jit = jax.jit(_forward_arrays)


def robot_brain_forward(params, vision, task_description, robot_state):
    del task_description  # unused: RobotBrain feeds a zero command embedding
    mean, std, action = _forward_jit(params, vision, robot_state)
    return (mean, std), action, "Simple navigation mode"


if __name__ == "__main__":
    key = jax.random.PRNGKey(0)
    k_vis, k_state = jax.random.split(key)

    # Vision must be 84x84 so the 64*7*7 flatten in the module is consistent.
    vision = jax.random.normal(k_vis, (2, 3, 84, 84), jnp.float32)
    robot_state = jax.random.normal(k_state, (2, 3), jnp.float32)

    params = init_params(jax.random.PRNGKey(1))

    (mean, std), action, mode = robot_brain_forward(
        params, vision, "navigate to the charging dock", robot_state)
    jax.block_until_ready((mean, std, action))

    assert mean.shape == (2, 4) and std.shape == (1, 4) and action.shape == (2, 4)
    assert bool(jnp.all(jnp.isfinite(mean)))
    assert bool(jnp.all(jnp.abs(mean) <= 1.0))
    assert mode == "Simple navigation mode"
    print("KERNEL_OK")
</pallas_src>

<mosaic_0001>
module attributes {stable_mosaic.version = 11 : i64} {
  func.func @_matmul_bias_act_kernel(%arg0: i32, %arg1: memref<200x256xf32, #tpu.memory_space<vmem>>, %arg2: memref<256x128xbf16, #tpu.memory_space<vmem>>, %arg3: memref<1x128xf32, #tpu.memory_space<vmem>>, %arg4: memref<200x128xf32, #tpu.memory_space<vmem>>) attributes {dimension_semantics = [#tpu.dimension_semantics<parallel>], iteration_bounds = array<i64: 4>, scalar_prefetch = 0 : i64, scratch_operands = 0 : i64, tpu.core_type = #tpu.core_type<tc>, window_params = [{transform_indices = @transform_0, window_bounds = array<i64: 200, 256>}, {pipeline_mode = #tpu.pipeline_mode<synchronous>, transform_indices = @transform_1, window_bounds = array<i64: 256, 128>}, {pipeline_mode = #tpu.pipeline_mode<synchronous>, transform_indices = @transform_2, window_bounds = array<i64: 1, 128>}, {transform_indices = @transform_3, window_bounds = array<i64: 200, 128>}]} {
    %c0 = arith.constant 0 : index
    %c0_0 = arith.constant 0 : index
    %0 = vector.load %arg1[%c0, %c0_0] : memref<200x256xf32, #tpu.memory_space<vmem>>, vector<200x256xf32>
    %1 = arith.truncf %0 : vector<200x256xf32> to vector<200x256xbf16>
    %c0_1 = arith.constant 0 : index
    %c0_2 = arith.constant 0 : index
    %2 = vector.load %arg2[%c0_1, %c0_2] : memref<256x128xbf16, #tpu.memory_space<vmem>>, vector<256x128xbf16>
    %cst = arith.constant dense<0.000000e+00> : vector<200x128xf32>
    %3 = tpu.matmul %1, %2, %cst {dimension_numbers = #tpu.dot_dimension_numbers<[1], [0], [0], [1], [0, 0, 1, 1], [], []>} : vector<200x256xbf16>, vector<256x128xbf16>, vector<200x128xf32> -> vector<200x128xf32>
    %c0_3 = arith.constant 0 : index
    %c0_4 = arith.constant 0 : index
    %4 = vector.load %arg3[%c0_3, %c0_4] : memref<1x128xf32, #tpu.memory_space<vmem>>, vector<1x128xf32>
    %5 = vector.broadcast %4 : vector<1x128xf32> to vector<200x128xf32>
    %6 = arith.addf %3, %5 : vector<200x128xf32>
    %cst_5 = arith.constant 0.000000e+00 : f32
    %7 = vector.broadcast %cst_5 : f32 to vector<200x128xf32>
    %8 = arith.maximumf %6, %7 : vector<200x128xf32>
    %c0_6 = arith.constant 0 : index
    %c0_7 = arith.constant 0 : index
    %9 = vector.load %arg4[%c0_6, %c0_7] : memref<200x128xf32, #tpu.memory_space<vmem>>, vector<200x128xf32>
    tpu.vector_store %arg4[%c0_6, %c0_7], %8 {strides = array<i32>} : memref<200x128xf32, #tpu.memory_space<vmem>>, vector<200x128xf32>,
    return
  }
  func.func @transform_0(%arg0: i32) -> (i32, i32) {
    %c0_i32 = arith.constant 0 : i32
    %c0_i32_0 = arith.constant 0 : i32
    return %arg0, %c0_i32 : i32, i32
  }
  func.func @transform_1(%arg0: i32) -> (i32, i32) {
    %c0_i32 = arith.constant 0 : i32
    %c0_i32_0 = arith.constant 0 : i32
    %c0_i32_1 = arith.constant 0 : i32
    return %c0_i32, %c0_i32_0 : i32, i32
  }
  func.func @transform_2(%arg0: i32) -> (i32, i32) {
    %c0_i32 = arith.constant 0 : i32
    %c0_i32_0 = arith.constant 0 : i32
    %c0_i32_1 = arith.constant 0 : i32
    return %c0_i32, %c0_i32_0 : i32, i32
  }
  func.func @transform_3(%arg0: i32) -> (i32, i32) {
    %c0_i32 = arith.constant 0 : i32
    %c0_i32_0 = arith.constant 0 : i32
    return %arg0, %c0_i32 : i32, i32
  }
}

module attributes {stable_mosaic.version = 11 : i64} {
  func.func @_matmul_bias_act_kernel(%arg0: i32, %arg1: memref<168x512xf32, #tpu.memory_space<vmem>>, %arg2: memref<512x128xbf16, #tpu.memory_space<vmem>>, %arg3: memref<1x128xf32, #tpu.memory_space<vmem>>, %arg4: memref<168x128xf32, #tpu.memory_space<vmem>>) attributes {dimension_semantics = [#tpu.dimension_semantics<parallel>], iteration_bounds = array<i64: 1>, scalar_prefetch = 0 : i64, scratch_operands = 0 : i64, tpu.core_type = #tpu.core_type<tc>, window_params = [{transform_indices = @transform_0, window_bounds = array<i64: 168, 512>}, {pipeline_mode = #tpu.pipeline_mode<synchronous>, transform_indices = @transform_1, window_bounds = array<i64: 512, 128>}, {pipeline_mode = #tpu.pipeline_mode<synchronous>, transform_indices = @transform_2, window_bounds = array<i64: 1, 128>}, {transform_indices = @transform_3, window_bounds = array<i64: 168, 128>}]} {
    %c0 = arith.constant 0 : index
    %c0_0 = arith.constant 0 : index
    %0 = vector.load %arg1[%c0, %c0_0] : memref<168x512xf32, #tpu.memory_space<vmem>>, vector<168x512xf32>
    %1 = arith.truncf %0 : vector<168x512xf32> to vector<168x512xbf16>
    %c0_1 = arith.constant 0 : index
    %c0_2 = arith.constant 0 : index
    %2 = vector.load %arg2[%c0_1, %c0_2] : memref<512x128xbf16, #tpu.memory_space<vmem>>, vector<512x128xbf16>
    %cst = arith.constant dense<0.000000e+00> : vector<168x128xf32>
    %3 = tpu.matmul %1, %2, %cst {dimension_numbers = #tpu.dot_dimension_numbers<[1], [0], [0], [1], [0, 0, 1, 1], [], []>} : vector<168x512xbf16>, vector<512x128xbf16>, vector<168x128xf32> -> vector<168x128xf32>
    %c0_3 = arith.constant 0 : index
    %c0_4 = arith.constant 0 : index
    %4 = vector.load %arg3[%c0_3, %c0_4] : memref<1x128xf32, #tpu.memory_space<vmem>>, vector<1x128xf32>
    %5 = vector.broadcast %4 : vector<1x128xf32> to vector<168x128xf32>
    %6 = arith.addf %3, %5 : vector<168x128xf32>
    %cst_5 = arith.constant 0.000000e+00 : f32
    %7 = vector.broadcast %cst_5 : f32 to vector<168x128xf32>
    %8 = arith.maximumf %6, %7 : vector<168x128xf32>
    %c0_6 = arith.constant 0 : index
    %c0_7 = arith.constant 0 : index
    %9 = vector.load %arg4[%c0_6, %c0_7] : memref<168x128xf32, #tpu.memory_space<vmem>>, vector<168x128xf32>
    tpu.vector_store %arg4[%c0_6, %c0_7], %8 {strides = array<i32>} : memref<168x128xf32, #tpu.memory_space<vmem>>, vector<168x128xf32>,
    return
  }
  func.func @transform_0(%arg0: i32) -> (i32, i32) {
    %c0_i32 = arith.constant 0 : i32
    %c0_i32_0 = arith.constant 0 : i32
    return %arg0, %c0_i32 : i32, i32
  }
  func.func @transform_1(%arg0: i32) -> (i32, i32) {
    %c0_i32 = arith.constant 0 : i32
    %c0_i32_0 = arith.constant 0 : i32
    %c0_i32_1 = arith.constant 0 : i32
    return %c0_i32, %c0_i32_0 : i32, i32
  }
  func.func @transform_2(%arg0: i32) -> (i32, i32) {
    %c0_i32 = arith.constant 0 : i32
    %c0_i32_0 = arith.constant 0 : i32
    %c0_i32_1 = arith.constant 0 : i32
    return %c0_i32, %c0_i32_0 : i32, i32
  }
  func.func @transform_3(%arg0: i32) -> (i32, i32) {
    %c0_i32 = arith.constant 0 : i32
    %c0_i32_0 = arith.constant 0 : i32
    return %arg0, %c0_i32 : i32, i32
  }
}

module attributes {stable_mosaic.version = 11 : i64} {
  func.func @_matmul_bias_act_kernel(%arg0: i32, %arg1: memref<104x640xf32, #tpu.memory_space<vmem>>, %arg2: memref<640x128xbf16, #tpu.memory_space<vmem>>, %arg3: memref<1x128xf32, #tpu.memory_space<vmem>>, %arg4: memref<104x128xf32, #tpu.memory_space<vmem>>) attributes {dimension_semantics = [#tpu.dimension_semantics<parallel>], iteration_bounds = array<i64: 1>, scalar_prefetch = 0 : i64, scratch_operands = 0 : i64, tpu.core_type = #tpu.core_type<tc>, window_params = [{transform_indices = @transform_0, window_bounds = array<i64: 104, 640>}, {pipeline_mode = #tpu.pipeline_mode<synchronous>, transform_indices = @transform_1, window_bounds = array<i64: 640, 128>}, {pipeline_mode = #tpu.pipeline_mode<synchronous>, transform_indices = @transform_2, window_bounds = array<i64: 1, 128>}, {transform_indices = @transform_3, window_bounds = array<i64: 104, 128>}]} {
    %c0 = arith.constant 0 : index
    %c0_0 = arith.constant 0 : index
    %0 = vector.load %arg1[%c0, %c0_0] : memref<104x640xf32, #tpu.memory_space<vmem>>, vector<104x640xf32>
    %1 = arith.truncf %0 : vector<104x640xf32> to vector<104x640xbf16>
    %c0_1 = arith.constant 0 : index
    %c0_2 = arith.constant 0 : index
    %2 = vector.load %arg2[%c0_1, %c0_2] : memref<640x128xbf16, #tpu.memory_space<vmem>>, vector<640x128xbf16>
    %cst = arith.constant dense<0.000000e+00> : vector<104x128xf32>
    %3 = tpu.matmul %1, %2, %cst {dimension_numbers = #tpu.dot_dimension_numbers<[1], [0], [0], [1], [0, 0, 1, 1], [], []>} : vector<104x640xbf16>, vector<640x128xbf16>, vector<104x128xf32> -> vector<104x128xf32>
    %c0_3 = arith.constant 0 : index
    %c0_4 = arith.constant 0 : index
    %4 = vector.load %arg3[%c0_3, %c0_4] : memref<1x128xf32, #tpu.memory_space<vmem>>, vector<1x128xf32>
    %5 = vector.broadcast %4 : vector<1x128xf32> to vector<104x128xf32>
    %6 = arith.addf %3, %5 : vector<104x128xf32>
    %cst_5 = arith.constant 0.000000e+00 : f32
    %7 = vector.broadcast %cst_5 : f32 to vector<104x128xf32>
    %8 = arith.maximumf %6, %7 : vector<104x128xf32>
    %c0_6 = arith.constant 0 : index
    %c0_7 = arith.constant 0 : index
    %9 = vector.load %arg4[%c0_6, %c0_7] : memref<104x128xf32, #tpu.memory_space<vmem>>, vector<104x128xf32>
    tpu.vector_store %arg4[%c0_6, %c0_7], %8 {strides = array<i32>} : memref<104x128xf32, #tpu.memory_space<vmem>>, vector<104x128xf32>,
    return
  }
  func.func @transform_0(%arg0: i32) -> (i32, i32) {
    %c0_i32 = arith.constant 0 : i32
    %c0_i32_0 = arith.constant 0 : i32
    return %arg0, %c0_i32 : i32, i32
  }
  func.func @transform_1(%arg0: i32) -> (i32, i32) {
    %c0_i32 = arith.constant 0 : i32
    %c0_i32_0 = arith.constant 0 : i32
    %c0_i32_1 = arith.constant 0 : i32
    return %c0_i32, %c0_i32_0 : i32, i32
  }
  func.func @transform_2(%arg0: i32) -> (i32, i32) {
    %c0_i32 = arith.constant 0 : i32
    %c0_i32_0 = arith.constant 0 : i32
    %c0_i32_1 = arith.constant 0 : i32
    return %c0_i32, %c0_i32_0 : i32, i32
  }
  func.func @transform_3(%arg0: i32) -> (i32, i32) {
    %c0_i32 = arith.constant 0 : i32
    %c0_i32_0 = arith.constant 0 : i32
    return %arg0, %c0_i32 : i32, i32
  }
}

module attributes {stable_mosaic.version = 11 : i64} {
  func.func @_mlp_head_kernel(%arg0: memref<8x3200xf32, #tpu.memory_space<vmem>>, %arg1: memref<8x128xf32, #tpu.memory_space<vmem>>, %arg2: memref<3200x256xbf16, #tpu.memory_space<vmem>>, %arg3: memref<1x256xf32, #tpu.memory_space<vmem>>, %arg4: memref<128x128xbf16, #tpu.memory_space<vmem>>, %arg5: memref<1x128xf32, #tpu.memory_space<vmem>>, %arg6: memref<128x256xbf16, #tpu.memory_space<vmem>>, %arg7: memref<1x256xf32, #tpu.memory_space<vmem>>, %arg8: memref<256x256xbf16, #tpu.memory_space<vmem>>, %arg9: memref<256x256xbf16, #tpu.memory_space<vmem>>, %arg10: memref<1x256xf32, #tpu.memory_space<vmem>>, %arg11: memref<256x128xbf16, #tpu.memory_space<vmem>>, %arg12: memref<1x128xf32, #tpu.memory_space<vmem>>, %arg13: memref<128x128xbf16, #tpu.memory_space<vmem>>, %arg14: memref<1x128xf32, #tpu.memory_space<vmem>>, %arg15: memref<8x128xf32, #tpu.memory_space<vmem>>) attributes {dimension_semantics = [], scalar_prefetch = 0 : i64, scratch_operands = 0 : i64, tpu.core_type = #tpu.core_type<tc>} {
    %c0 = arith.constant 0 : index
    %c0_0 = arith.constant 0 : index
    %0 = vector.load %arg0[%c0, %c0_0] : memref<8x3200xf32, #tpu.memory_space<vmem>>, vector<8x3200xf32>
    %1 = arith.truncf %0 : vector<8x3200xf32> to vector<8x3200xbf16>
    %c0_1 = arith.constant 0 : index
    %c0_2 = arith.constant 0 : index
    %2 = vector.load %arg2[%c0_1, %c0_2] : memref<3200x256xbf16, #tpu.memory_space<vmem>>, vector<3200x256xbf16>
    %cst = arith.constant dense<0.000000e+00> : vector<8x256xf32>
    %3 = tpu.matmul %1, %2, %cst {dimension_numbers = #tpu.dot_dimension_numbers<[1], [0], [0], [1], [0, 0, 1, 1], [], []>} : vector<8x3200xbf16>, vector<3200x256xbf16>, vector<8x256xf32> -> vector<8x256xf32>
    %c0_3 = arith.constant 0 : index
    %c0_4 = arith.constant 0 : index
    %4 = vector.load %arg3[%c0_3, %c0_4] : memref<1x256xf32, #tpu.memory_space<vmem>>, vector<1x256xf32>
    %5 = vector.broadcast %4 : vector<1x256xf32> to vector<8x256xf32>
    %6 = arith.addf %3, %5 : vector<8x256xf32>
    %c0_5 = arith.constant 0 : index
    %c0_6 = arith.constant 0 : index
    %7 = vector.load %arg1[%c0_5, %c0_6] : memref<8x128xf32, #tpu.memory_space<vmem>>, vector<8x128xf32>
    %8 = arith.truncf %7 : vector<8x128xf32> to vector<8x128xbf16>
    %c0_7 = arith.constant 0 : index
    %c0_8 = arith.constant 0 : index
    %9 = vector.load %arg4[%c0_7, %c0_8] : memref<128x128xbf16, #tpu.memory_space<vmem>>, vector<128x128xbf16>
    %cst_9 = arith.constant dense<0.000000e+00> : vector<8x128xf32>
    %10 = tpu.matmul %8, %9, %cst_9 {dimension_numbers = #tpu.dot_dimension_numbers<[1], [0], [0], [1], [0, 0, 1, 1], [], []>} : vector<8x128xbf16>, vector<128x128xbf16>, vector<8x128xf32> -> vector<8x128xf32>
    %c0_10 = arith.constant 0 : index
    %c0_11 = arith.constant 0 : index
    %11 = vector.load %arg5[%c0_10, %c0_11] : memref<1x128xf32, #tpu.memory_space<vmem>>, vector<1x128xf32>
    %12 = vector.broadcast %11 : vector<1x128xf32> to vector<8x128xf32>
    %13 = arith.addf %10, %12 : vector<8x128xf32>
    %cst_12 = arith.constant 0.000000e+00 : f32
    %14 = vector.broadcast %cst_12 : f32 to vector<8x128xf32>
    %15 = arith.maximumf %13, %14 : vector<8x128xf32>
    %16 = arith.truncf %15 : vector<8x128xf32> to vector<8x128xbf16>
    %c0_13 = arith.constant 0 : index
    %c0_14 = arith.constant 0 : index
    %17 = vector.load %arg6[%c0_13, %c0_14] : memref<128x256xbf16, #tpu.memory_space<vmem>>, vector<128x256xbf16>
    %cst_15 = arith.constant dense<0.000000e+00> : vector<8x256xf32>
    %18 = tpu.matmul %16, %17, %cst_15 {dimension_numbers = #tpu.dot_dimension_numbers<[1], [0], [0], [1], [0, 0, 1, 1], [], []>} : vector<8x128xbf16>, vector<128x256xbf16>, vector<8x256xf32> -> vector<8x256xf32>
    %c0_16 = arith.constant 0 : index
    %c0_17 = arith.constant 0 : index
    %19 = vector.load %arg7[%c0_16, %c0_17] : memref<1x256xf32, #tpu.memory_space<vmem>>, vector<1x256xf32>
    %20 = vector.broadcast %19 : vector<1x256xf32> to vector<8x256xf32>
    %21 = arith.addf %18, %20 : vector<8x256xf32>
    %22 = arith.truncf %6 : vector<8x256xf32> to vector<8x256xbf16>
    %c0_18 = arith.constant 0 : index
    %c0_19 = arith.constant 0 : index
    %23 = vector.load %arg8[%c0_18, %c0_19] : memref<256x256xbf16, #tpu.memory_space<vmem>>, vector<256x256xbf16>
    %cst_20 = arith.constant dense<0.000000e+00> : vector<8x256xf32>
    %24 = tpu.matmul %22, %23, %cst_20 {dimension_numbers = #tpu.dot_dimension_numbers<[1], [0], [0], [1], [0, 0, 1, 1], [], []>} : vector<8x256xbf16>, vector<256x256xbf16>, vector<8x256xf32> -> vector<8x256xf32>
    %25 = arith.truncf %21 : vector<8x256xf32> to vector<8x256xbf16>
    %c0_21 = arith.constant 0 : index
    %c0_22 = arith.constant 0 : index
    %26 = vector.load %arg9[%c0_21, %c0_22] : memref<256x256xbf16, #tpu.memory_space<vmem>>, vector<256x256xbf16>
    %cst_23 = arith.constant dense<0.000000e+00> : vector<8x256xf32>
    %27 = tpu.matmul %25, %26, %cst_23 {dimension_numbers = #tpu.dot_dimension_numbers<[1], [0], [0], [1], [0, 0, 1, 1], [], []>} : vector<8x256xbf16>, vector<256x256xbf16>, vector<8x256xf32> -> vector<8x256xf32>
    %28 = arith.addf %24, %27 : vector<8x256xf32>
    %c0_24 = arith.constant 0 : index
    %c0_25 = arith.constant 0 : index
    %29 = vector.load %arg10[%c0_24, %c0_25] : memref<1x256xf32, #tpu.memory_space<vmem>>, vector<1x256xf32>
    %30 = vector.broadcast %29 : vector<1x256xf32> to vector<8x256xf32>
    %31 = arith.addf %28, %30 : vector<8x256xf32>
    %cst_26 = arith.constant 0.000000e+00 : f32
    %32 = vector.broadcast %cst_26 : f32 to vector<8x256xf32>
    %33 = arith.maximumf %31, %32 : vector<8x256xf32>
    %34 = arith.truncf %33 : vector<8x256xf32> to vector<8x256xbf16>
    %c0_27 = arith.constant 0 : index
    %c0_28 = arith.constant 0 : index
    %35 = vector.load %arg11[%c0_27, %c0_28] : memref<256x128xbf16, #tpu.memory_space<vmem>>, vector<256x128xbf16>
    %cst_29 = arith.constant dense<0.000000e+00> : vector<8x128xf32>
    %36 = tpu.matmul %34, %35, %cst_29 {dimension_numbers = #tpu.dot_dimension_numbers<[1], [0], [0], [1], [0, 0, 1, 1], [], []>} : vector<8x256xbf16>, vector<256x128xbf16>, vector<8x128xf32> -> vector<8x128xf32>
    %c0_30 = arith.constant 0 : index
    %c0_31 = arith.constant 0 : index
    %37 = vector.load %arg12[%c0_30, %c0_31] : memref<1x128xf32, #tpu.memory_space<vmem>>, vector<1x128xf32>
    %38 = vector.broadcast %37 : vector<1x128xf32> to vector<8x128xf32>
    %39 = arith.addf %36, %38 : vector<8x128xf32>
    %cst_32 = arith.constant 0.000000e+00 : f32
    %40 = vector.broadcast %cst_32 : f32 to vector<8x128xf32>
    %41 = arith.maximumf %39, %40 : vector<8x128xf32>
    %42 = arith.truncf %41 : vector<8x128xf32> to vector<8x128xbf16>
    %c0_33 = arith.constant 0 : index
    %c0_34 = arith.constant 0 : index
    %43 = vector.load %arg13[%c0_33, %c0_34] : memref<128x128xbf16, #tpu.memory_space<vmem>>, vector<128x128xbf16>
    %cst_35 = arith.constant dense<0.000000e+00> : vector<8x128xf32>
    %44 = tpu.matmul %42, %43, %cst_35 {dimension_numbers = #tpu.dot_dimension_numbers<[1], [0], [0], [1], [0, 0, 1, 1], [], []>} : vector<8x128xbf16>, vector<128x128xbf16>, vector<8x128xf32> -> vector<8x128xf32>
    %c0_36 = arith.constant 0 : index
    %c0_37 = arith.constant 0 : index
    %45 = vector.load %arg14[%c0_36, %c0_37] : memref<1x128xf32, #tpu.memory_space<vmem>>, vector<1x128xf32>
    %46 = vector.broadcast %45 : vector<1x128xf32> to vector<8x128xf32>
    %47 = arith.addf %44, %46 : vector<8x128xf32>
    %48 = math.tanh %47 : vector<8x128xf32>
    %c0_38 = arith.constant 0 : index
    %c0_39 = arith.constant 0 : index
    %49 = vector.load %arg15[%c0_38, %c0_39] : memref<8x128xf32, #tpu.memory_space<vmem>>, vector<8x128xf32>
    tpu.vector_store %arg15[%c0_38, %c0_39], %48 {strides = array<i32>} : memref<8x128xf32, #tpu.memory_space<vmem>>, vector<8x128xf32>,
    return
  }
}

</mosaic_0001>

<bundles_post_ra>
// kernel: _forward_arrays.4
= control target key start
LH: loop header
LB: loop body
LE: loop exit
PB: predicated region body
PF: predicated region fallthrough
CT: control target
= control target key end

     0   :  { %s821_s12 = smov 0   ;;  %s999_s0 = inlined_call_operand.vmem [shape: f32[800,256], index: 0, kind: input, shape index: {}]   ;;  %s1000_s1 = inlined_call_operand.vmem [shape: bf16[256,128], index: 1, kind: input, shape index: {}]   ;;  %s1001_s2 = inlined_call_operand.vmem [shape: f32[1,128], index: 2, kind: input, shape index: {}]   ;;  %s1002_s3 = inlined_call_operand.vmem [shape: f32[800,128], index: 3, kind: output, shape index: {}]  }
   0x1 LB: > { %s631_s13 = sadd.s32 4294967295, %s799_s12   ;;  %p635_p0 = scmp.ge.s32.totalorder %s799_s12, 1  ;;  %s799_s12 = sphi %s821_s12, %s13_s12  }
   0x2   : > { %p139_p1 = scmp.lt.s32.totalorder %s799_s12, 5 }
   0x4   : > { %p140_p2 = pnand %p635_p0, %p139_p1 }
   0x5   : > { %s164_s16 = smul.u32 (!%p140_p2), 25, %s631_s13 }
   0x6   : > { %143 = sbr.rel (%p140_p2) target bundleno = 298 (0x12a), region = 32 }
   0x7   : > { %p165_p3 = scmp.lt.s32.totalorder (!%p140_p2), %s164_s16, 99 }
   0xb   : > { %v777_v0 = vld [vmem:[%s1000_s1 + $0x78] sm:$0xff]   ;;  %v779_v2 = vld [vmem:[%s1000_s1 + $0x70] sm:$0xff]   ;;  %v781_v4 = vld [vmem:[%s1000_s1 + $0x68] sm:$0xff]   ;;  %s1004_s16 = smov (!%p165_p3, %s164_s16), 99 }
   0xc   : > { %v778_v1 = vld [vmem:[%s1000_s1 + $0x38] sm:$0xff]   ;;  %659 = vmatprep.subr.bf16.mxu0 %v777_v0  ;;  %753 = vmatprep.subr.bf16.mxu1 %v777_v0  ;;  %v780_v3 = vld [vmem:[%s1000_s1 + $0x30] sm:$0xff]   ;;  %v782_v5 = vld [vmem:[%s1000_s1 + $0x28] sm:$0xff]   ;;  %s658_s29 = sshll.u32 %s1004_s16, 4  ;;  %s638_s28 = sshll.u32 %s1004_s16, 3 }
   0xd   : > { %660 = vmatpush3.bf16.msra.mxu0 %v778_v1  ;;  %761 = vmatpush3.bf16.msra.mxu1 %v778_v1  ;;  %v783_v6 = vld [vmem:[%s1000_s1 + $0x60] sm:$0xff]   ;;  %v785_v8 = vld [vmem:[%s1000_s1 + $0x58] sm:$0xff]   ;;  %s862_s9 = scalar_lea.vmem %s999_s0, %s658_s29  ;;  %v787_v10 = vld [vmem:[%s1000_s1 + $0x50] sm:$0xff]   ;;  %s946_s4 = scalar_lea.vmem %s1002_s3, %s638_s28 }
   0xe   : > { %661 = vmatprep.subr.bf16.mxu0 %v779_v2  ;;  %754 = vmatprep.subr.bf16.mxu1 %v779_v2  ;;  %v784_v7 = vld [vmem:[%s1000_s1 + $0x20] sm:$0xff]   ;;  %v786_v9 = vld [vmem:[%s1000_s1 + $0x18] sm:$0xff]   ;;  %v179_v11 = vld [vmem:[%s862_s9 + $0x8] sm:$0xff] }
   0xf   : > { %v181_v12 = vld [vmem:[%s862_s9 + $0x18] sm:$0xff]  ;;  %v207_v14 = vld [vmem:[%s862_s9 + $0xe8] sm:$0xff]  ;;  %v788_v17 = vld [vmem:[%s1000_s1 + $0x10] sm:$0xff]  }
  0x10   : > { %v229_v13 = vpack.c.bf16 %v181_v12, %v179_v11  ;;  %v209_v15 = vld [vmem:[%s862_s9 + $0xf8] sm:$0xff]  ;;  %v789_v18 = vld [vmem:[%s1000_s1 + $0x48] sm:$0xff]   ;;  %v791_v20 = vld [vmem:[%s1000_s1 + $0x40] sm:$0xff]  }
  0x11   : > { %662 = vmatpush3.bf16.msra.mxu0 %v780_v3  ;;  %762 = vmatpush3.bf16.msra.mxu1 %v780_v3  ;;  %v243_v16 = vpack.c.bf16 %v209_v15, %v207_v14  ;;  %v790_v19 = vld [vmem:[%s1000_s1 + $0x8] sm:$0xff]   ;;  %v792_v21 = vld [vmem:[%s1000_s1] sm:$0xff]   ;;  %v180_v23 = vld [vmem:[%s862_s9 + $0x10] sm:$0xff] }
  0x12   : > { %663 = vmatprep.subr.bf16.mxu0 %v781_v4  ;;  %755 = vmatprep.subr.bf16.mxu1 %v781_v4  ;;  %v178_v22 = vld [vmem:[%s862_s9] sm:$0xff]  ;;  %v208_v25 = vld [vmem:[%s862_s9 + $0xf0] sm:$0xff]  ;;  %v183_v26 = vld [vmem:[%s862_s9 + $0x28] sm:$0xff] }
  0x13   : > { %421 = vmatprep.mubr.bf16.mxu0 %v229_v13  ;;  %477 = vmatprep.mubr.bf16.mxu1 %v243_v16  ;;  %v206_v24 = vld [vmem:[%s862_s9 + $0xe0] sm:$0xff]  ;;  %v185_v27 = vld [vmem:[%s862_s9 + $0x38] sm:$0xff]  ;;  %v211_v28 = vld [vmem:[%s862_s9 + $0x108] sm:$0xff]  ;;  %v228_v30 = vpack.c.bf16 %v180_v23, %v178_v22 }
  0x14   : > { %v213_v29 = vld [vmem:[%s862_s9 + $0x118] sm:$0xff]  ;;  %v242_v31 = vpack.c.bf16 %v208_v25, %v206_v24  ;;  %v231_v32 = vpack.c.bf16 %v185_v27, %v183_v26  ;;  %v182_v34 = vld [vmem:[%s862_s9 + $0x20] sm:$0xff]  ;;  %v184_v35 = vld [vmem:[%s862_s9 + $0x30] sm:$0xff] }
  0x15   : > { %664 = vmatpush3.bf16.msra.mxu0 %v782_v5  ;;  %763 = vmatpush3.bf16.msra.mxu1 %v782_v5  ;;  %v245_v33 = vpack.c.bf16 %v213_v29, %v211_v28  ;;  %v210_v36 = vld [vmem:[%s862_s9 + $0x100] sm:$0xff]  ;;  %v212_v37 = vld [vmem:[%s862_s9 + $0x110] sm:$0xff]  ;;  %v187_v38 = vld [vmem:[%s862_s9 + $0x48] sm:$0xff]  ;;  %v230_v42 = vpack.c.bf16 %v184_v35, %v182_v34 }
  0x16   : > { %665 = vmatprep.subr.bf16.mxu0 %v783_v6  ;;  %756 = vmatprep.subr.bf16.mxu1 %v783_v6  ;;  %v189_v39 = vld [vmem:[%s862_s9 + $0x58] sm:$0xff]  ;;  %v215_v40 = vld [vmem:[%s862_s9 + $0x128] sm:$0xff]  ;;  %v244_v43 = vpack.c.bf16 %v212_v37, %v210_v36  ;;  %v186_v46 = vld [vmem:[%s862_s9 + $0x40] sm:$0xff] }
  0x17   : > { %v217_v41 = vld [vmem:[%s862_s9 + $0x138] sm:$0xff]  ;;  %v233_v44 = vpack.c.bf16 %v189_v39, %v187_v38  ;;  %v188_v47 = vld [vmem:[%s862_s9 + $0x50] sm:$0xff]  ;;  %v214_v48 = vld [vmem:[%s862_s9 + $0x120] sm:$0xff] }
  0x18   : > { %v247_v45 = vpack.c.bf16 %v217_v41, %v215_v40  ;;  %v216_v49 = vld [vmem:[%s862_s9 + $0x130] sm:$0xff]  ;;  %v191_v50 = vld [vmem:[%s862_s9 + $0x68] sm:$0xff]  ;;  %v193_v51 = vld [vmem:[%s862_s9 + $0x78] sm:$0xff]  ;;  %v232_v54 = vpack.c.bf16 %v188_v47, %v186_v46 }
  0x19   : > { %666 = vmatpush3.bf16.msra.mxu0 %v784_v7  ;;  %764 = vmatpush3.bf16.msra.mxu1 %v784_v7  ;;  %v219_v52 = vld [vmem:[%s862_s9 + $0x148] sm:$0xff]  ;;  %v221_v53 = vld [vmem:[%s862_s9 + $0x158] sm:$0xff]  ;;  %v246_v55 = vpack.c.bf16 %v216_v49, %v214_v48  ;;  %v235_v56 = vpack.c.bf16 %v193_v51, %v191_v50  ;;  %v190_v58 = vld [vmem:[%s862_s9 + $0x60] sm:$0xff] }
  0x1a   : > { %667 = vmatprep.subr.bf16.mxu0 %v785_v8  ;;  %757 = vmatprep.subr.bf16.mxu1 %v785_v8  ;;  %v249_v57 = vpack.c.bf16 %v221_v53, %v219_v52  ;;  %v192_v59 = vld [vmem:[%s862_s9 + $0x70] sm:$0xff]  ;;  %v218_v60 = vld [vmem:[%s862_s9 + $0x140] sm:$0xff]  ;;  %v195_v62 = vld [vmem:[%s862_s9 + $0x88] sm:$0xff] }
  0x1b   : > { %v220_v61 = vld [vmem:[%s862_s9 + $0x150] sm:$0xff]  ;;  %v197_v63 = vld [vmem:[%s862_s9 + $0x98] sm:$0xff]  ;;  %v223_v0 = vld [vmem:[%s862_s9 + $0x168] sm:$0xff]  ;;  %v234_v2 = vpack.c.bf16 %v192_v59, %v190_v58 }
  0x1c   : > { %v225_v1 = vld [vmem:[%s862_s9 + $0x178] sm:$0xff]  ;;  %v248_v3 = vpack.c.bf16 %v220_v61, %v218_v60  ;;  %v237_v4 = vpack.c.bf16 %v197_v63, %v195_v62  ;;  %v194_v6 = vld [vmem:[%s862_s9 + $0x80] sm:$0xff]  ;;  %v196_v7 = vld [vmem:[%s862_s9 + $0x90] sm:$0xff] }
  0x1d   : > { %668 = vmatpush3.bf16.msra.mxu0 %v786_v9  ;;  %765 = vmatpush3.bf16.msra.mxu1 %v786_v9  ;;  %v251_v5 = vpack.c.bf16 %v225_v1, %v223_v0  ;;  %v222_v8 = vld [vmem:[%s862_s9 + $0x160] sm:$0xff]  ;;  %v224_v9 = vld [vmem:[%s862_s9 + $0x170] sm:$0xff]  ;;  %v201_v11 = vld [vmem:[%s862_s9 + $0xb8] sm:$0xff]  ;;  %v236_v13 = vpack.c.bf16 %v196_v7, %v194_v6 }
  0x1e   : > { %669 = vmatprep.subr.bf16.mxu0 %v787_v10  ;;  %758 = vmatprep.subr.bf16.mxu1 %v787_v10  ;;  %v199_v10 = vld [vmem:[%s862_s9 + $0xa8] sm:$0xff]  ;;  %v250_v14 = vpack.c.bf16 %v224_v9, %v222_v8  ;;  %v202_v25 = vld [vmem:[%s862_s9 + $0xc0] sm:$0xff]  ;;  %v204_v26 = vld [vmem:[%s862_s9 + $0xd0] sm:$0xff] }
  0x1f   : > { %v227_v12 = vld [vmem:[%s862_s9 + $0x188] sm:$0xff]  ;;  %v239_v15 = vpack.c.bf16 %v201_v11, %v199_v10  ;;  %v240_v27 = vpack.c.bf16 %v204_v26, %v202_v25 }
  0x20   : > { %v253_v16 = vpack.c.bf16 %v227_v12, %v227_v12 }
  0x21   : > { %670 = vmatpush3.bf16.msra.mxu0 %v788_v17  ;;  %766 = vmatpush3.bf16.msra.mxu1 %v788_v17  ;;  %v198_v17 = vld [vmem:[%s862_s9 + $0xa0] sm:$0xff] }
  0x22   : > { %671 = vmatprep.subr.bf16.mxu0 %v789_v18  ;;  %759 = vmatprep.subr.bf16.mxu1 %v789_v18  ;;  %v200_v18 = vld [vmem:[%s862_s9 + $0xb0] sm:$0xff] }
  0x23   : > { %v238_v22 = vpack.c.bf16 %v200_v18, %v198_v17 }
  0x25   : > { %672 = vmatpush3.bf16.msra.mxu0 %v790_v19  ;;  %767 = vmatpush3.bf16.msra.mxu1 %v790_v19  ;;  %v226_v19 = vld [vmem:[%s862_s9 + $0x180] sm:$0xff] }
  0x26   : > { %673 = vmatprep.subr.bf16.mxu0 %v791_v20  ;;  %760 = vmatprep.subr.bf16.mxu1 %v791_v20  ;;  %v203_v20 = vld [vmem:[%s862_s9 + $0xc8] sm:$0xff]  ;;  %v252_v23 = vpack.c.bf16 %v226_v19, %v226_v19 }
  0x29   : > { %674 = vmatpush3.bf16.msra.mxu0 %v792_v21  ;;  %768 = vmatpush3.bf16.msra.mxu1 %v792_v21  ;;  %v205_v21 = vld [vmem:[%s862_s9 + $0xd8] sm:$0xff] }
  0x2a   : > { %v241_v24 = vpack.c.bf16 %v205_v21, %v203_v20 }
  0x2c   : > { %422 = vmatmul.mubr.bf16.vlgmr.msra.gmra.mxu0 %v228_v30  ;;  %478 = vmatmul.mubr.bf16.vlgmr.msra.gmra.mxu1 %v242_v31  ;;  %v938_v30 = vld [vmem:[%s1001_s2] ss:$0 sm:$0xff] }
  0x2d   : > { %429 = vmatprep.mubr.bf16.mxu0 %v231_v32  ;;  %485 = vmatprep.mubr.bf16.mxu1 %v245_v33 }
  0x34   : > { %430 = vmatmul.mubr.bf16.gmra.mxu0 %v230_v42  ;;  %486 = vmatmul.mubr.bf16.gmra.mxu1 %v244_v43 }
  0x35   : > { %437 = vmatprep.mubr.bf16.mxu0 %v233_v44  ;;  %493 = vmatprep.mubr.bf16.mxu1 %v247_v45 }
  0x3c   : > { %438 = vmatmul.mubr.bf16.gmra.mxu0 %v232_v54  ;;  %494 = vmatmul.mubr.bf16.gmra.mxu1 %v246_v55 }
  0x3d   : > { %445 = vmatprep.mubr.bf16.mxu0 %v235_v56  ;;  %501 = vmatprep.mubr.bf16.mxu1 %v249_v57 }
  0x44   : > { %446 = vmatmul.mubr.bf16.gmra.mxu0 %v234_v2  ;;  %502 = vmatmul.mubr.bf16.gmra.mxu1 %v248_v3 }
  0x45   : > { %453 = vmatprep.mubr.bf16.mxu0 %v237_v4  ;;  %509 = vmatprep.mubr.bf16.mxu1 %v251_v5 }
  0x4c   : > { %454 = vmatmul.mubr.bf16.gmra.mxu0 %v236_v13  ;;  %510 = vmatmul.mubr.bf16.gmra.mxu1 %v250_v14 }
  0x4d   : > { %461 = vmatprep.mubr.bf16.mxu0 %v239_v15  ;;  %517 = vmatprep.mubr.bf16.mxu1 %v253_v16 }
  0x54   : > { %462 = vmatmul.mubr.bf16.gmra.mxu0 %v238_v22  ;;  %518 = vmatmul.mubr.bf16.gmra.mxu1 %v252_v23 }
  0x55   : > { %469 = vmatprep.mubr.bf16.mxu0 %v241_v24 }
  0x5c   : > { %470 = vmatmul.mubr.bf16.gmra.mxu0 %v240_v27 }
  0xec   : > { %v675_v28 = vpop.f32.mrf.mxu0  ;;  %v717_v29 = vpop.f32.mrf.mxu1 }
  0xee   : > { %v676_v31 = vpop.f32.mrf.mxu0  ;;  %v718_v32 = vpop.f32.mrf.mxu1 }
  0xef   : > { %v677_v33 = vadd.f32 %v676_v31, %v675_v28  ;;  %v719_v34 = vadd.f32 %v718_v32, %v717_v29 }
  0xf0   : > { %v678_v35 = vpop.f32.mrf.mxu0  ;;  %v720_v36 = vpop.f32.mrf.mxu1 }
  0xf1   : > { %v424_v37 = vadd.f32 %v677_v33, %v938_v30  ;;  %v480_v38 = vadd.f32 %v719_v34, %v938_v30 }
  0xf2   : > { %v679_v39 = vpop.f32.mrf.mxu0  ;;  %v721_v40 = vpop.f32.mrf.mxu1 }
  0xf3   : > { %v525_v41 = vmax.f32 %v424_v37, 0.0  ;;  %v680_v42 = vadd.f32 %v679_v39, %v678_v35  ;;  %v539_v43 = vmax.f32 %v480_v38, 0.0  ;;  %v722_v44 = vadd.f32 %v721_v40, %v720_v36 }
  0xf4   : > { %v681_v45 = vpop.f32.mrf.mxu0  ;;  %v723_v46 = vpop.f32.mrf.mxu1 }
  0xf5   : > { %550 = vst [vmem:[%s946_s4] sm:$0xff] %v525_v41  ;;  %v427_v47 = vadd.f32 %v680_v42, %v938_v30  ;;  %564 = vst [vmem:[%s946_s4 + $0x70] sm:$0xff] %v539_v43  ;;  %v483_v48 = vadd.f32 %v722_v44, %v938_v30 }
  0xf6   : > { %v682_v49 = vpop.f32.mrf.mxu0  ;;  %v724_v50 = vpop.f32.mrf.mxu1 }
  0xf7   : > { %v526_v51 = vmax.f32 %v427_v47, 0.0  ;;  %v683_v52 = vadd.f32 %v682_v49, %v681_v45  ;;  %v540_v53 = vmax.f32 %v483_v48, 0.0  ;;  %v725_v54 = vadd.f32 %v724_v50, %v723_v46 }
  0xf8   : > { %v684_v55 = vpop.f32.mrf.mxu0  ;;  %v726_v56 = vpop.f32.mrf.mxu1 }
  0xf9   : > { %551 = vst [vmem:[%s946_s4 + $0x8] sm:$0xff] %v526_v51  ;;  %v432_v57 = vadd.f32 %v683_v52, %v938_v30  ;;  %565 = vst [vmem:[%s946_s4 + $0x78] sm:$0xff] %v540_v53  ;;  %v488_v58 = vadd.f32 %v725_v54, %v938_v30 }
  0xfa   : > { %v685_v59 = vpop.f32.mrf.mxu0  ;;  %v727_v60 = vpop.f32.mrf.mxu1 }
  0xfb   : > { %v527_v61 = vmax.f32 %v432_v57, 0.0  ;;  %v686_v62 = vadd.f32 %v685_v59, %v684_v55  ;;  %v541_v63 = vmax.f32 %v488_v58, 0.0  ;;  %v728_v0 = vadd.f32 %v727_v60, %v726_v56 }
  0xfc   : > { %v687_v1 = vpop.f32.mrf.mxu0  ;;  %v729_v2 = vpop.f32.mrf.mxu1 }
  0xfd   : > { %552 = vst [vmem:[%s946_s4 + $0x10] sm:$0xff] %v527_v61  ;;  %v435_v3 = vadd.f32 %v686_v62, %v938_v30  ;;  %566 = vst [vmem:[%s946_s4 + $0x80] sm:$0xff] %v541_v63  ;;  %v491_v4 = vadd.f32 %v728_v0, %v938_v30 }
  0xfe   : > { %v688_v5 = vpop.f32.mrf.mxu0  ;;  %v730_v6 = vpop.f32.mrf.mxu1 }
  0xff   : > { %v528_v7 = vmax.f32 %v435_v3, 0.0  ;;  %v689_v8 = vadd.f32 %v688_v5, %v687_v1  ;;  %v542_v9 = vmax.f32 %v491_v4, 0.0  ;;  %v731_v10 = vadd.f32 %v730_v6, %v729_v2 }
 0x100   : > { %v690_v11 = vpop.f32.mrf.mxu0  ;;  %v732_v12 = vpop.f32.mrf.mxu1 }
 0x101   : > { %553 = vst [vmem:[%s946_s4 + $0x18] sm:$0xff] %v528_v7  ;;  %v440_v13 = vadd.f32 %v689_v8, %v938_v30  ;;  %567 = vst [vmem:[%s946_s4 + $0x88] sm:$0xff] %v542_v9  ;;  %v496_v14 = vadd.f32 %v731_v10, %v938_v30 }
 0x102   : > { %v691_v15 = vpop.f32.mrf.mxu0  ;;  %v733_v16 = vpop.f32.mrf.mxu1 }
 0x103   : > { %v529_v17 = vmax.f32 %v440_v13, 0.0  ;;  %v692_v18 = vadd.f32 %v691_v15, %v690_v11  ;;  %v543_v19 = vmax.f32 %v496_v14, 0.0  ;;  %v734_v20 = vadd.f32 %v733_v16, %v732_v12 }
 0x104   : > { %v693_v21 = vpop.f32.mrf.mxu0  ;;  %v735_v22 = vpop.f32.mrf.mxu1 }
 0x105   : > { %554 = vst [vmem:[%s946_s4 + $0x20] sm:$0xff] %v529_v17  ;;  %v443_v23 = vadd.f32 %v692_v18, %v938_v30  ;;  %568 = vst [vmem:[%s946_s4 + $0x90] sm:$0xff] %v543_v19  ;;  %v499_v24 = vadd.f32 %v734_v20, %v938_v30 }
 0x106   : > { %v694_v25 = vpop.f32.mrf.mxu0  ;;  %v736_v26 = vpop.f32.mrf.mxu1 }
 0x107   : > { %v530_v27 = vmax.f32 %v443_v23, 0.0  ;;  %v695_v28 = vadd.f32 %v694_v25, %v693_v21  ;;  %v544_v29 = vmax.f32 %v499_v24, 0.0  ;;  %v737_v31 = vadd.f32 %v736_v26, %v735_v22 }
 0x108   : > { %v696_v32 = vpop.f32.mrf.mxu0  ;;  %v738_v33 = vpop.f32.mrf.mxu1 }
 0x109   : > { %555 = vst [vmem:[%s946_s4 + $0x28] sm:$0xff] %v530_v27  ;;  %v448_v34 = vadd.f32 %v695_v28, %v938_v30  ;;  %569 = vst [vmem:[%s946_s4 + $0x98] sm:$0xff] %v544_v29  ;;  %v504_v35 = vadd.f32 %v737_v31, %v938_v30 }
 0x10a   : > { %v697_v36 = vpop.f32.mrf.mxu0  ;;  %v739_v37 = vpop.f32.mrf.mxu1 }
 0x10b   : > { %v531_v38 = vmax.f32 %v448_v34, 0.0  ;;  %v698_v39 = vadd.f32 %v697_v36, %v696_v32  ;;  %v545_v40 = vmax.f32 %v504_v35, 0.0  ;;  %v740_v41 = vadd.f32 %v739_v37, %v738_v33 }
 0x10c   : > { %v699_v42 = vpop.f32.mrf.mxu0  ;;  %v741_v43 = vpop.f32.mrf.mxu1 }
 0x10d   : > { %556 = vst [vmem:[%s946_s4 + $0x30] sm:$0xff] %v531_v38  ;;  %v451_v44 = vadd.f32 %v698_v39, %v938_v30  ;;  %570 = vst [vmem:[%s946_s4 + $0xa0] sm:$0xff] %v545_v40  ;;  %v507_v45 = vadd.f32 %v740_v41, %v938_v30 }
 0x10e   : > { %v700_v46 = vpop.f32.mrf.mxu0  ;;  %v742_v47 = vpop.f32.mrf.mxu1 }
 0x10f   : > { %v532_v48 = vmax.f32 %v451_v44, 0.0  ;;  %v701_v49 = vadd.f32 %v700_v46, %v699_v42  ;;  %v546_v50 = vmax.f32 %v507_v45, 0.0  ;;  %v743_v51 = vadd.f32 %v742_v47, %v741_v43 }
 0x110   : > { %v702_v52 = vpop.f32.mrf.mxu0  ;;  %v744_v53 = vpop.f32.mrf.mxu1 }
 0x111   : > { %557 = vst [vmem:[%s946_s4 + $0x38] sm:$0xff] %v532_v48  ;;  %v456_v54 = vadd.f32 %v701_v49, %v938_v30  ;;  %571 = vst [vmem:[%s946_s4 + $0xa8] sm:$0xff] %v546_v50  ;;  %v512_v55 = vadd.f32 %v743_v51, %v938_v30 }
 0x112   : > { %v703_v56 = vpop.f32.mrf.mxu0  ;;  %v745_v57 = vpop.f32.mrf.mxu1 }
 0x113   : > { %v533_v58 = vmax.f32 %v456_v54, 0.0  ;;  %v704_v59 = vadd.f32 %v703_v56, %v702_v52  ;;  %v547_v60 = vmax.f32 %v512_v55, 0.0  ;;  %v746_v61 = vadd.f32 %v745_v57, %v744_v53 }
 0x114   : > { %v705_v62 = vpop.f32.mrf.mxu0  ;;  %v747_v63 = vpop.f32.mrf.mxu1 }
 0x115   : > { %558 = vst [vmem:[%s946_s4 + $0x40] sm:$0xff] %v533_v58  ;;  %v459_v0 = vadd.f32 %v704_v59, %v938_v30  ;;  %572 = vst [vmem:[%s946_s4 + $0xb0] sm:$0xff] %v547_v60  ;;  %v515_v1 = vadd.f32 %v746_v61, %v938_v30 }
 0x116   : > { %v706_v2 = vpop.f32.mrf.mxu0  ;;  %v748_v3 = vpop.f32.mrf.mxu1 }
 0x117   : > { %v534_v4 = vmax.f32 %v459_v0, 0.0  ;;  %v707_v5 = vadd.f32 %v706_v2, %v705_v62  ;;  %v548_v6 = vmax.f32 %v515_v1, 0.0  ;;  %v749_v7 = vadd.f32 %v748_v3, %v747_v63 }
 0x118   : > { %v708_v8 = vpop.f32.mrf.mxu0  ;;  %v750_v9 = vpop.f32.mrf.mxu1 }
 0x119   : > { %559 = vst [vmem:[%s946_s4 + $0x48] sm:$0xff] %v534_v4  ;;  %v464_v10 = vadd.f32 %v707_v5, %v938_v30  ;;  %573 = vst [vmem:[%s946_s4 + $0xb8] sm:$0xff] %v548_v6  ;;  %v520_v11 = vadd.f32 %v749_v7, %v938_v30 }
 0x11a   : > { %v709_v12 = vpop.f32.mrf.mxu0  ;;  %v751_v13 = vpop.f32.mrf.mxu1 }
 0x11b   : > { %v535_v14 = vmax.f32 %v464_v10, 0.0  ;;  %v710_v15 = vadd.f32 %v709_v12, %v708_v8  ;;  %v549_v16 = vmax.f32 %v520_v11, 0.0 }
 0x11c   : > { %v711_v17 = vpop.f32.mrf.mxu0 }
 0x11d   : > { %560 = vst [vmem:[%s946_s4 + $0x50] sm:$0xff] %v535_v14  ;;  %v467_v18 = vadd.f32 %v710_v15, %v938_v30  ;;  %574 = vst [vmem:[%s946_s4 + $0xc0] sm:$0xff] %v549_v16 }
 0x11e   : > { %v712_v19 = vpop.f32.mrf.mxu0 }
 0x11f   : > { %v536_v20 = vmax.f32 %v467_v18, 0.0  ;;  %v713_v21 = vadd.f32 %v712_v19, %v711_v17 }
 0x120   : > { %v714_v22 = vpop.f32.mrf.mxu0 }
 0x121   : > { %561 = vst [vmem:[%s946_s4 + $0x58] sm:$0xff] %v536_v20  ;;  %v472_v23 = vadd.f32 %v713_v21, %v938_v30 }
 0x122   : > { %v715_v24 = vpop.f32.mrf.mxu0 }
 0x123   : > { %v537_v25 = vmax.f32 %v472_v23, 0.0  ;;  %v716_v26 = vadd.f32 %v715_v24, %v714_v22 }
 0x125   : > { %562 = vst [vmem:[%s946_s4 + $0x60] sm:$0xff] %v537_v25  ;;  %v475_v27 = vadd.f32 %v716_v26, %v938_v30 }
 0x127   : > { %v538_v28 = vmax.f32 %v475_v27, 0.0 }
 0x129   : > { %563 = vst [vmem:[%s946_s4 + $0x68] sm:$0xff] %v538_v28 }
 0x12a PF: > { %s13_s12 = sadd.s32 1, %s799_s12  }
 0x12b   : > { %p10_p4 = scmp.ge.s32.totalorder %s13_s12, 6  }
 0x12d   :  { %12 = sbr.rel (!%p10_p4) target bundleno = 1 (0x1), region = 62 }

// kernel: _forward_arrays.5
= control target key start
LH: loop header
LB: loop body
LE: loop exit
PB: predicated region body
PF: predicated region fallthrough
CT: control target
= control target key end

     0   :  { %s1378_s1 = inlined_call_operand.vmem [shape: bf16[512,128], index: 1, kind: input, shape index: {}]   ;;  %s1379_s0 = inlined_call_operand.vmem [shape: f32[168,512], index: 0, kind: input, shape index: {}]   ;;  %s1380_s2 = inlined_call_operand.vmem [shape: f32[1,128], index: 2, kind: input, shape index: {}]   ;;  %s1381_s3 = inlined_call_operand.vmem [shape: f32[168,128], index: 3, kind: output, shape index: {}]  }
   0x1   :  { %v889_v0 = vld [vmem:[%s1378_s1 + $0x78] sm:$0xff]   ;;  %v893_v4 = vld [vmem:[%s1378_s1 + $0x70] sm:$0xff]   ;;  %v897_v8 = vld [vmem:[%s1378_s1 + $0x68] sm:$0xff]  }
   0x2   :  { %v890_v1 = vld [vmem:[%s1378_s1 + $0xf8] sm:$0xff]   ;;  %725 = vmatprep.subr.bf16.mxu0 %v889_v0  ;;  %v894_v5 = vld [vmem:[%s1378_s1 + $0xf0] sm:$0xff]   ;;  %v898_v9 = vld [vmem:[%s1378_s1 + $0xe8] sm:$0xff]  }
   0x3   :  { %v891_v2 = vld [vmem:[%s1378_s1 + $0x38] sm:$0xff]   ;;  %807 = vmatprep.subr.bf16.mxu1 %v890_v1  ;;  %v895_v6 = vld [vmem:[%s1378_s1 + $0x30] sm:$0xff]   ;;  %v899_v10 = vld [vmem:[%s1378_s1 + $0x28] sm:$0xff]  }
   0x4   :  { %v892_v3 = vld [vmem:[%s1378_s1 + $0xb8] sm:$0xff]   ;;  %726 = vmatpush3.bf16.msra.mxu0 %v891_v2  ;;  %v896_v7 = vld [vmem:[%s1378_s1 + $0xb0] sm:$0xff]   ;;  %v900_v11 = vld [vmem:[%s1378_s1 + $0xa8] sm:$0xff]  }
   0x5   :  { %808 = vmatpush3.bf16.msra.mxu1 %v892_v3  ;;  %727 = vmatprep.subr.bf16.mxu0 %v893_v4  ;;  %v901_v12 = vld [vmem:[%s1378_s1 + $0x60] sm:$0xff]   ;;  %v905_v16 = vld [vmem:[%s1378_s1 + $0x58] sm:$0xff]   ;;  %v909_v20 = vld [vmem:[%s1378_s1 + $0x50] sm:$0xff]  }
   0x6   :  { %809 = vmatprep.subr.bf16.mxu1 %v894_v5  ;;  %v902_v13 = vld [vmem:[%s1378_s1 + $0xe0] sm:$0xff]   ;;  %v906_v17 = vld [vmem:[%s1378_s1 + $0xd8] sm:$0xff]   ;;  %v910_v21 = vld [vmem:[%s1378_s1 + $0xd0] sm:$0xff]  }
   0x7   :  { %v903_v14 = vld [vmem:[%s1378_s1 + $0x20] sm:$0xff]   ;;  %v907_v18 = vld [vmem:[%s1378_s1 + $0x18] sm:$0xff]   ;;  %v911_v22 = vld [vmem:[%s1378_s1 + $0x10] sm:$0xff]  }
   0x8   :  { %728 = vmatpush3.bf16.msra.mxu0 %v895_v6  ;;  %v904_v15 = vld [vmem:[%s1378_s1 + $0xa0] sm:$0xff]   ;;  %v908_v19 = vld [vmem:[%s1378_s1 + $0x98] sm:$0xff]   ;;  %v912_v23 = vld [vmem:[%s1378_s1 + $0x90] sm:$0xff]  }
   0x9   :  { %810 = vmatpush3.bf16.msra.mxu1 %v896_v7  ;;  %729 = vmatprep.subr.bf16.mxu0 %v897_v8  ;;  %v913_v24 = vld [vmem:[%s1378_s1 + $0x48] sm:$0xff]   ;;  %v917_v28 = vld [vmem:[%s1378_s1 + $0x40] sm:$0xff]   ;;  %v18_v34 = vld [vmem:[%s1379_s0 + $0x18] sm:$0xff] }
   0xa   :  { %811 = vmatprep.subr.bf16.mxu1 %v898_v9  ;;  %v914_v25 = vld [vmem:[%s1378_s1 + $0xc8] sm:$0xff]   ;;  %v918_v29 = vld [vmem:[%s1378_s1 + $0xc0] sm:$0xff]   ;;  %v22_v36 = vld [vmem:[%s1379_s0 + $0x38] sm:$0xff] }
   0xb   :  { %v915_v26 = vld [vmem:[%s1378_s1 + $0x8] sm:$0xff]   ;;  %v919_v30 = vld [vmem:[%s1378_s1] sm:$0xff]   ;;  %v102_v39 = vpack.c.bf16 %v22_v36, %v18_v34  ;;  %v17_v41 = vld [vmem:[%s1379_s0 + $0x10] sm:$0xff] }
   0xc   :  { %730 = vmatpush3.bf16.msra.mxu0 %v899_v10  ;;  %v916_v27 = vld [vmem:[%s1378_s1 + $0x88] sm:$0xff]   ;;  %v920_v31 = vld [vmem:[%s1378_s1 + $0x80] sm:$0xff]   ;;  %v21_v42 = vld [vmem:[%s1379_s0 + $0x30] sm:$0xff] }
   0xd   :  { %812 = vmatpush3.bf16.msra.mxu1 %v900_v11  ;;  %731 = vmatprep.subr.bf16.mxu0 %v901_v12  ;;  %v16_v32 = vld [vmem:[%s1379_s0 + $0x8] sm:$0xff]  ;;  %v15_v37 = vld [vmem:[%s1379_s0] sm:$0xff]  ;;  %v101_v44 = vpack.c.bf16 %v21_v42, %v17_v41  ;;  %v26_v46 = vld [vmem:[%s1379_s0 + $0x58] sm:$0xff] }
   0xe   :  { %813 = vmatprep.subr.bf16.mxu1 %v902_v13  ;;  %v20_v33 = vld [vmem:[%s1379_s0 + $0x28] sm:$0xff]  ;;  %v19_v38 = vld [vmem:[%s1379_s0 + $0x20] sm:$0xff]  ;;  %v30_v47 = vld [vmem:[%s1379_s0 + $0x78] sm:$0xff]  ;;  %558 = vmatprep.mubr.bf16.mxu1 %v102_v39 }
   0xf   :  { %v100_v35 = vpack.c.bf16 %v20_v33, %v16_v32  ;;  %v99_v40 = vpack.c.bf16 %v19_v38, %v15_v37  ;;  %v24_v43 = vld [vmem:[%s1379_s0 + $0x48] sm:$0xff]  ;;  %v106_v49 = vpack.c.bf16 %v30_v47, %v26_v46  ;;  %v23_v50 = vld [vmem:[%s1379_s0 + $0x40] sm:$0xff]  ;;  %v25_v52 = vld [vmem:[%s1379_s0 + $0x50] sm:$0xff] }
  0x10   :  { %732 = vmatpush3.bf16.msra.mxu0 %v903_v14  ;;  %v28_v45 = vld [vmem:[%s1379_s0 + $0x68] sm:$0xff]  ;;  %v27_v51 = vld [vmem:[%s1379_s0 + $0x60] sm:$0xff]  ;;  %v29_v53 = vld [vmem:[%s1379_s0 + $0x70] sm:$0xff] }
  0x11   :  { %814 = vmatpush3.bf16.msra.mxu1 %v904_v15  ;;  %733 = vmatprep.subr.bf16.mxu0 %v905_v16  ;;  %v104_v48 = vpack.c.bf16 %v28_v45, %v24_v43  ;;  %v32_v54 = vld [vmem:[%s1379_s0 + $0x88] sm:$0xff]  ;;  %v34_v56 = vld [vmem:[%s1379_s0 + $0x98] sm:$0xff]  ;;  %v103_v58 = vpack.c.bf16 %v27_v51, %v23_v50  ;;  %v105_v59 = vpack.c.bf16 %v29_v53, %v25_v52  ;;  %v31_v62 = vld [vmem:[%s1379_s0 + $0x80] sm:$0xff] }
  0x12   :  { %815 = vmatprep.subr.bf16.mxu1 %v906_v17  ;;  %438 = vmatprep.mubr.bf16.mxu0 %v100_v35  ;;  %v36_v55 = vld [vmem:[%s1379_s0 + $0xa8] sm:$0xff]  ;;  %v38_v57 = vld [vmem:[%s1379_s0 + $0xb8] sm:$0xff]  ;;  %v35_v63 = vld [vmem:[%s1379_s0 + $0xa0] sm:$0xff] }
  0x13   :  { %v108_v60 = vpack.c.bf16 %v36_v55, %v32_v54  ;;  %v110_v61 = vpack.c.bf16 %v38_v57, %v34_v56  ;;  %v33_v0 = vld [vmem:[%s1379_s0 + $0x90] sm:$0xff]  ;;  %v40_v2 = vld [vmem:[%s1379_s0 + $0xc8] sm:$0xff]  ;;  %v42_v4 = vld [vmem:[%s1379_s0 + $0xd8] sm:$0xff]  ;;  %v107_v6 = vpack.c.bf16 %v35_v63, %v31_v62 }
  0x14   :  { %734 = vmatpush3.bf16.msra.mxu0 %v907_v18  ;;  %v37_v1 = vld [vmem:[%s1379_s0 + $0xb0] sm:$0xff]  ;;  %v44_v3 = vld [vmem:[%s1379_s0 + $0xe8] sm:$0xff]  ;;  %v46_v5 = vld [vmem:[%s1379_s0 + $0xf8] sm:$0xff] }
  0x15   :  { %816 = vmatpush3.bf16.msra.mxu1 %v908_v19  ;;  %735 = vmatprep.subr.bf16.mxu0 %v909_v20  ;;  %v109_v7 = vpack.c.bf16 %v37_v1, %v33_v0  ;;  %v112_v8 = vpack.c.bf16 %v44_v3, %v40_v2  ;;  %v114_v9 = vpack.c.bf16 %v46_v5, %v42_v4  ;;  %v39_v10 = vld [vmem:[%s1379_s0 + $0xc0] sm:$0xff]  ;;  %v41_v12 = vld [vmem:[%s1379_s0 + $0xd0] sm:$0xff]  ;;  %v48_v14 = vld [vmem:[%s1379_s0 + $0x108] sm:$0xff] }
  0x16   :  { %817 = vmatprep.subr.bf16.mxu1 %v910_v21  ;;  %v43_v11 = vld [vmem:[%s1379_s0 + $0xe0] sm:$0xff]  ;;  %v45_v13 = vld [vmem:[%s1379_s0 + $0xf0] sm:$0xff]  ;;  %v52_v15 = vld [vmem:[%s1379_s0 + $0x128] sm:$0xff] }
  0x17   :  { %v50_v16 = vld [vmem:[%s1379_s0 + $0x118] sm:$0xff]  ;;  %v111_v18 = vpack.c.bf16 %v43_v11, %v39_v10  ;;  %v113_v19 = vpack.c.bf16 %v45_v13, %v41_v12  ;;  %v116_v20 = vpack.c.bf16 %v52_v15, %v48_v14  ;;  %v55_v34 = vld [vmem:[%s1379_s0 + $0x140] sm:$0xff]  ;;  %v57_v36 = vld [vmem:[%s1379_s0 + $0x150] sm:$0xff] }
  0x18   :  { %736 = vmatpush3.bf16.msra.mxu0 %v911_v22  ;;  %v54_v17 = vld [vmem:[%s1379_s0 + $0x138] sm:$0xff]  ;;  %v47_v22 = vld [vmem:[%s1379_s0 + $0x100] sm:$0xff]  ;;  %v61_v37 = vld [vmem:[%s1379_s0 + $0x170] sm:$0xff] }
  0x19   :  { %818 = vmatpush3.bf16.msra.mxu1 %v912_v23  ;;  %737 = vmatprep.subr.bf16.mxu0 %v913_v24  ;;  %v118_v21 = vpack.c.bf16 %v54_v17, %v50_v16  ;;  %v51_v23 = vld [vmem:[%s1379_s0 + $0x120] sm:$0xff]  ;;  %v49_v24 = vld [vmem:[%s1379_s0 + $0x110] sm:$0xff]  ;;  %v64_v38 = vld [vmem:[%s1379_s0 + $0x188] sm:$0xff]  ;;  %v121_v43 = vpack.c.bf16 %v61_v37, %v57_v36 }
  0x1a   :  { %819 = vmatprep.subr.bf16.mxu1 %v914_v25  ;;  %v53_v25 = vld [vmem:[%s1379_s0 + $0x130] sm:$0xff]  ;;  %v59_v35 = vld [vmem:[%s1379_s0 + $0x160] sm:$0xff]  ;;  %v68_v39 = vld [vmem:[%s1379_s0 + $0x1a8] sm:$0xff] }
  0x1b   :  { %v70_v41 = vld [vmem:[%s1379_s0 + $0x1b8] sm:$0xff]  ;;  %v119_v42 = vpack.c.bf16 %v59_v35, %v55_v34  ;;  %v63_v46 = vld [vmem:[%s1379_s0 + $0x180] sm:$0xff]  ;;  %v72_v50 = vld [vmem:[%s1379_s0 + $0x1c8] sm:$0xff] }
  0x1c   :  { %738 = vmatpush3.bf16.msra.mxu0 %v915_v26  ;;  %v56_v26 = vld [vmem:[%s1379_s0 + $0x148] sm:$0xff]  ;;  %v67_v47 = vld [vmem:[%s1379_s0 + $0x1a0] sm:$0xff]  ;;  %v74_v52 = vld [vmem:[%s1379_s0 + $0x1d8] sm:$0xff] }
  0x1d   :  { %820 = vmatpush3.bf16.msra.mxu1 %v916_v27  ;;  %739 = vmatprep.subr.bf16.mxu0 %v917_v28  ;;  %v60_v27 = vld [vmem:[%s1379_s0 + $0x168] sm:$0xff]  ;;  %v58_v28 = vld [vmem:[%s1379_s0 + $0x158] sm:$0xff]  ;;  %v123_v54 = vpack.c.bf16 %v67_v47, %v63_v46  ;;  %v1292_v34 = vld [vmem:[%s1380_s2] ss:$0 sm:$0xff] }
  0x1e   :  { %821 = vmatprep.subr.bf16.mxu1 %v918_v29  ;;  %v62_v29 = vld [vmem:[%s1379_s0 + $0x178] sm:$0xff]  ;;  %v120_v32 = vpack.c.bf16 %v60_v27, %v56_v26  ;;  %v76_v51 = vld [vmem:[%s1379_s0 + $0x1e8] sm:$0xff] }
  0x1f   :  { %v122_v33 = vpack.c.bf16 %v62_v29, %v58_v28  ;;  %v78_v53 = vld [vmem:[%s1379_s0 + $0x1f8] sm:$0xff]  ;;  %v128_v56 = vpack.c.bf16 %v76_v51, %v72_v50  ;;  %v80_v62 = vld [vmem:[%s1379_s0 + $0x208] sm:$0xff]  ;;  %v95_v28 = vld [vmem:[%s1379_s0 + $0x280] sm:$0xff] }
  0x20   :  { %740 = vmatpush3.bf16.msra.mxu0 %v919_v30  ;;  %v115_v30 = vpack.c.bf16 %v51_v23, %v47_v22  ;;  %v130_v57 = vpack.c.bf16 %v78_v53, %v74_v52  ;;  %v84_v63 = vld [vmem:[%s1379_s0 + $0x228] sm:$0xff]  ;;  %v82_v0 = vld [vmem:[%s1379_s0 + $0x218] sm:$0xff]  ;;  %v97_v29 = vld [vmem:[%s1379_s0 + $0x290] sm:$0xff] }
  0x21   :  { %822 = vmatpush3.bf16.msra.mxu1 %v920_v31  ;;  %v117_v31 = vpack.c.bf16 %v53_v25, %v49_v24  ;;  %v86_v1 = vld [vmem:[%s1379_s0 + $0x238] sm:$0xff]  ;;  %v132_v4 = vpack.c.bf16 %v84_v63, %v80_v62  ;;  %v88_v10 = vld [vmem:[%s1379_s0 + $0x248] sm:$0xff] }
  0x22   :  { %v134_v5 = vpack.c.bf16 %v86_v1, %v82_v0  ;;  %v92_v11 = vld [vmem:[%s1379_s0 + $0x268] sm:$0xff]  ;;  %v90_v12 = vld [vmem:[%s1379_s0 + $0x258] sm:$0xff] }
  0x23   :  { %439 = vmatmul.mubr.bf16.vlgmr.msra.gmra.mxu0 %v99_v40  ;;  %v66_v40 = vld [vmem:[%s1379_s0 + $0x198] sm:$0xff]  ;;  %v136_v16 = vpack.c.bf16 %v92_v11, %v88_v10  ;;  %v96_v22 = vld [vmem:[%s1379_s0 + $0x288] sm:$0xff] }
  0x24   :  { %559 = vmatmul.mubr.bf16.vlgmr.msra.gmra.mxu1 %v101_v44  ;;  %446 = vmatprep.mubr.bf16.mxu0 %v104_v48  ;;  %v124_v44 = vpack.c.bf16 %v68_v39, %v64_v38  ;;  %v126_v45 = vpack.c.bf16 %v70_v41, %v66_v40  ;;  %v65_v48 = vld [vmem:[%s1379_s0 + $0x190] sm:$0xff]  ;;  %v94_v13 = vld [vmem:[%s1379_s0 + $0x278] sm:$0xff]  ;;  %v140_v26 = vpack.c.bf16 %v96_v22, %v96_v22 }
  0x25   :  { %566 = vmatprep.mubr.bf16.mxu1 %v106_v49  ;;  %v69_v49 = vld [vmem:[%s1379_s0 + $0x1b0] sm:$0xff]  ;;  %v138_v17 = vpack.c.bf16 %v94_v13, %v90_v12  ;;  %v98_v23 = vld [vmem:[%s1379_s0 + $0x298] sm:$0xff] }
  0x26   :  { %v125_v55 = vpack.c.bf16 %v69_v49, %v65_v48  ;;  %v142_v27 = vpack.c.bf16 %v98_v23, %v98_v23 }
  0x2b   :  { %447 = vmatmul.mubr.bf16.gmra.mxu0 %v103_v58  ;;  %v71_v58 = vld [vmem:[%s1379_s0 + $0x1c0] sm:$0xff] }
  0x2c   :  { %567 = vmatmul.mubr.bf16.gmra.mxu1 %v105_v59  ;;  %454 = vmatprep.mubr.bf16.mxu0 %v108_v60  ;;  %v75_v59 = vld [vmem:[%s1379_s0 + $0x1e0] sm:$0xff]  ;;  %v73_v60 = vld [vmem:[%s1379_s0 + $0x1d0] sm:$0xff] }
  0x2d   :  { %574 = vmatprep.mubr.bf16.mxu1 %v110_v61  ;;  %v77_v61 = vld [vmem:[%s1379_s0 + $0x1f0] sm:$0xff]  ;;  %v127_v2 = vpack.c.bf16 %v75_v59, %v71_v58 }
  0x2e   :  { %v129_v3 = vpack.c.bf16 %v77_v61, %v73_v60 }
  0x33   :  { %455 = vmatmul.mubr.bf16.gmra.mxu0 %v107_v6  ;;  %v79_v6 = vld [vmem:[%s1379_s0 + $0x200] sm:$0xff] }
  0x34   :  { %575 = vmatmul.mubr.bf16.gmra.mxu1 %v109_v7  ;;  %462 = vmatprep.mubr.bf16.mxu0 %v112_v8  ;;  %v83_v7 = vld [vmem:[%s1379_s0 + $0x220] sm:$0xff]  ;;  %v81_v8 = vld [vmem:[%s1379_s0 + $0x210] sm:$0xff] }
  0x35   :  { %582 = vmatprep.mubr.bf16.mxu1 %v114_v9  ;;  %v85_v9 = vld [vmem:[%s1379_s0 + $0x230] sm:$0xff]  ;;  %v131_v14 = vpack.c.bf16 %v83_v7, %v79_v6 }
  0x36   :  { %v133_v15 = vpack.c.bf16 %v85_v9, %v81_v8 }
  0x3b   :  { %463 = vmatmul.mubr.bf16.gmra.mxu0 %v111_v18  ;;  %v87_v18 = vld [vmem:[%s1379_s0 + $0x240] sm:$0xff] }
  0x3c   :  { %583 = vmatmul.mubr.bf16.gmra.mxu1 %v113_v19  ;;  %470 = vmatprep.mubr.bf16.mxu0 %v116_v20  ;;  %v91_v19 = vld [vmem:[%s1379_s0 + $0x260] sm:$0xff]  ;;  %v89_v20 = vld [vmem:[%s1379_s0 + $0x250] sm:$0xff] }
  0x3d   :  { %590 = vmatprep.mubr.bf16.mxu1 %v118_v21  ;;  %v93_v21 = vld [vmem:[%s1379_s0 + $0x270] sm:$0xff]  ;;  %v135_v24 = vpack.c.bf16 %v91_v19, %v87_v18 }
  0x3e   :  { %v137_v25 = vpack.c.bf16 %v93_v21, %v89_v20 }
  0x43   :  { %471 = vmatmul.mubr.bf16.gmra.mxu0 %v115_v30  ;;  %v139_v30 = vpack.c.bf16 %v95_v28, %v95_v28 }
  0x44   :  { %591 = vmatmul.mubr.bf16.gmra.mxu1 %v117_v31  ;;  %478 = vmatprep.mubr.bf16.mxu0 %v120_v32  ;;  %v141_v31 = vpack.c.bf16 %v97_v29, %v97_v29 }
  0x45   :  { %598 = vmatprep.mubr.bf16.mxu1 %v122_v33 }
  0x4b   :  { %479 = vmatmul.mubr.bf16.gmra.mxu0 %v119_v42 }
  0x4c   :  { %599 = vmatmul.mubr.bf16.gmra.mxu1 %v121_v43  ;;  %486 = vmatprep.mubr.bf16.mxu0 %v124_v44 }
  0x4d   :  { %606 = vmatprep.mubr.bf16.mxu1 %v126_v45 }
  0x53   :  { %487 = vmatmul.mubr.bf16.gmra.mxu0 %v123_v54 }
  0x54   :  { %607 = vmatmul.mubr.bf16.gmra.mxu1 %v125_v55  ;;  %494 = vmatprep.mubr.bf16.mxu0 %v128_v56 }
  0x55   :  { %614 = vmatprep.mubr.bf16.mxu1 %v130_v57 }
  0x5b   :  { %495 = vmatmul.mubr.bf16.gmra.mxu0 %v127_v2 }
  0x5c   :  { %615 = vmatmul.mubr.bf16.gmra.mxu1 %v129_v3  ;;  %502 = vmatprep.mubr.bf16.mxu0 %v132_v4 }
  0x5d   :  { %622 = vmatprep.mubr.bf16.mxu1 %v134_v5 }
  0x63   :  { %503 = vmatmul.mubr.bf16.gmra.mxu0 %v131_v14 }
  0x64   :  { %623 = vmatmul.mubr.bf16.gmra.mxu1 %v133_v15  ;;  %510 = vmatprep.mubr.bf16.mxu0 %v136_v16 }
  0x65   :  { %630 = vmatprep.mubr.bf16.mxu1 %v138_v17 }
  0x6b   :  { %511 = vmatmul.mubr.bf16.gmra.mxu0 %v135_v24 }
  0x6c   :  { %631 = vmatmul.mubr.bf16.gmra.mxu1 %v137_v25  ;;  %518 = vmatprep.mubr.bf16.mxu0 %v140_v26 }
  0x6d   :  { %638 = vmatprep.mubr.bf16.mxu1 %v142_v27 }
  0x73   :  { %519 = vmatmul.mubr.bf16.gmra.mxu0 %v139_v30 }
  0x74   :  { %639 = vmatmul.mubr.bf16.gmra.mxu1 %v141_v31 }
  0xe3   :  { %v741_v32 = vpop.f32.mrf.mxu0 }
  0xe4   :  { %v823_v33 = vpop.f32.mrf.mxu1 }
  0xe5   :  { %v742_v35 = vpop.f32.mrf.mxu0 }
  0xe6   :  { %v743_v36 = vadd.f32 %v742_v35, %v741_v32  ;;  %v824_v37 = vpop.f32.mrf.mxu1 }
  0xe7   :  { %v744_v38 = vpop.f32.mrf.mxu0  ;;  %v825_v40 = vadd.f32 %v824_v37, %v823_v33 }
  0xe8   :  { %v441_v39 = vadd.f32 %v743_v36, %v1292_v34  ;;  %v826_v41 = vpop.f32.mrf.mxu1 }
  0xe9   :  { %v745_v42 = vpop.f32.mrf.mxu0 }
  0xea   :  { %v561_v43 = vadd.f32 %v825_v40, %v441_v39  ;;  %v746_v44 = vadd.f32 %v745_v42, %v744_v38  ;;  %v827_v45 = vpop.f32.mrf.mxu1 }
  0xeb   :  { %v747_v46 = vpop.f32.mrf.mxu0  ;;  %v828_v49 = vadd.f32 %v827_v45, %v826_v41 }
  0xec   :  { %v646_v47 = vmax.f32 %v561_v43, 0.0  ;;  %v444_v48 = vadd.f32 %v746_v44, %v1292_v34  ;;  %v829_v50 = vpop.f32.mrf.mxu1 }
  0xed   :  { %v748_v51 = vpop.f32.mrf.mxu0 }
  0xee   :  { %667 = vst [vmem:[%s1381_s3] sm:$0xff] %v646_v47  ;;  %v564_v52 = vadd.f32 %v828_v49, %v444_v48  ;;  %v749_v53 = vadd.f32 %v748_v51, %v747_v46  ;;  %v830_v54 = vpop.f32.mrf.mxu1 }
  0xef   :  { %v750_v55 = vpop.f32.mrf.mxu0  ;;  %v831_v58 = vadd.f32 %v830_v54, %v829_v50 }
  0xf0   :  { %v647_v56 = vmax.f32 %v564_v52, 0.0  ;;  %v449_v57 = vadd.f32 %v749_v53, %v1292_v34  ;;  %v832_v59 = vpop.f32.mrf.mxu1 }
  0xf1   :  { %v751_v60 = vpop.f32.mrf.mxu0 }
  0xf2   :  { %668 = vst [vmem:[%s1381_s3 + $0x8] sm:$0xff] %v647_v56  ;;  %v569_v61 = vadd.f32 %v831_v58, %v449_v57  ;;  %v752_v62 = vadd.f32 %v751_v60, %v750_v55  ;;  %v833_v63 = vpop.f32.mrf.mxu1 }
  0xf3   :  { %v753_v0 = vpop.f32.mrf.mxu0  ;;  %v834_v3 = vadd.f32 %v833_v63, %v832_v59 }
  0xf4   :  { %v648_v1 = vmax.f32 %v569_v61, 0.0  ;;  %v452_v2 = vadd.f32 %v752_v62, %v1292_v34  ;;  %v835_v4 = vpop.f32.mrf.mxu1 }
  0xf5   :  { %v754_v5 = vpop.f32.mrf.mxu0 }
  0xf6   :  { %669 = vst [vmem:[%s1381_s3 + $0x10] sm:$0xff] %v648_v1  ;;  %v572_v6 = vadd.f32 %v834_v3, %v452_v2  ;;  %v755_v7 = vadd.f32 %v754_v5, %v753_v0  ;;  %v836_v8 = vpop.f32.mrf.mxu1 }
  0xf7   :  { %v756_v9 = vpop.f32.mrf.mxu0  ;;  %v837_v12 = vadd.f32 %v836_v8, %v835_v4 }
  0xf8   :  { %v649_v10 = vmax.f32 %v572_v6, 0.0  ;;  %v457_v11 = vadd.f32 %v755_v7, %v1292_v34  ;;  %v838_v13 = vpop.f32.mrf.mxu1 }
  0xf9   :  { %v757_v14 = vpop.f32.mrf.mxu0 }
  0xfa   :  { %670 = vst [vmem:[%s1381_s3 + $0x18] sm:$0xff] %v649_v10  ;;  %v577_v15 = vadd.f32 %v837_v12, %v457_v11  ;;  %v758_v16 = vadd.f32 %v757_v14, %v756_v9  ;;  %v839_v17 = vpop.f32.mrf.mxu1 }
  0xfb   :  { %v759_v18 = vpop.f32.mrf.mxu0  ;;  %v840_v21 = vadd.f32 %v839_v17, %v838_v13 }
  0xfc   :  { %v650_v19 = vmax.f32 %v577_v15, 0.0  ;;  %v460_v20 = vadd.f32 %v758_v16, %v1292_v34  ;;  %v841_v22 = vpop.f32.mrf.mxu1 }
  0xfd   :  { %v760_v23 = vpop.f32.mrf.mxu0 }
  0xfe   :  { %671 = vst [vmem:[%s1381_s3 + $0x20] sm:$0xff] %v650_v19  ;;  %v580_v24 = vadd.f32 %v840_v21, %v460_v20  ;;  %v761_v25 = vadd.f32 %v760_v23, %v759_v18  ;;  %v842_v26 = vpop.f32.mrf.mxu1 }
  0xff   :  { %v762_v27 = vpop.f32.mrf.mxu0  ;;  %v843_v30 = vadd.f32 %v842_v26, %v841_v22 }
 0x100   :  { %v651_v28 = vmax.f32 %v580_v24, 0.0  ;;  %v465_v29 = vadd.f32 %v761_v25, %v1292_v34  ;;  %v844_v31 = vpop.f32.mrf.mxu1 }
 0x101   :  { %v763_v32 = vpop.f32.mrf.mxu0 }
 0x102   :  { %672 = vst [vmem:[%s1381_s3 + $0x28] sm:$0xff] %v651_v28  ;;  %v585_v33 = vadd.f32 %v843_v30, %v465_v29  ;;  %v764_v35 = vadd.f32 %v763_v32, %v762_v27  ;;  %v845_v36 = vpop.f32.mrf.mxu1 }
 0x103   :  { %v765_v37 = vpop.f32.mrf.mxu0  ;;  %v846_v40 = vadd.f32 %v845_v36, %v844_v31 }
 0x104   :  { %v652_v38 = vmax.f32 %v585_v33, 0.0  ;;  %v468_v39 = vadd.f32 %v764_v35, %v1292_v34  ;;  %v847_v41 = vpop.f32.mrf.mxu1 }
 0x105   :  { %v766_v42 = vpop.f32.mrf.mxu0 }
 0x106   :  { %673 = vst [vmem:[%s1381_s3 + $0x30] sm:$0xff] %v652_v38  ;;  %v588_v43 = vadd.f32 %v846_v40, %v468_v39  ;;  %v767_v44 = vadd.f32 %v766_v42, %v765_v37  ;;  %v848_v45 = vpop.f32.mrf.mxu1 }
 0x107   :  { %v768_v46 = vpop.f32.mrf.mxu0  ;;  %v849_v49 = vadd.f32 %v848_v45, %v847_v41 }
 0x108   :  { %v653_v47 = vmax.f32 %v588_v43, 0.0  ;;  %v473_v48 = vadd.f32 %v767_v44, %v1292_v34  ;;  %v850_v50 = vpop.f32.mrf.mxu1 }
 0x109   :  { %v769_v51 = vpop.f32.mrf.mxu0 }
 0x10a   :  { %674 = vst [vmem:[%s1381_s3 + $0x38] sm:$0xff] %v653_v47  ;;  %v593_v52 = vadd.f32 %v849_v49, %v473_v48  ;;  %v770_v53 = vadd.f32 %v769_v51, %v768_v46  ;;  %v851_v54 = vpop.f32.mrf.mxu1 }
 0x10b   :  { %v771_v55 = vpop.f32.mrf.mxu0  ;;  %v852_v58 = vadd.f32 %v851_v54, %v850_v50 }
 0x10c   :  { %v654_v56 = vmax.f32 %v593_v52, 0.0  ;;  %v476_v57 = vadd.f32 %v770_v53, %v1292_v34  ;;  %v853_v59 = vpop.f32.mrf.mxu1 }
 0x10d   :  { %v772_v60 = vpop.f32.mrf.mxu0 }
 0x10e   :  { %675 = vst [vmem:[%s1381_s3 + $0x40] sm:$0xff] %v654_v56  ;;  %v596_v61 = vadd.f32 %v852_v58, %v476_v57  ;;  %v773_v62 = vadd.f32 %v772_v60, %v771_v55  ;;  %v854_v63 = vpop.f32.mrf.mxu1 }
 0x10f   :  { %v774_v0 = vpop.f32.mrf.mxu0  ;;  %v855_v3 = vadd.f32 %v854_v63, %v853_v59 }
 0x110   :  { %v655_v1 = vmax.f32 %v596_v61, 0.0  ;;  %v481_v2 = vadd.f32 %v773_v62, %v1292_v34  ;;  %v856_v4 = vpop.f32.mrf.mxu1 }
 0x111   :  { %v775_v5 = vpop.f32.mrf.mxu0 }
 0x112   :  { %676 = vst [vmem:[%s1381_s3 + $0x48] sm:$0xff] %v655_v1  ;;  %v601_v6 = vadd.f32 %v855_v3, %v481_v2  ;;  %v776_v7 = vadd.f32 %v775_v5, %v774_v0  ;;  %v857_v8 = vpop.f32.mrf.mxu1 }
 0x113   :  { %v777_v9 = vpop.f32.mrf.mxu0  ;;  %v858_v12 = vadd.f32 %v857_v8, %v856_v4 }
 0x114   :  { %v656_v10 = vmax.f32 %v601_v6, 0.0  ;;  %v484_v11 = vadd.f32 %v776_v7, %v1292_v34  ;;  %v859_v13 = vpop.f32.mrf.mxu1 }
 0x115   :  { %v778_v14 = vpop.f32.mrf.mxu0 }
 0x116   :  { %677 = vst [vmem:[%s1381_s3 + $0x50] sm:$0xff] %v656_v10  ;;  %v604_v15 = vadd.f32 %v858_v12, %v484_v11  ;;  %v779_v16 = vadd.f32 %v778_v14, %v777_v9  ;;  %v860_v17 = vpop.f32.mrf.mxu1 }
 0x117   :  { %v780_v18 = vpop.f32.mrf.mxu0  ;;  %v861_v21 = vadd.f32 %v860_v17, %v859_v13 }
 0x118   :  { %v657_v19 = vmax.f32 %v604_v15, 0.0  ;;  %v489_v20 = vadd.f32 %v779_v16, %v1292_v34  ;;  %v862_v22 = vpop.f32.mrf.mxu1 }
 0x119   :  { %v781_v23 = vpop.f32.mrf.mxu0 }
 0x11a   :  { %678 = vst [vmem:[%s1381_s3 + $0x58] sm:$0xff] %v657_v19  ;;  %v609_v24 = vadd.f32 %v861_v21, %v489_v20  ;;  %v782_v25 = vadd.f32 %v781_v23, %v780_v18  ;;  %v863_v26 = vpop.f32.mrf.mxu1 }
 0x11b   :  { %v783_v27 = vpop.f32.mrf.mxu0  ;;  %v864_v30 = vadd.f32 %v863_v26, %v862_v22 }
 0x11c   :  { %v658_v28 = vmax.f32 %v609_v24, 0.0  ;;  %v492_v29 = vadd.f32 %v782_v25, %v1292_v34  ;;  %v865_v31 = vpop.f32.mrf.mxu1 }
 0x11d   :  { %v784_v32 = vpop.f32.mrf.mxu0 }
 0x11e   :  { %679 = vst [vmem:[%s1381_s3 + $0x60] sm:$0xff] %v658_v28  ;;  %v612_v33 = vadd.f32 %v864_v30, %v492_v29  ;;  %v785_v35 = vadd.f32 %v784_v32, %v783_v27  ;;  %v866_v36 = vpop.f32.mrf.mxu1 }
 0x11f   :  { %v786_v37 = vpop.f32.mrf.mxu0  ;;  %v867_v40 = vadd.f32 %v866_v36, %v865_v31 }
 0x120   :  { %v659_v38 = vmax.f32 %v612_v33, 0.0  ;;  %v497_v39 = vadd.f32 %v785_v35, %v1292_v34  ;;  %v868_v41 = vpop.f32.mrf.mxu1 }
 0x121   :  { %v787_v42 = vpop.f32.mrf.mxu0 }
 0x122   :  { %680 = vst [vmem:[%s1381_s3 + $0x68] sm:$0xff] %v659_v38  ;;  %v617_v43 = vadd.f32 %v867_v40, %v497_v39  ;;  %v788_v44 = vadd.f32 %v787_v42, %v786_v37  ;;  %v869_v45 = vpop.f32.mrf.mxu1 }
 0x123   :  { %v789_v46 = vpop.f32.mrf.mxu0  ;;  %v870_v49 = vadd.f32 %v869_v45, %v868_v41 }
 0x124   :  { %v660_v47 = vmax.f32 %v617_v43, 0.0  ;;  %v500_v48 = vadd.f32 %v788_v44, %v1292_v34  ;;  %v871_v50 = vpop.f32.mrf.mxu1 }
 0x125   :  { %v790_v51 = vpop.f32.mrf.mxu0 }
 0x126   :  { %681 = vst [vmem:[%s1381_s3 + $0x70] sm:$0xff] %v660_v47  ;;  %v620_v52 = vadd.f32 %v870_v49, %v500_v48  ;;  %v791_v53 = vadd.f32 %v790_v51, %v789_v46  ;;  %v872_v54 = vpop.f32.mrf.mxu1 }
 0x127   :  { %v792_v55 = vpop.f32.mrf.mxu0  ;;  %v873_v58 = vadd.f32 %v872_v54, %v871_v50 }
 0x128   :  { %v661_v56 = vmax.f32 %v620_v52, 0.0  ;;  %v505_v57 = vadd.f32 %v791_v53, %v1292_v34  ;;  %v874_v59 = vpop.f32.mrf.mxu1 }
 0x129   :  { %v793_v60 = vpop.f32.mrf.mxu0 }
 0x12a   :  { %682 = vst [vmem:[%s1381_s3 + $0x78] sm:$0xff] %v661_v56  ;;  %v625_v61 = vadd.f32 %v873_v58, %v505_v57  ;;  %v794_v62 = vadd.f32 %v793_v60, %v792_v55  ;;  %v875_v63 = vpop.f32.mrf.mxu1 }
 0x12b   :  { %v795_v0 = vpop.f32.mrf.mxu0  ;;  %v876_v3 = vadd.f32 %v875_v63, %v874_v59 }
 0x12c   :  { %v662_v1 = vmax.f32 %v625_v61, 0.0  ;;  %v508_v2 = vadd.f32 %v794_v62, %v1292_v34  ;;  %v877_v4 = vpop.f32.mrf.mxu1 }
 0x12d   :  { %v796_v5 = vpop.f32.mrf.mxu0 }
 0x12e   :  { %683 = vst [vmem:[%s1381_s3 + $0x80] sm:$0xff] %v662_v1  ;;  %v628_v6 = vadd.f32 %v876_v3, %v508_v2  ;;  %v797_v7 = vadd.f32 %v796_v5, %v795_v0  ;;  %v878_v8 = vpop.f32.mrf.mxu1 }
 0x12f   :  { %v798_v9 = vpop.f32.mrf.mxu0  ;;  %v879_v12 = vadd.f32 %v878_v8, %v877_v4 }
 0x130   :  { %v663_v10 = vmax.f32 %v628_v6, 0.0  ;;  %v513_v11 = vadd.f32 %v797_v7, %v1292_v34  ;;  %v880_v13 = vpop.f32.mrf.mxu1 }
 0x131   :  { %v799_v14 = vpop.f32.mrf.mxu0 }
 0x132   :  { %684 = vst [vmem:[%s1381_s3 + $0x88] sm:$0xff] %v663_v10  ;;  %v633_v15 = vadd.f32 %v879_v12, %v513_v11  ;;  %v800_v16 = vadd.f32 %v799_v14, %v798_v9  ;;  %v881_v17 = vpop.f32.mrf.mxu1 }
 0x133   :  { %v801_v18 = vpop.f32.mrf.mxu0  ;;  %v882_v21 = vadd.f32 %v881_v17, %v880_v13 }
 0x134   :  { %v664_v19 = vmax.f32 %v633_v15, 0.0  ;;  %v516_v20 = vadd.f32 %v800_v16, %v1292_v34  ;;  %v883_v22 = vpop.f32.mrf.mxu1 }
 0x135   :  { %v802_v23 = vpop.f32.mrf.mxu0 }
 0x136   :  { %685 = vst [vmem:[%s1381_s3 + $0x90] sm:$0xff] %v664_v19  ;;  %v636_v24 = vadd.f32 %v882_v21, %v516_v20  ;;  %v803_v25 = vadd.f32 %v802_v23, %v801_v18  ;;  %v884_v26 = vpop.f32.mrf.mxu1 }
 0x137   :  { %v804_v27 = vpop.f32.mrf.mxu0  ;;  %v885_v30 = vadd.f32 %v884_v26, %v883_v22 }
 0x138   :  { %v665_v28 = vmax.f32 %v636_v24, 0.0  ;;  %v521_v29 = vadd.f32 %v803_v25, %v1292_v34  ;;  %v886_v31 = vpop.f32.mrf.mxu1 }
 0x139   :  { %v805_v32 = vpop.f32.mrf.mxu0 }
 0x13a   :  { %686 = vst [vmem:[%s1381_s3 + $0x98] sm:$0xff] %v665_v28  ;;  %v641_v33 = vadd.f32 %v885_v30, %v521_v29  ;;  %v887_v35 = vpop.f32.mrf.mxu1 }
 0x13c   :  { %v666_v36 = vmax.f32 %v641_v33, 0.0 }
 0x13e   :  { %687 = vst [vmem:[%s1381_s3 + $0xa0] sm:$0xff] %v666_v36 }

// kernel: _forward_arrays.6
= control target key start
LH: loop header
LB: loop body
LE: loop exit
PB: predicated region body
PF: predicated region fallthrough
CT: control target
= control target key end

     0   :  { %v1010_v35 = vmov 0.0   ;;  %vm1011_vm0 = vmmov 0   ;;  %s1468_s1 = inlined_call_operand.vmem [shape: bf16[640,128], index: 1, kind: input, shape index: {}]   ;;  %s1469_s0 = inlined_call_operand.vmem [shape: f32[104,640], index: 0, kind: input, shape index: {}]   ;;  %s1470_s2 = inlined_call_operand.vmem [shape: f32[1,128], index: 2, kind: input, shape index: {}]   ;;  %s1471_s3 = inlined_call_operand.vmem [shape: f32[104,128], index: 3, kind: output, shape index: {}]  }
   0x1   :  { %v970_v0 = vld [vmem:[%s1468_s1 + $0x78] sm:$0xff]   ;;  %v972_v2 = vld [vmem:[%s1468_s1 + $0x70] sm:$0xff]   ;;  %v974_v4 = vld [vmem:[%s1468_s1 + $0x68] sm:$0xff]  }
   0x2   :  { %v971_v1 = vld [vmem:[%s1468_s1 + $0x38] sm:$0xff]   ;;  %777 = vmatprep.subr.bf16.mxu0 %v970_v0  ;;  %952 = vmatprep.subr.bf16.mxu1 %v970_v0  ;;  %v973_v3 = vld [vmem:[%s1468_s1 + $0x30] sm:$0xff]   ;;  %v975_v5 = vld [vmem:[%s1468_s1 + $0x28] sm:$0xff]  }
   0x3   :  { %778 = vmatpush3.bf16.msra.mxu0 %v971_v1  ;;  %960 = vmatpush3.bf16.msra.mxu1 %v971_v1  ;;  %v976_v6 = vld [vmem:[%s1468_s1 + $0x60] sm:$0xff]   ;;  %v978_v8 = vld [vmem:[%s1468_s1 + $0x58] sm:$0xff]   ;;  %v980_v10 = vld [vmem:[%s1468_s1 + $0x50] sm:$0xff]  }
   0x4   :  { %779 = vmatprep.subr.bf16.mxu0 %v972_v2  ;;  %953 = vmatprep.subr.bf16.mxu1 %v972_v2  ;;  %v977_v7 = vld [vmem:[%s1468_s1 + $0x20] sm:$0xff]   ;;  %v979_v9 = vld [vmem:[%s1468_s1 + $0x18] sm:$0xff]   ;;  %v16_v11 = vld [vmem:[%s1469_s0 + $0x8] sm:$0xff] }
   0x5   :  { %v21_v12 = vld [vmem:[%s1469_s0 + $0x30] sm:$0xff]  ;;  %v56_v13 = vld [vmem:[%s1469_s0 + $0x148] sm:$0xff]  ;;  %v984_v20 = vld [vmem:[%s1468_s1 + $0x40] sm:$0xff]  }
   0x6   :  { %v81_v14 = vpack.c.bf16 %v21_v12, %v16_v11  ;;  %v61_v15 = vld [vmem:[%s1469_s0 + $0x170] sm:$0xff]  ;;  %v982_v18 = vld [vmem:[%s1468_s1 + $0x48] sm:$0xff]   ;;  %v985_v21 = vld [vmem:[%s1468_s1] sm:$0xff]  }
   0x7   :  { %780 = vmatpush3.bf16.msra.mxu0 %v973_v3  ;;  %961 = vmatpush3.bf16.msra.mxu1 %v973_v3  ;;  %v101_v16 = vpack.c.bf16 %v61_v15, %v56_v13  ;;  %v981_v17 = vld [vmem:[%s1468_s1 + $0x10] sm:$0xff]   ;;  %v983_v19 = vld [vmem:[%s1468_s1 + $0x8] sm:$0xff]   ;;  %v15_v22 = vld [vmem:[%s1469_s0] sm:$0xff] }
   0x8   :  { %781 = vmatprep.subr.bf16.mxu0 %v974_v4  ;;  %954 = vmatprep.subr.bf16.mxu1 %v974_v4  ;;  %v20_v23 = vld [vmem:[%s1469_s0 + $0x28] sm:$0xff]  ;;  %v55_v24 = vld [vmem:[%s1469_s0 + $0x140] sm:$0xff]  ;;  %v986_v26 = vld [vmem:[%s1468_s1 + $0xf8] sm:$0xff]  }
   0x9   :  { %474 = vmatprep.mubr.bf16.mxu0 %v81_v14  ;;  %506 = vmatprep.mubr.bf16.mxu1 %v101_v16  ;;  %v60_v25 = vld [vmem:[%s1469_s0 + $0x168] sm:$0xff]  ;;  %v26_v27 = vld [vmem:[%s1469_s0 + $0x58] sm:$0xff]  ;;  %v31_v29 = vld [vmem:[%s1469_s0 + $0x80] sm:$0xff]  ;;  %v80_v31 = vpack.c.bf16 %v20_v23, %v15_v22 }
   0xa   :  { %v987_v28 = vld [vmem:[%s1468_s1 + $0xb8] sm:$0xff]   ;;  %v100_v32 = vpack.c.bf16 %v60_v25, %v55_v24  ;;  %v71_v33 = vld [vmem:[%s1469_s0 + $0x1c0] sm:$0xff]  ;;  %v989_v36 = vld [vmem:[%s1468_s1 + $0xf0] sm:$0xff]   ;;  %v86_v39 = vpack.c.bf16 %v31_v29, %v26_v27 }
   0xb   :  { %782 = vmatpush3.bf16.msra.mxu0 %v975_v5  ;;  %962 = vmatpush3.bf16.msra.mxu1 %v975_v5  ;;  %v66_v30 = vld [vmem:[%s1469_s0 + $0x198] sm:$0xff]  ;;  %v990_v37 = vld [vmem:[%s1468_s1 + $0xb0] sm:$0xff]   ;;  %v992_v43 = vld [vmem:[%s1468_s1 + $0xe8] sm:$0xff]  }
   0xc   :  { %783 = vmatprep.subr.bf16.mxu0 %v976_v6  ;;  %955 = vmatprep.subr.bf16.mxu1 %v976_v6  ;;  %v988_v34 = vld [vmem:[%s1468_s1 + $0x138] sm:$0xff]   ;;  %v991_v38 = vld [vmem:[%s1468_s1 + $0x130] sm:$0xff]   ;;  %v106_v41 = vpack.c.bf16 %v71_v33, %v66_v30  ;;  %v36_v46 = vld [vmem:[%s1469_s0 + $0xa8] sm:$0xff] }
   0xd   :  { %v25_v40 = vld [vmem:[%s1469_s0 + $0x50] sm:$0xff]  ;;  %v30_v42 = vld [vmem:[%s1469_s0 + $0x78] sm:$0xff]  ;;  %v993_v47 = vld [vmem:[%s1468_s1 + $0xa8] sm:$0xff]  }
   0xe   :  { %v65_v44 = vld [vmem:[%s1469_s0 + $0x190] sm:$0xff]  ;;  %v70_v45 = vld [vmem:[%s1469_s0 + $0x1b8] sm:$0xff]  ;;  %v85_v49 = vpack.c.bf16 %v30_v42, %v25_v40  ;;  %v76_v51 = vld [vmem:[%s1469_s0 + $0x1e8] sm:$0xff] }
   0xf   :  { %784 = vmatpush3.bf16.msra.mxu0 %v977_v7  ;;  %963 = vmatpush3.bf16.msra.mxu1 %v977_v7  ;;  %v41_v48 = vld [vmem:[%s1469_s0 + $0xd0] sm:$0xff]  ;;  %v105_v50 = vpack.c.bf16 %v70_v45, %v65_v44  ;;  %v994_v52 = vld [vmem:[%s1468_s1 + $0x128] sm:$0xff]   ;;  %v995_v53 = vld [vmem:[%s1468_s1 + $0xe0] sm:$0xff]   ;;  %v111_v57 = vpack.c.bf16 %v76_v51, %v76_v51 }
  0x10   :  { %785 = vmatprep.subr.bf16.mxu0 %v978_v8  ;;  %956 = vmatprep.subr.bf16.mxu1 %v978_v8  ;;  %v996_v54 = vld [vmem:[%s1468_s1 + $0xa0] sm:$0xff]   ;;  %v91_v56 = vpack.c.bf16 %v41_v48, %v36_v46  ;;  %v40_v59 = vld [vmem:[%s1469_s0 + $0xc8] sm:$0xff]  ;;  %v998_v61 = vld [vmem:[%s1468_s1 + $0xd8] sm:$0xff]  }
  0x11   :  { %v997_v55 = vld [vmem:[%s1468_s1 + $0x120] sm:$0xff]   ;;  %v999_v62 = vld [vmem:[%s1468_s1 + $0x98] sm:$0xff]   ;;  %v1001_v4 = vld [vmem:[%s1468_s1 + $0xd0] sm:$0xff]  }
  0x12   :  { %v35_v58 = vld [vmem:[%s1469_s0 + $0xa0] sm:$0xff]  ;;  %v46_v63 = vld [vmem:[%s1469_s0 + $0xf8] sm:$0xff]  ;;  %v1002_v8 = vld [vmem:[%s1468_s1 + $0x90] sm:$0xff]  }
  0x13   :  { %786 = vmatpush3.bf16.msra.mxu0 %v979_v9  ;;  %964 = vmatpush3.bf16.msra.mxu1 %v979_v9  ;;  %v75_v60 = vld [vmem:[%s1469_s0 + $0x1e0] sm:$0xff]  ;;  %v90_v0 = vpack.c.bf16 %v40_v59, %v35_v58  ;;  %v1000_v3 = vld [vmem:[%s1468_s1 + $0x118] sm:$0xff]   ;;  %v45_v11 = vld [vmem:[%s1469_s0 + $0xf0] sm:$0xff] }
  0x14   :  { %787 = vmatprep.subr.bf16.mxu0 %v980_v10  ;;  %957 = vmatprep.subr.bf16.mxu1 %v980_v10  ;;  %v110_v1 = vpack.c.bf16 %v75_v60, %v75_v60  ;;  %v51_v2 = vld [vmem:[%s1469_s0 + $0x120] sm:$0xff]  ;;  %v18_v5 = vld [vmem:[%s1469_s0 + $0x18] sm:$0xff]  ;;  %v1003_v10 = vld [vmem:[%s1468_s1 + $0x110] sm:$0xff]  }
  0x15   :  { %v96_v6 = vpack.c.bf16 %v51_v2, %v46_v63  ;;  %v23_v7 = vld [vmem:[%s1469_s0 + $0x40] sm:$0xff]  ;;  %v50_v12 = vld [vmem:[%s1469_s0 + $0x118] sm:$0xff]  ;;  %v1004_v13 = vld [vmem:[%s1468_s1 + $0xc8] sm:$0xff]  }
  0x16   :  { %v83_v9 = vpack.c.bf16 %v23_v7, %v18_v5  ;;  %v95_v14 = vpack.c.bf16 %v50_v12, %v45_v11  ;;  %v1005_v15 = vld [vmem:[%s1468_s1 + $0x88] sm:$0xff]   ;;  %v19_v22 = vld [vmem:[%s1469_s0 + $0x20] sm:$0xff]  ;;  %v33_v25 = vld [vmem:[%s1469_s0 + $0x90] sm:$0xff] }
  0x17   :  { %788 = vmatpush3.bf16.msra.mxu0 %v981_v17  ;;  %965 = vmatpush3.bf16.msra.mxu1 %v981_v17  ;;  %v1006_v16 = vld [vmem:[%s1468_s1 + $0x108] sm:$0xff]   ;;  %v1007_v17 = vld [vmem:[%s1468_s1 + $0xc0] sm:$0xff]   ;;  %v38_v33 = vld [vmem:[%s1469_s0 + $0xb8] sm:$0xff] }
  0x18   :  { %789 = vmatprep.subr.bf16.mxu0 %v982_v18  ;;  %958 = vmatprep.subr.bf16.mxu1 %v982_v18  ;;  %v1008_v18 = vld [vmem:[%s1468_s1 + $0x80] sm:$0xff]   ;;  %v24_v23 = vld [vmem:[%s1469_s0 + $0x48] sm:$0xff]  ;;  %v42_v40 = vld [vmem:[%s1469_s0 + $0xd8] sm:$0xff] }
  0x19   :  { %v28_v24 = vld [vmem:[%s1469_s0 + $0x68] sm:$0xff]  ;;  %v84_v27 = vpack.c.bf16 %v24_v23, %v19_v22  ;;  %v27_v29 = vld [vmem:[%s1469_s0 + $0x60] sm:$0xff]  ;;  %v53_v44 = vld [vmem:[%s1469_s0 + $0x130] sm:$0xff] }
  0x1a   :  { %v32_v30 = vld [vmem:[%s1469_s0 + $0x88] sm:$0xff]  ;;  %v47_v48 = vld [vmem:[%s1469_s0 + $0x100] sm:$0xff]  ;;  %v54_v51 = vld [vmem:[%s1469_s0 + $0x138] sm:$0xff] }
  0x1b   :  { %790 = vmatpush3.bf16.msra.mxu0 %v983_v19  ;;  %966 = vmatpush3.bf16.msra.mxu1 %v983_v19  ;;  %v1009_v19 = vld [vmem:[%s1468_s1 + $0x100] sm:$0xff]   ;;  %v44_v42 = vld [vmem:[%s1469_s0 + $0xe8] sm:$0xff]  ;;  %v62_v58 = vld [vmem:[%s1469_s0 + $0x178] sm:$0xff] }
  0x1c   :  { %791 = vmatprep.subr.bf16.mxu0 %v984_v20  ;;  %959 = vmatprep.subr.bf16.mxu1 %v984_v20  ;;  %v17_v20 = vld [vmem:[%s1469_s0 + $0x10] sm:$0xff]  ;;  %v59_v59 = vld [vmem:[%s1469_s0 + $0x160] sm:$0xff]  ;;  %v64_v60 = vld [vmem:[%s1469_s0 + $0x188] sm:$0xff] }
  0x1d   :  { %v67_v2 = vld [vmem:[%s1469_s0 + $0x1a0] sm:$0xff]  ;;  %v74_v5 = vld [vmem:[%s1469_s0 + $0x1d8] sm:$0xff] }
  0x1e   :  { %v79_v11 = vld [vmem:[%s1469_s0 + $0x200] sm:$0xff] }
  0x1f   :  { %792 = vmatpush3.bf16.msra.mxu0 %v985_v21  ;;  %967 = vmatpush3.bf16.msra.mxu1 %v985_v21  ;;  %v22_v21 = vld [vmem:[%s1469_s0 + $0x38] sm:$0xff] }
  0x20   :  { %835 = vmatprep.subr.bf16.mxu1 %v986_v26  ;;  %908 = vmatprep.subr.bf16.mxu0 %v1010_v35  ;;  %v82_v26 = vpack.c.bf16 %v22_v21, %v17_v20 }
  0x22   :  { %475 = vmatmul.mubr.bf16.vlgmr.msra.gmra.mxu0 %v80_v31  ;;  %507 = vmatmul.mubr.bf16.vlgmr.msra.gmra.mxu1 %v100_v32  ;;  %v29_v31 = vld [vmem:[%s1469_s0 + $0x70] sm:$0xff]  ;;  %v34_v32 = vld [vmem:[%s1469_s0 + $0x98] sm:$0xff] }
  0x23   :  { %836 = vmatpush3.bf16.msra.mxu1 %v987_v28  ;;  %909 = vmatpush3.bf16.msra.mxu0 %v988_v34  ;;  %v88_v28 = vpack.c.bf16 %v33_v25, %v28_v24  ;;  %v43_v34 = vld [vmem:[%s1469_s0 + $0xe0] sm:$0xff] }
  0x24   :  { %837 = vmatprep.subr.bf16.mxu1 %v989_v36  ;;  %910 = vmatprep.subr.bf16.mxu0 %v1010_v35  ;;  %v87_v36 = vpack.c.bf16 %v32_v30, %v27_v29 }
  0x25   :  { %482 = vmatprep.mubr.bf16.mxu0 %v86_v39  ;;  %514 = vmatprep.mubr.bf16.mxu1 %v106_v41  ;;  %v37_v39 = vld [vmem:[%s1469_s0 + $0xb0] sm:$0xff]  ;;  %v39_v41 = vld [vmem:[%s1469_s0 + $0xc0] sm:$0xff] }
  0x26   :  { %v92_v45 = vpack.c.bf16 %v42_v40, %v37_v39  ;;  %v94_v46 = vpack.c.bf16 %v44_v42, %v39_v41 }
  0x27   :  { %838 = vmatpush3.bf16.msra.mxu1 %v990_v37  ;;  %911 = vmatpush3.bf16.msra.mxu0 %v991_v38  ;;  %v89_v37 = vpack.c.bf16 %v34_v32, %v29_v31  ;;  %v93_v38 = vpack.c.bf16 %v43_v34, %v38_v33 }
  0x28   :  { %839 = vmatprep.subr.bf16.mxu1 %v992_v43  ;;  %912 = vmatprep.subr.bf16.mxu0 %v1010_v35  ;;  %v48_v43 = vld [vmem:[%s1469_s0 + $0x108] sm:$0xff] }
  0x2a   :  { %483 = vmatmul.mubr.bf16.gmra.mxu0 %v85_v49  ;;  %515 = vmatmul.mubr.bf16.gmra.mxu1 %v105_v50  ;;  %v52_v49 = vld [vmem:[%s1469_s0 + $0x128] sm:$0xff]  ;;  %v49_v50 = vld [vmem:[%s1469_s0 + $0x110] sm:$0xff] }
  0x2b   :  { %840 = vmatpush3.bf16.msra.mxu1 %v993_v47  ;;  %913 = vmatpush3.bf16.msra.mxu0 %v994_v52  ;;  %v98_v47 = vpack.c.bf16 %v53_v44, %v48_v43  ;;  %v58_v52 = vld [vmem:[%s1469_s0 + $0x158] sm:$0xff] }
  0x2c   :  { %841 = vmatprep.subr.bf16.mxu1 %v995_v53  ;;  %914 = vmatprep.subr.bf16.mxu0 %v1010_v35  ;;  %v63_v53 = vld [vmem:[%s1469_s0 + $0x180] sm:$0xff] }
  0x2d   :  { %490 = vmatprep.mubr.bf16.mxu0 %v91_v56  ;;  %522 = vmatprep.mubr.bf16.mxu1 %v111_v57  ;;  %v103_v56 = vpack.c.bf16 %v63_v53, %v58_v52  ;;  %v57_v57 = vld [vmem:[%s1469_s0 + $0x150] sm:$0xff] }
  0x2e   :  { %v102_v63 = vpack.c.bf16 %v62_v58, %v57_v57 }
  0x2f   :  { %842 = vmatpush3.bf16.msra.mxu1 %v996_v54  ;;  %915 = vmatpush3.bf16.msra.mxu0 %v997_v55  ;;  %v97_v54 = vpack.c.bf16 %v52_v49, %v47_v48  ;;  %v99_v55 = vpack.c.bf16 %v54_v51, %v49_v50 }
  0x30   :  { %843 = vmatprep.subr.bf16.mxu1 %v998_v61  ;;  %916 = vmatprep.subr.bf16.mxu0 %v1010_v35  ;;  %v68_v61 = vld [vmem:[%s1469_s0 + $0x1a8] sm:$0xff] }
  0x32   :  { %491 = vmatmul.mubr.bf16.gmra.mxu0 %v90_v0  ;;  %523 = vmatmul.mubr.bf16.gmra.mxu1 %v110_v1  ;;  %v104_v0 = vpack.c.bf16 %v64_v60, %v59_v59 }
  0x33   :  { %844 = vmatpush3.bf16.msra.mxu1 %v999_v62  ;;  %917 = vmatpush3.bf16.msra.mxu0 %v1000_v3  ;;  %v73_v62 = vld [vmem:[%s1469_s0 + $0x1d0] sm:$0xff]  ;;  %v72_v3 = vld [vmem:[%s1469_s0 + $0x1c8] sm:$0xff] }
  0x34   :  { %845 = vmatprep.subr.bf16.mxu1 %v1001_v4  ;;  %918 = vmatprep.subr.bf16.mxu0 %v1010_v35  ;;  %v108_v1 = vpack.c.bf16 %v73_v62, %v68_v61  ;;  %v69_v4 = vld [vmem:[%s1469_s0 + $0x1b0] sm:$0xff]  ;;  %v107_v7 = vpack.c.bf16 %v72_v3, %v67_v2 }
  0x35   :  { %498 = vmatprep.mubr.bf16.mxu0 %v96_v6  ;;  %562 = vmatprep.mubr.bf16.mxu1 %v83_v9  ;;  %v78_v6 = vld [vmem:[%s1469_s0 + $0x1f8] sm:$0xff] }
  0x36   :  { %v113_v9 = vpack.c.bf16 %v78_v6, %v78_v6 }
  0x37   :  { %846 = vmatpush3.bf16.msra.mxu1 %v1002_v8  ;;  %919 = vmatpush3.bf16.msra.mxu0 %v1003_v10  ;;  %v109_v8 = vpack.c.bf16 %v74_v5, %v69_v4  ;;  %v77_v10 = vld [vmem:[%s1469_s0 + $0x1f0] sm:$0xff] }
  0x38   :  { %847 = vmatprep.subr.bf16.mxu1 %v1004_v13  ;;  %920 = vmatprep.subr.bf16.mxu0 %v1010_v35  ;;  %v112_v12 = vpack.c.bf16 %v77_v10, %v77_v10  ;;  %v114_v13 = vpack.c.bf16 %v79_v11, %v79_v11 }
  0x3a   :  { %499 = vmatmul.mubr.bf16.gmra.mxu0 %v95_v14 }
  0x3b   :  { %848 = vmatpush3.bf16.msra.mxu1 %v1005_v15  ;;  %921 = vmatpush3.bf16.msra.mxu0 %v1006_v16 }
  0x3c   :  { %849 = vmatprep.subr.bf16.mxu1 %v1007_v17  ;;  %922 = vmatprep.subr.bf16.mxu0 %v1010_v35 }
  0x3d   :  { %924 = vmatprep.mubr.msk.bf16.mxu0 %vm1011_vm0, %v1010_v35 }
  0x3f   :  { %850 = vmatpush3.bf16.msra.mxu1 %v1008_v18  ;;  %923 = vmatpush3.bf16.msra.mxu0 %v1009_v19 }
  0x42   :  { %563 = vmatmul.mubr.bf16.vlgmr.msra.gmra.mxu1 %v82_v26  ;;  %925 = vmatmul.mubr.bf16.vlgmr.msra.gmra.mxu0 %v84_v27 }
  0x43   :  { %570 = vmatprep.mubr.bf16.mxu1 %v88_v28  ;;  %928 = vmatprep.mubr.msk.bf16.mxu0 %vm1011_vm0, %v1010_v35 }
  0x4a   :  { %571 = vmatmul.mubr.bf16.gmra.mxu1 %v87_v36  ;;  %929 = vmatmul.mubr.bf16.gmra.mxu0 %v89_v37 }
  0x4b   :  { %578 = vmatprep.mubr.bf16.mxu1 %v93_v38  ;;  %932 = vmatprep.mubr.msk.bf16.mxu0 %vm1011_vm0, %v1010_v35 }
  0x52   :  { %579 = vmatmul.mubr.bf16.gmra.mxu1 %v92_v45  ;;  %933 = vmatmul.mubr.bf16.gmra.mxu0 %v94_v46  ;;  %v1400_v45 = vld [vmem:[%s1470_s2] ss:$0 sm:$0xff] }
  0x53   :  { %586 = vmatprep.mubr.bf16.mxu1 %v98_v47  ;;  %936 = vmatprep.mubr.msk.bf16.mxu0 %vm1011_vm0, %v1010_v35 }
  0x5a   :  { %587 = vmatmul.mubr.bf16.gmra.mxu1 %v97_v54  ;;  %937 = vmatmul.mubr.bf16.gmra.mxu0 %v99_v55 }
  0x5b   :  { %594 = vmatprep.mubr.bf16.mxu1 %v103_v56  ;;  %940 = vmatprep.mubr.msk.bf16.mxu0 %vm1011_vm0, %v1010_v35 }
  0x62   :  { %595 = vmatmul.mubr.bf16.gmra.mxu1 %v102_v63  ;;  %941 = vmatmul.mubr.bf16.gmra.mxu0 %v104_v0 }
  0x63   :  { %602 = vmatprep.mubr.bf16.mxu1 %v108_v1  ;;  %944 = vmatprep.mubr.msk.bf16.mxu0 %vm1011_vm0, %v1010_v35 }
  0x6a   :  { %603 = vmatmul.mubr.bf16.gmra.mxu1 %v107_v7  ;;  %945 = vmatmul.mubr.bf16.gmra.mxu0 %v109_v8 }
  0x6b   :  { %610 = vmatprep.mubr.bf16.mxu1 %v113_v9  ;;  %948 = vmatprep.mubr.msk.bf16.mxu0 %vm1011_vm0, %v1010_v35 }
  0x72   :  { %611 = vmatmul.mubr.bf16.gmra.mxu1 %v112_v12  ;;  %949 = vmatmul.mubr.bf16.gmra.mxu0 %v114_v13 }
  0xe2   :  { %v793_v14 = vpop.f32.mrf.mxu0  ;;  %v1369_v15 = vpop.f32.mrf.mxu1 }
  0xe4   :  { %v794_v16 = vpop.f32.mrf.mxu0  ;;  %v1371_v17 = vpop.f32.mrf.mxu1 }
  0xe5   :  { %v795_v42 = vadd.f32 %v794_v16, %v793_v14 }
  0xe6   :  { %v796_v18 = vpop.f32.mrf.mxu0  ;;  %v1373_v35 = vpop.f32.mrf.mxu1 }
  0xe7   :  { %v477_v48 = vadd.f32 %v795_v42, %v1400_v45 }
  0xe8   :  { %v797_v19 = vpop.f32.mrf.mxu0  ;;  %v1375_v20 = vpop.f32.mrf.mxu1 }
  0xe9   :  { %v798_v49 = vadd.f32 %v797_v19, %v796_v18 }
  0xea   :  { %v799_v21 = vpop.f32.mrf.mxu0  ;;  %v1377_v22 = vpop.f32.mrf.mxu1 }
  0xeb   :  { %v480_v56 = vadd.f32 %v798_v49, %v1400_v45 }
  0xec   :  { %v800_v23 = vpop.f32.mrf.mxu0  ;;  %v1379_v24 = vpop.f32.mrf.mxu1 }
  0xed   :  { %v801_v57 = vadd.f32 %v800_v23, %v799_v21 }
  0xee   :  { %v802_v25 = vpop.f32.mrf.mxu0  ;;  %v1381_v26 = vpop.f32.mrf.mxu1 }
  0xef   :  { %v485_v2 = vadd.f32 %v801_v57, %v1400_v45 }
  0xf0   :  { %v803_v27 = vpop.f32.mrf.mxu0  ;;  %v1383_v28 = vpop.f32.mrf.mxu1 }
  0xf1   :  { %v804_v3 = vadd.f32 %v803_v27, %v802_v25 }
  0xf2   :  { %v805_v29 = vpop.f32.mrf.mxu0  ;;  %v1385_v30 = vpop.f32.mrf.mxu1 }
  0xf3   :  { %v488_v12 = vadd.f32 %v804_v3, %v1400_v45 }
  0xf4   :  { %v806_v31 = vpop.f32.mrf.mxu0  ;;  %v1387_v32 = vpop.f32.mrf.mxu1 }
  0xf5   :  { %v807_v13 = vadd.f32 %v806_v31, %v805_v29 }
  0xf6   :  { %v808_v33 = vpop.f32.mrf.mxu0  ;;  %v832_v34 = vpop.f32.mrf.mxu1 }
  0xf7   :  { %v493_v34 = vadd.f32 %v807_v13, %v1400_v45 }
  0xf8   :  { %v809_v36 = vpop.f32.mrf.mxu0  ;;  %v833_v37 = vpop.f32.mrf.mxu1 }
  0xf9   :  { %v810_v37 = vadd.f32 %v809_v36, %v808_v33 }
  0xfa   :  { %v1389_v38 = vpop.f32.mrf.mxu0 }
  0xfb   :  { %v496_v49 = vadd.f32 %v810_v37, %v1400_v45 }
  0xfc   :  { %v1391_v39 = vpop.f32.mrf.mxu0 }
  0xfe   :  { %v1393_v40 = vpop.f32.mrf.mxu0 }
 0x100   :  { %v1395_v41 = vpop.f32.mrf.mxu0 }
 0x102   :  { %v851_v43 = vpop.f32.mrf.mxu1  ;;  %v652_v44 = vpop.f32.mrf.mxu0 }
 0x104   :  { %v852_v46 = vpop.f32.mrf.mxu1  ;;  %v926_v47 = vpop.f32.mrf.mxu0 }
 0x105   :  { %v853_v50 = vadd.f32 %v852_v46, %v851_v43 }
 0x106   :  { %v854_v51 = vpop.f32.mrf.mxu1  ;;  %v655_v52 = vpop.f32.mrf.mxu0 }
 0x107   :  { %v565_v53 = vadd.f32 %v853_v50, %v477_v48  ;;  %v813_v50 = vadd.f32 %v1391_v39, %v1389_v38 }
 0x108   :  { %v855_v54 = vpop.f32.mrf.mxu1  ;;  %v927_v55 = vpop.f32.mrf.mxu0 }
 0x109   :  { %v653_v58 = vadd.f32 %v652_v44, %v565_v53  ;;  %v856_v59 = vadd.f32 %v855_v54, %v854_v51  ;;  %v501_v57 = vadd.f32 %v813_v50, %v1400_v45 }
 0x10a   :  { %v857_v60 = vpop.f32.mrf.mxu1  ;;  %v660_v61 = vpop.f32.mrf.mxu0 }
 0x10b   :  { %v706_v62 = vmax.f32 %v653_v58, 0.0  ;;  %v568_v63 = vadd.f32 %v856_v59, %v480_v56  ;;  %v816_v58 = vadd.f32 %v1395_v41, %v1393_v40 }
 0x10c   :  { %v858_v0 = vpop.f32.mrf.mxu1  ;;  %v930_v1 = vpop.f32.mrf.mxu0 }
 0x10d   :  { %719 = vst [vmem:[%s1471_s3] sm:$0xff] %v706_v62  ;;  %v656_v4 = vadd.f32 %v655_v52, %v568_v63  ;;  %v859_v5 = vadd.f32 %v858_v0, %v857_v60  ;;  %v819_v1 = vadd.f32 %v1371_v17, %v1369_v15 }
 0x10e   :  { %v860_v6 = vpop.f32.mrf.mxu1  ;;  %v663_v7 = vpop.f32.mrf.mxu0 }
 0x10f   :  { %v707_v8 = vmax.f32 %v656_v4, 0.0  ;;  %v573_v9 = vadd.f32 %v859_v5, %v485_v2  ;;  %v504_v2 = vadd.f32 %v816_v58, %v1400_v45 }
 0x110   :  { %v861_v10 = vpop.f32.mrf.mxu1  ;;  %v931_v11 = vpop.f32.mrf.mxu0 }
 0x111   :  { %720 = vst [vmem:[%s1471_s3 + $0x8] sm:$0xff] %v707_v8  ;;  %v661_v14 = vadd.f32 %v660_v61, %v573_v9  ;;  %v862_v16 = vadd.f32 %v861_v10, %v860_v6  ;;  %v509_v9 = vadd.f32 %v819_v1, %v1400_v45  ;;  %v822_v10 = vadd.f32 %v1375_v20, %v1373_v35 }
 0x112   :  { %v863_v18 = vpop.f32.mrf.mxu1  ;;  %v668_v19 = vpop.f32.mrf.mxu0 }
 0x113   :  { %v708_v21 = vmax.f32 %v661_v14, 0.0  ;;  %v576_v23 = vadd.f32 %v862_v16, %v488_v12 }
 0x114   :  { %v864_v25 = vpop.f32.mrf.mxu1  ;;  %v934_v27 = vpop.f32.mrf.mxu0 }
 0x115   :  { %721 = vst [vmem:[%s1471_s3 + $0x10] sm:$0xff] %v708_v21  ;;  %v664_v29 = vadd.f32 %v663_v7, %v576_v23  ;;  %v865_v31 = vadd.f32 %v864_v25, %v863_v18  ;;  %v825_v21 = vadd.f32 %v1379_v24, %v1377_v22 }
 0x116   :  { %v866_v42 = vpop.f32.mrf.mxu1  ;;  %v671_v43 = vpop.f32.mrf.mxu0 }
 0x117   :  { %v709_v44 = vmax.f32 %v664_v29, 0.0  ;;  %v581_v46 = vadd.f32 %v865_v31, %v493_v34  ;;  %v517_v31 = vadd.f32 %v825_v21, %v1400_v45 }
 0x118   :  { %v867_v47 = vpop.f32.mrf.mxu1  ;;  %v935_v48 = vpop.f32.mrf.mxu0 }
 0x119   :  { %722 = vst [vmem:[%s1471_s3 + $0x18] sm:$0xff] %v709_v44  ;;  %v669_v33 = vadd.f32 %v668_v19, %v581_v46  ;;  %v868_v36 = vadd.f32 %v867_v47, %v866_v42  ;;  %v512_v19 = vadd.f32 %v822_v10, %v1400_v45  ;;  %v828_v42 = vadd.f32 %v1383_v28, %v1381_v26 }
 0x11a   :  { %v869_v51 = vpop.f32.mrf.mxu1  ;;  %v676_v52 = vpop.f32.mrf.mxu0 }
 0x11b   :  { %v710_v53 = vmax.f32 %v669_v33, 0.0  ;;  %v584_v54 = vadd.f32 %v868_v36, %v496_v49  ;;  %v520_v50 = vadd.f32 %v828_v42, %v1400_v45  ;;  %v831_v33 = vadd.f32 %v1387_v32, %v1385_v30 }
 0x11c   :  { %v870_v55 = vpop.f32.mrf.mxu1  ;;  %v938_v56 = vpop.f32.mrf.mxu0 }
 0x11d   :  { %723 = vst [vmem:[%s1471_s3 + $0x20] sm:$0xff] %v710_v53  ;;  %v672_v38 = vadd.f32 %v671_v43, %v584_v54  ;;  %v871_v39 = vadd.f32 %v870_v55, %v869_v51  ;;  %v525_v56 = vadd.f32 %v831_v33, %v1400_v45 }
 0x11e   :  { %v872_v59 = vpop.f32.mrf.mxu1  ;;  %v679_v60 = vpop.f32.mrf.mxu0 }
 0x11f   :  { %v711_v61 = vmax.f32 %v672_v38, 0.0  ;;  %v589_v62 = vadd.f32 %v871_v39, %v501_v57 }
 0x120   :  { %v873_v63 = vpop.f32.mrf.mxu1  ;;  %v939_v0 = vpop.f32.mrf.mxu0 }
 0x121   :  { %724 = vst [vmem:[%s1471_s3 + $0x28] sm:$0xff] %v711_v61  ;;  %v677_v40 = vadd.f32 %v676_v52, %v589_v62  ;;  %v874_v41 = vadd.f32 %v873_v63, %v872_v59 }
 0x122   :  { %v875_v3 = vpop.f32.mrf.mxu1  ;;  %v684_v4 = vpop.f32.mrf.mxu0 }
 0x123   :  { %v712_v5 = vmax.f32 %v677_v40, 0.0  ;;  %v592_v6 = vadd.f32 %v874_v41, %v504_v2 }
 0x124   :  { %v876_v7 = vpop.f32.mrf.mxu1  ;;  %v942_v8 = vpop.f32.mrf.mxu0 }
 0x125   :  { %725 = vst [vmem:[%s1471_s3 + $0x30] sm:$0xff] %v712_v5  ;;  %v680_v15 = vadd.f32 %v679_v60, %v592_v6  ;;  %v877_v17 = vadd.f32 %v876_v7, %v875_v3 }
 0x126   :  { %v878_v11 = vpop.f32.mrf.mxu1  ;;  %v687_v12 = vpop.f32.mrf.mxu0 }
 0x127   :  { %v713_v13 = vmax.f32 %v680_v15, 0.0  ;;  %v597_v14 = vadd.f32 %v877_v17, %v509_v9 }
 0x128   :  { %v879_v16 = vpop.f32.mrf.mxu1  ;;  %v943_v18 = vpop.f32.mrf.mxu0 }
 0x129   :  { %726 = vst [vmem:[%s1471_s3 + $0x38] sm:$0xff] %v713_v13  ;;  %v685_v35 = vadd.f32 %v684_v4, %v597_v14  ;;  %v880_v20 = vadd.f32 %v879_v16, %v878_v11 }
 0x12a   :  { %v881_v23 = vpop.f32.mrf.mxu1  ;;  %v692_v25 = vpop.f32.mrf.mxu0 }
 0x12b   :  { %v714_v27 = vmax.f32 %v685_v35, 0.0  ;;  %v600_v34 = vadd.f32 %v880_v20, %v512_v19 }
 0x12c   :  { %v882_v37 = vpop.f32.mrf.mxu1  ;;  %v946_v29 = vpop.f32.mrf.mxu0 }
 0x12d   :  { %727 = vst [vmem:[%s1471_s3 + $0x40] sm:$0xff] %v714_v27  ;;  %v688_v22 = vadd.f32 %v687_v12, %v600_v34  ;;  %v883_v24 = vadd.f32 %v882_v37, %v881_v23 }
 0x12e   :  { %v884_v43 = vpop.f32.mrf.mxu1  ;;  %v695_v44 = vpop.f32.mrf.mxu0 }
 0x12f   :  { %v715_v46 = vmax.f32 %v688_v22, 0.0  ;;  %v605_v47 = vadd.f32 %v883_v24, %v517_v31 }
 0x130   :  { %v885_v48 = vpop.f32.mrf.mxu1  ;;  %v947_v49 = vpop.f32.mrf.mxu0 }
 0x131   :  { %728 = vst [vmem:[%s1471_s3 + $0x48] sm:$0xff] %v715_v46  ;;  %v693_v26 = vadd.f32 %v692_v25, %v605_v47  ;;  %v886_v28 = vadd.f32 %v885_v48, %v884_v43 }
 0x132   :  { %v887_v36 = vpop.f32.mrf.mxu1  ;;  %v700_v51 = vpop.f32.mrf.mxu0 }
 0x133   :  { %v716_v52 = vmax.f32 %v693_v26, 0.0  ;;  %v608_v53 = vadd.f32 %v886_v28, %v520_v50 }
 0x134   :  { %v888_v54 = vpop.f32.mrf.mxu1  ;;  %v950_v55 = vpop.f32.mrf.mxu0 }
 0x135   :  { %729 = vst [vmem:[%s1471_s3 + $0x50] sm:$0xff] %v716_v52  ;;  %v696_v57 = vadd.f32 %v695_v44, %v608_v53  ;;  %v889_v30 = vadd.f32 %v888_v54, %v887_v36 }
 0x136   :  { %v890_v32 = vpop.f32.mrf.mxu1  ;;  %v703_v58 = vpop.f32.mrf.mxu0 }
 0x137   :  { %v717_v38 = vmax.f32 %v696_v57, 0.0  ;;  %v613_v39 = vadd.f32 %v889_v30, %v525_v56 }
 0x138   :  { %v891_v59 = vpop.f32.mrf.mxu1  ;;  %v951_v60 = vpop.f32.mrf.mxu0 }
 0x139   :  { %730 = vst [vmem:[%s1471_s3 + $0x58] sm:$0xff] %v717_v38  ;;  %v701_v61 = vadd.f32 %v700_v51, %v613_v39 }
 0x13b   :  { %v718_v62 = vmax.f32 %v701_v61, 0.0 }
 0x13d   :  { %731 = vst [vmem:[%s1471_s3 + $0x60] sm:$0xff] %v718_v62 }

// kernel: _forward_arrays.7
= control target key start
LH: loop header
LB: loop body
LE: loop exit
PB: predicated region body
PF: predicated region fallthrough
CT: control target
= control target key end

     0   :  { %vm5446_vm0 = vmmov 0   ;;  %s7214_s2 = inlined_call_operand.vmem [shape: bf16[3200,256], index: 2, kind: input, shape index: {}]   ;;  %s7215_s0 = inlined_call_operand.vmem [shape: f32[8,3200], index: 0, kind: input, shape index: {}]   ;;  %s7216_s3 = inlined_call_operand.vmem [shape: f32[1,256], index: 3, kind: input, shape index: {}]   ;;  %s7217_s4 = inlined_call_operand.vmem [shape: bf16[128,128], index: 4, kind: input, shape index: {}]   ;;  %s7218_s1 = inlined_call_operand.vmem [shape: f32[8,128], index: 1, kind: input, shape index: {}]   ;;  %s7219_s6 = inlined_call_operand.vmem [shape: bf16[128,256], index: 6, kind: input, shape index: {}]   ;;  %s7220_s8 = inlined_call_operand.vmem [shape: bf16[256,256], index: 8, kind: input, shape index: {}]   ;;  %s7221_s9 = inlined_call_operand.vmem [shape: bf16[256,256], index: 9, kind: input, shape index: {}]   ;;  %s7222_s5 = inlined_call_operand.vmem [shape: f32[1,128], index: 5, kind: input, shape index: {}]   ;;  %s7223_s11 = inlined_call_operand.vmem [shape: bf16[256,128], index: 11, kind: input, shape index: {}]   ;;  %s7224_s7 = inlined_call_operand.vmem [shape: f32[1,256], index: 7, kind: input, shape index: {}]   ;;  %s7225_s13 = inlined_call_operand.vmem [shape: bf16[128,128], index: 13, kind: input, shape index: {}]   ;;  %s7226_s10 = inlined_call_operand.vmem [shape: f32[1,256], index: 10, kind: input, shape index: {}]   ;;  %s7227_s12 = inlined_call_operand.vmem [shape: f32[1,128], index: 12, kind: input, shape index: {}]   ;;  %s7228_s14 = inlined_call_operand.vmem [shape: f32[1,128], index: 14, kind: input, shape index: {}]   ;;  %s7229_s15 = inlined_call_operand.vmem [shape: f32[8,128], index: 15, kind: output, shape index: {}]  }
   0x1   :  { %v4690_v0 = vld [vmem:[%s7214_s2 + $0x74] ss:$8 sps:$4 sm:$0xff]   ;;  %v4694_v2 = vld [vmem:[%s7214_s2 + $0x70] ss:$8 sps:$4 sm:$0xff]   ;;  %v4696_v4 = vld [vmem:[%s7214_s2 + $0x64] ss:$8 sps:$4 sm:$0xff]  }
   0x2   :  { %v4692_v1 = vld [vmem:[%s7214_s2 + $0x174] ss:$8 sps:$4 sm:$0xff]   ;;  %2513 = vmatprep.subr.bf16.mxu0 %v4690_v0  ;;  %v4695_v3 = vld [vmem:[%s7214_s2 + $0x170] ss:$8 sps:$4 sm:$0xff]   ;;  %v4698_v5 = vld [vmem:[%s7214_s2 + $0x164] ss:$8 sps:$4 sm:$0xff]  }
   0x3   :  { %2554 = vmatprep.subr.bf16.mxu1 %v4692_v1  ;;  %2514 = vmatpush1.bf16.msra.mxu0 %v4694_v2  ;;  %v4700_v6 = vld [vmem:[%s7214_s2 + $0x60] ss:$8 sps:$4 sm:$0xff]   ;;  %v4702_v8 = vld [vmem:[%s7214_s2 + $0x54] ss:$8 sps:$4 sm:$0xff]   ;;  %v4706_v10 = vld [vmem:[%s7214_s2 + $0x50] ss:$8 sps:$4 sm:$0xff]  }
   0x4   :  { %2555 = vmatpush1.bf16.msra.mxu1 %v4695_v3  ;;  %2515 = vmatprep.subr.bf16.mxu0 %v4696_v4  ;;  %v4701_v7 = vld [vmem:[%s7214_s2 + $0x160] ss:$8 sps:$4 sm:$0xff]   ;;  %v4704_v9 = vld [vmem:[%s7214_s2 + $0x154] ss:$8 sps:$4 sm:$0xff]   ;;  %v4707_v11 = vld [vmem:[%s7214_s2 + $0x150] ss:$8 sps:$4 sm:$0xff]  }
   0x5   :  { %2556 = vmatprep.subr.bf16.mxu1 %v4698_v5  ;;  %v4708_v12 = vld [vmem:[%s7214_s2 + $0x44] ss:$8 sps:$4 sm:$0xff]   ;;  %v4712_v14 = vld [vmem:[%s7214_s2 + $0x40] ss:$8 sps:$4 sm:$0xff]   ;;  %v4714_v16 = vld [vmem:[%s7214_s2 + $0x34] ss:$8 sps:$4 sm:$0xff]  }
   0x6   :  { %v4710_v13 = vld [vmem:[%s7214_s2 + $0x144] ss:$8 sps:$4 sm:$0xff]   ;;  %v4713_v15 = vld [vmem:[%s7214_s2 + $0x140] ss:$8 sps:$4 sm:$0xff]   ;;  %v4716_v17 = vld [vmem:[%s7214_s2 + $0x134] ss:$8 sps:$4 sm:$0xff]  }
   0x7   :  { %2516 = vmatpush1.bf16.msra.mxu0 %v4700_v6  ;;  %v4718_v18 = vld [vmem:[%s7214_s2 + $0x30] ss:$8 sps:$4 sm:$0xff]   ;;  %v4720_v20 = vld [vmem:[%s7214_s2 + $0x24] ss:$8 sps:$4 sm:$0xff]   ;;  %v4724_v22 = vld [vmem:[%s7214_s2 + $0x20] ss:$8 sps:$4 sm:$0xff]  }
   0x8   :  { %2557 = vmatpush1.bf16.msra.mxu1 %v4701_v7  ;;  %2517 = vmatprep.subr.bf16.mxu0 %v4702_v8  ;;  %v4719_v19 = vld [vmem:[%s7214_s2 + $0x130] ss:$8 sps:$4 sm:$0xff]   ;;  %v4722_v21 = vld [vmem:[%s7214_s2 + $0x124] ss:$8 sps:$4 sm:$0xff]   ;;  %v4725_v23 = vld [vmem:[%s7214_s2 + $0x120] ss:$8 sps:$4 sm:$0xff]  }
   0x9   :  { %2558 = vmatprep.subr.bf16.mxu1 %v4704_v9  ;;  %v4726_v24 = vld [vmem:[%s7214_s2 + $0x14] ss:$8 sps:$4 sm:$0xff]   ;;  %v4730_v26 = vld [vmem:[%s7214_s2 + $0x10] ss:$8 sps:$4 sm:$0xff]   ;;  %v4732_v28 = vld [vmem:[%s7214_s2 + $0x4] ss:$8 sps:$4 sm:$0xff]  }
   0xa   :  { %v4728_v25 = vld [vmem:[%s7214_s2 + $0x114] ss:$8 sps:$4 sm:$0xff]   ;;  %v4731_v27 = vld [vmem:[%s7214_s2 + $0x110] ss:$8 sps:$4 sm:$0xff]   ;;  %v4734_v29 = vld [vmem:[%s7214_s2 + $0x104] ss:$8 sps:$4 sm:$0xff]  }
   0xb   :  { %2518 = vmatpush1.bf16.msra.mxu0 %v4706_v10  ;;  %v4736_v30 = vld [vmem:[%s7214_s2] ss:$8 sps:$4 sm:$0xff]   ;;  %v4738_v32 = vld [vmem:[%s7214_s2 + $0xf4] ss:$8 sps:$4 sm:$0xff]   ;;  %v4742_v34 = vld [vmem:[%s7214_s2 + $0xf0] ss:$8 sps:$4 sm:$0xff]  }
   0xc   :  { %2559 = vmatpush1.bf16.msra.mxu1 %v4707_v11  ;;  %2519 = vmatprep.subr.bf16.mxu0 %v4708_v12  ;;  %v4737_v31 = vld [vmem:[%s7214_s2 + $0x100] ss:$8 sps:$4 sm:$0xff]   ;;  %v4740_v33 = vld [vmem:[%s7214_s2 + $0x1f4] ss:$8 sps:$4 sm:$0xff]   ;;  %v4743_v35 = vld [vmem:[%s7214_s2 + $0x1f0] ss:$8 sps:$4 sm:$0xff]  }
   0xd   :  { %2560 = vmatprep.subr.bf16.mxu1 %v4710_v13  ;;  %v4744_v36 = vld [vmem:[%s7214_s2 + $0xe4] ss:$8 sps:$4 sm:$0xff]   ;;  %v4748_v38 = vld [vmem:[%s7214_s2 + $0xe0] ss:$8 sps:$4 sm:$0xff]   ;;  %v4750_v40 = vld [vmem:[%s7214_s2 + $0xd4] ss:$8 sps:$4 sm:$0xff]  }
   0xe   :  { %v4746_v37 = vld [vmem:[%s7214_s2 + $0x1e4] ss:$8 sps:$4 sm:$0xff]   ;;  %v4749_v39 = vld [vmem:[%s7214_s2 + $0x1e0] ss:$8 sps:$4 sm:$0xff]   ;;  %v4752_v41 = vld [vmem:[%s7214_s2 + $0x1d4] ss:$8 sps:$4 sm:$0xff]  }
   0xf   :  { %2520 = vmatpush1.bf16.msra.mxu0 %v4712_v14  ;;  %v4754_v42 = vld [vmem:[%s7214_s2 + $0xd0] ss:$8 sps:$4 sm:$0xff]   ;;  %v4756_v44 = vld [vmem:[%s7214_s2 + $0xc4] ss:$8 sps:$4 sm:$0xff]   ;;  %v4760_v47 = vld [vmem:[%s7214_s2 + $0xc0] ss:$8 sps:$4 sm:$0xff]  }
  0x10   :  { %2561 = vmatpush1.bf16.msra.mxu1 %v4713_v15  ;;  %2521 = vmatprep.subr.bf16.mxu0 %v4714_v16  ;;  %v4755_v43 = vld [vmem:[%s7214_s2 + $0x1d0] ss:$8 sps:$4 sm:$0xff]   ;;  %v4758_v45 = vld [vmem:[%s7214_s2 + $0x1c4] ss:$8 sps:$4 sm:$0xff]   ;;  %v4761_v48 = vld [vmem:[%s7214_s2 + $0x1c0] ss:$8 sps:$4 sm:$0xff]  }
  0x11   :  { %2562 = vmatprep.subr.bf16.mxu1 %v4716_v17  ;;  %v52_v46 = vld [vmem:[%s7215_s0 + $0x8] sm:$0xff]  ;;  %v54_v50 = vld [vmem:[%s7215_s0 + $0x18] sm:$0xff]  ;;  %v51_v4 = vld [vmem:[%s7215_s0] sm:$0xff] }
  0x12   :  { %v77_v49 = vpack.c.bf16 %v52_v46, %v52_v46  ;;  %v4762_v51 = vld [vmem:[%s7214_s2 + $0xb4] ss:$8 sps:$4 sm:$0xff]   ;;  %v79_v52 = vpack.c.bf16 %v54_v50, %v54_v50  ;;  %v4766_v54 = vld [vmem:[%s7214_s2 + $0xb0] ss:$8 sps:$4 sm:$0xff]   ;;  %v4768_v56 = vld [vmem:[%s7214_s2 + $0xa4] ss:$8 sps:$4 sm:$0xff]   ;;  %v76_v8 = vpack.c.bf16 %v51_v4, %v51_v4 }
  0x13   :  { %2522 = vmatpush1.bf16.msra.mxu0 %v4718_v18  ;;  %v4764_v53 = vld [vmem:[%s7214_s2 + $0x1b4] ss:$8 sps:$4 sm:$0xff]   ;;  %v4767_v55 = vld [vmem:[%s7214_s2 + $0x1b0] ss:$8 sps:$4 sm:$0xff]   ;;  %v4770_v57 = vld [vmem:[%s7214_s2 + $0x1a4] ss:$8 sps:$4 sm:$0xff]  }
  0x14   :  { %2563 = vmatpush1.bf16.msra.mxu1 %v4719_v19  ;;  %2523 = vmatprep.subr.bf16.mxu0 %v4720_v20  ;;  %v4772_v58 = vld [vmem:[%s7214_s2 + $0xa0] ss:$8 sps:$4 sm:$0xff]   ;;  %v4774_v60 = vld [vmem:[%s7214_s2 + $0x94] ss:$8 sps:$4 sm:$0xff]   ;;  %v4778_v62 = vld [vmem:[%s7214_s2 + $0x90] ss:$8 sps:$4 sm:$0xff]  }
  0x15   :  { %2564 = vmatprep.subr.bf16.mxu1 %v4722_v21  ;;  %2545 = vmatprep.mubr.bf16.mxu0 %v77_v49  ;;  %v4773_v59 = vld [vmem:[%s7214_s2 + $0x1a0] ss:$8 sps:$4 sm:$0xff]   ;;  %v4776_v61 = vld [vmem:[%s7214_s2 + $0x194] ss:$8 sps:$4 sm:$0xff]   ;;  %v4779_v63 = vld [vmem:[%s7214_s2 + $0x190] ss:$8 sps:$4 sm:$0xff]  }
  0x16   :  { %2586 = vmatprep.mubr.bf16.mxu1 %v79_v52  ;;  %v4780_v0 = vld [vmem:[%s7214_s2 + $0x84] ss:$8 sps:$4 sm:$0xff]   ;;  %v4784_v2 = vld [vmem:[%s7214_s2 + $0x80] ss:$8 sps:$4 sm:$0xff]   ;;  %v53_v5 = vld [vmem:[%s7215_s0 + $0x10] sm:$0xff] }
  0x17   :  { %2524 = vmatpush1.bf16.msra.mxu0 %v4724_v22  ;;  %v4782_v1 = vld [vmem:[%s7214_s2 + $0x184] ss:$8 sps:$4 sm:$0xff]   ;;  %v4785_v3 = vld [vmem:[%s7214_s2 + $0x180] ss:$8 sps:$4 sm:$0xff]   ;;  %v4788_v6 = vld [vmem:[%s7214_s2 + $0x274] ss:$8 sps:$4 sm:$0xff]   ;;  %v78_v9 = vpack.c.bf16 %v53_v5, %v53_v5 }
  0x18   :  { %2565 = vmatpush1.bf16.msra.mxu1 %v4725_v23  ;;  %2525 = vmatprep.subr.bf16.mxu0 %v4726_v24  ;;  %v4791_v7 = vld [vmem:[%s7214_s2 + $0x374] ss:$8 sps:$4 sm:$0xff]   ;;  %v4786_v10 = vld [vmem:[%s7214_s2 + $0x270] ss:$8 sps:$4 sm:$0xff]   ;;  %v4794_v12 = vld [vmem:[%s7214_s2 + $0x264] ss:$8 sps:$4 sm:$0xff]  }
  0x19   :  { %2566 = vmatprep.subr.bf16.mxu1 %v4728_v25  ;;  %v4789_v11 = vld [vmem:[%s7214_s2 + $0x370] ss:$8 sps:$4 sm:$0xff]   ;;  %v4797_v13 = vld [vmem:[%s7214_s2 + $0x364] ss:$8 sps:$4 sm:$0xff]   ;;  %v4792_v14 = vld [vmem:[%s7214_s2 + $0x260] ss:$8 sps:$4 sm:$0xff]  }
  0x1a   :  { %v4795_v15 = vld [vmem:[%s7214_s2 + $0x360] ss:$8 sps:$4 sm:$0xff]   ;;  %v4800_v16 = vld [vmem:[%s7214_s2 + $0x254] ss:$8 sps:$4 sm:$0xff]   ;;  %v4798_v18 = vld [vmem:[%s7214_s2 + $0x250] ss:$8 sps:$4 sm:$0xff]  }
  0x1b   :  { %2526 = vmatpush1.bf16.msra.mxu0 %v4730_v26  ;;  %v4803_v17 = vld [vmem:[%s7214_s2 + $0x354] ss:$8 sps:$4 sm:$0xff]   ;;  %v4801_v19 = vld [vmem:[%s7214_s2 + $0x350] ss:$8 sps:$4 sm:$0xff]   ;;  %v4806_v20 = vld [vmem:[%s7214_s2 + $0x244] ss:$8 sps:$4 sm:$0xff]  }
  0x1c   :  { %2567 = vmatpush1.bf16.msra.mxu1 %v4731_v27  ;;  %2527 = vmatprep.subr.bf16.mxu0 %v4732_v28  ;;  %v4809_v21 = vld [vmem:[%s7214_s2 + $0x344] ss:$8 sps:$4 sm:$0xff]   ;;  %v4804_v22 = vld [vmem:[%s7214_s2 + $0x240] ss:$8 sps:$4 sm:$0xff]   ;;  %v4812_v24 = vld [vmem:[%s7214_s2 + $0x234] ss:$8 sps:$4 sm:$0xff]  }
  0x1d   :  { %2568 = vmatprep.subr.bf16.mxu1 %v4734_v29  ;;  %v4807_v23 = vld [vmem:[%s7214_s2 + $0x340] ss:$8 sps:$4 sm:$0xff]   ;;  %v4815_v25 = vld [vmem:[%s7214_s2 + $0x334] ss:$8 sps:$4 sm:$0xff]   ;;  %v4810_v26 = vld [vmem:[%s7214_s2 + $0x230] ss:$8 sps:$4 sm:$0xff]  }
  0x1e   :  { %v4813_v27 = vld [vmem:[%s7214_s2 + $0x330] ss:$8 sps:$4 sm:$0xff]   ;;  %v4818_v28 = vld [vmem:[%s7214_s2 + $0x224] ss:$8 sps:$4 sm:$0xff]   ;;  %v4840_v50 = vld [vmem:[%s7214_s2 + $0x2e0] ss:$8 sps:$4 sm:$0xff]  }
  0x1f   :  { %2528 = vmatpush1.bf16.msra.mxu0 %v4736_v30  ;;  %v4821_v29 = vld [vmem:[%s7214_s2 + $0x324] ss:$8 sps:$4 sm:$0xff]   ;;  %v4816_v30 = vld [vmem:[%s7214_s2 + $0x220] ss:$8 sps:$4 sm:$0xff]   ;;  %v4834_v46 = vld [vmem:[%s7214_s2 + $0x2f0] ss:$8 sps:$4 sm:$0xff]  }
  0x20   :  { %2569 = vmatpush1.bf16.msra.mxu1 %v4737_v31  ;;  %2529 = vmatprep.subr.bf16.mxu0 %v4738_v32  ;;  %v4819_v31 = vld [vmem:[%s7214_s2 + $0x320] ss:$8 sps:$4 sm:$0xff]   ;;  %v4824_v32 = vld [vmem:[%s7214_s2 + $0x214] ss:$8 sps:$4 sm:$0xff]   ;;  %v4845_v49 = vld [vmem:[%s7214_s2 + $0x3e4] ss:$8 sps:$4 sm:$0xff]  }
  0x21   :  { %2570 = vmatprep.subr.bf16.mxu1 %v4740_v33  ;;  %v4827_v33 = vld [vmem:[%s7214_s2 + $0x314] ss:$8 sps:$4 sm:$0xff]  }
  0x22   :  { %v4848_v52 = vld [vmem:[%s7214_s2 + $0x2d4] ss:$8 sps:$4 sm:$0xff]  }
  0x23   :  { %2530 = vmatpush2.bf16.msra.mxu0 %v4742_v34  ;;  %v56_v34 = vld [vmem:[%s7215_s0 + $0x28] sm:$0xff]  ;;  %v4872_v4 = vld [vmem:[%s7214_s2 + $0x294] ss:$8 sps:$4 sm:$0xff]  }
  0x24   :  { %2571 = vmatpush2.bf16.msra.mxu1 %v4743_v35  ;;  %2531 = vmatprep.subr.bf16.mxu0 %v4744_v36  ;;  %v4822_v35 = vld [vmem:[%s7214_s2 + $0x210] ss:$8 sps:$4 sm:$0xff]   ;;  %v4875_v5 = vld [vmem:[%s7214_s2 + $0x394] ss:$8 sps:$4 sm:$0xff]  }
  0x25   :  { %2572 = vmatprep.subr.bf16.mxu1 %v4746_v37  ;;  %v4825_v36 = vld [vmem:[%s7214_s2 + $0x310] ss:$8 sps:$4 sm:$0xff]   ;;  %v81_v37 = vpack.c.bf16 %v56_v34, %v56_v34  ;;  %v4900_v34 = vld [vmem:[%s7214_s2 + $0x440] ss:$8 sps:$4 sm:$0xff]  }
  0x27   :  { %2532 = vmatpush2.bf16.msra.mxu0 %v4748_v38  ;;  %v58_v38 = vld [vmem:[%s7215_s0 + $0x38] sm:$0xff] }
  0x28   :  { %2573 = vmatpush2.bf16.msra.mxu1 %v4749_v39  ;;  %2533 = vmatprep.subr.bf16.mxu0 %v4750_v40  ;;  %v4830_v39 = vld [vmem:[%s7214_s2 + $0x204] ss:$8 sps:$4 sm:$0xff]   ;;  %v83_v40 = vpack.c.bf16 %v58_v38, %v58_v38  ;;  %v4906_v38 = vld [vmem:[%s7214_s2 + $0x430] ss:$8 sps:$4 sm:$0xff]  }
  0x29   :  { %2574 = vmatprep.subr.bf16.mxu1 %v4752_v41  ;;  %v4833_v41 = vld [vmem:[%s7214_s2 + $0x304] ss:$8 sps:$4 sm:$0xff]  }
  0x2b   :  { %2534 = vmatpush2.bf16.msra.mxu0 %v4754_v42  ;;  %v4828_v42 = vld [vmem:[%s7214_s2 + $0x200] ss:$8 sps:$4 sm:$0xff]  }
  0x2c   :  { %2575 = vmatpush2.bf16.msra.mxu1 %v4755_v43  ;;  %2535 = vmatprep.subr.bf16.mxu0 %v4756_v44  ;;  %v4831_v43 = vld [vmem:[%s7214_s2 + $0x300] ss:$8 sps:$4 sm:$0xff]   ;;  %v4836_v44 = vld [vmem:[%s7214_s2 + $0x2f4] ss:$8 sps:$4 sm:$0xff]  }
  0x2d   :  { %2576 = vmatprep.subr.bf16.mxu1 %v4758_v45  ;;  %v4839_v45 = vld [vmem:[%s7214_s2 + $0x3f4] ss:$8 sps:$4 sm:$0xff]  }
  0x2f   :  { %2536 = vmatpush2.bf16.msra.mxu0 %v4760_v47  ;;  %v4837_v47 = vld [vmem:[%s7214_s2 + $0x3f0] ss:$8 sps:$4 sm:$0xff]  }
  0x30   :  { %2577 = vmatpush2.bf16.msra.mxu1 %v4761_v48  ;;  %2537 = vmatprep.subr.bf16.mxu0 %v4762_v51  ;;  %v4842_v48 = vld [vmem:[%s7214_s2 + $0x2e4] ss:$8 sps:$4 sm:$0xff]   ;;  %v4843_v51 = vld [vmem:[%s7214_s2 + $0x3e0] ss:$8 sps:$4 sm:$0xff]  }
  0x31   :  { %2578 = vmatprep.subr.bf16.mxu1 %v4764_v53  ;;  %v4851_v53 = vld [vmem:[%s7214_s2 + $0x3d4] ss:$8 sps:$4 sm:$0xff]  }
  0x33   :  { %2538 = vmatpush2.bf16.msra.mxu0 %v4766_v54  ;;  %v4846_v54 = vld [vmem:[%s7214_s2 + $0x2d0] ss:$8 sps:$4 sm:$0xff]  }
  0x34   :  { %2579 = vmatpush2.bf16.msra.mxu1 %v4767_v55  ;;  %2539 = vmatprep.subr.bf16.mxu0 %v4768_v56  ;;  %v4849_v55 = vld [vmem:[%s7214_s2 + $0x3d0] ss:$8 sps:$4 sm:$0xff]   ;;  %v4854_v56 = vld [vmem:[%s7214_s2 + $0x2c4] ss:$8 sps:$4 sm:$0xff]  }
  0x35   :  { %2580 = vmatprep.subr.bf16.mxu1 %v4770_v57  ;;  %v4857_v57 = vld [vmem:[%s7214_s2 + $0x3c4] ss:$8 sps:$4 sm:$0xff]  }
  0x37   :  { %2540 = vmatpush2.bf16.msra.mxu0 %v4772_v58  ;;  %v4852_v58 = vld [vmem:[%s7214_s2 + $0x2c0] ss:$8 sps:$4 sm:$0xff]  }
  0x38   :  { %2581 = vmatpush2.bf16.msra.mxu1 %v4773_v59  ;;  %2541 = vmatprep.subr.bf16.mxu0 %v4774_v60  ;;  %v4855_v59 = vld [vmem:[%s7214_s2 + $0x3c0] ss:$8 sps:$4 sm:$0xff]   ;;  %v4860_v60 = vld [vmem:[%s7214_s2 + $0x2b4] ss:$8 sps:$4 sm:$0xff]  }
  0x39   :  { %2582 = vmatprep.subr.bf16.mxu1 %v4776_v61  ;;  %v4863_v61 = vld [vmem:[%s7214_s2 + $0x3b4] ss:$8 sps:$4 sm:$0xff]  }
  0x3b   :  { %2542 = vmatpush2.bf16.msra.mxu0 %v4778_v62  ;;  %v4858_v62 = vld [vmem:[%s7214_s2 + $0x2b0] ss:$8 sps:$4 sm:$0xff]  }
  0x3c   :  { %2583 = vmatpush2.bf16.msra.mxu1 %v4779_v63  ;;  %2543 = vmatprep.subr.bf16.mxu0 %v4780_v0  ;;  %v4861_v63 = vld [vmem:[%s7214_s2 + $0x3b0] ss:$8 sps:$4 sm:$0xff]   ;;  %v4866_v0 = vld [vmem:[%s7214_s2 + $0x2a4] ss:$8 sps:$4 sm:$0xff]  }
  0x3d   :  { %2584 = vmatprep.subr.bf16.mxu1 %v4782_v1  ;;  %v4869_v1 = vld [vmem:[%s7214_s2 + $0x3a4] ss:$8 sps:$4 sm:$0xff]  }
  0x3f   :  { %2544 = vmatpush2.bf16.msra.mxu0 %v4784_v2  ;;  %v4864_v2 = vld [vmem:[%s7214_s2 + $0x2a0] ss:$8 sps:$4 sm:$0xff]  }
  0x40   :  { %2585 = vmatpush2.bf16.msra.mxu1 %v4785_v3  ;;  %2595 = vmatprep.subr.bf16.mxu0 %v4788_v6  ;;  %v4867_v3 = vld [vmem:[%s7214_s2 + $0x3a0] ss:$8 sps:$4 sm:$0xff]   ;;  %v4870_v6 = vld [vmem:[%s7214_s2 + $0x290] ss:$8 sps:$4 sm:$0xff]  }
  0x41   :  { %2636 = vmatprep.subr.bf16.mxu1 %v4791_v7  ;;  %v4873_v7 = vld [vmem:[%s7214_s2 + $0x390] ss:$8 sps:$4 sm:$0xff]  }
  0x42   :  { %2546 = vmatmul.mubr.bf16.vlgmr.msra.gmra.mxu0 %v76_v8  ;;  %v4878_v8 = vld [vmem:[%s7214_s2 + $0x284] ss:$8 sps:$4 sm:$0xff]  }
  0x43   :  { %2587 = vmatmul.mubr.bf16.vlgmr.msra.gmra.mxu1 %v78_v9  ;;  %2596 = vmatpush1.bf16.msra.mxu0 %v4786_v10  ;;  %v4881_v9 = vld [vmem:[%s7214_s2 + $0x384] ss:$8 sps:$4 sm:$0xff]   ;;  %v4876_v10 = vld [vmem:[%s7214_s2 + $0x280] ss:$8 sps:$4 sm:$0xff]  }
  0x44   :  { %2637 = vmatpush1.bf16.msra.mxu1 %v4789_v11  ;;  %2597 = vmatprep.subr.bf16.mxu0 %v4794_v12  ;;  %v4879_v11 = vld [vmem:[%s7214_s2 + $0x380] ss:$8 sps:$4 sm:$0xff]  }
  0x45   :  { %2638 = vmatprep.subr.bf16.mxu1 %v4797_v13  ;;  %2627 = vmatprep.mubr.bf16.mxu0 %v81_v37  ;;  %v55_v12 = vld [vmem:[%s7215_s0 + $0x20] sm:$0xff]  ;;  %v57_v13 = vld [vmem:[%s7215_s0 + $0x30] sm:$0xff] }
  0x46   :  { %2668 = vmatprep.mubr.bf16.mxu1 %v83_v40  ;;  %v4911_v37 = vld [vmem:[%s7214_s2 + $0x534] ss:$8 sps:$4 sm:$0xff]   ;;  %v4914_v40 = vld [vmem:[%s7214_s2 + $0x424] ss:$8 sps:$4 sm:$0xff]  }
  0x47   :  { %2598 = vmatpush1.bf16.msra.mxu0 %v4792_v14  ;;  %v4884_v14 = vld [vmem:[%s7214_s2 + $0x474] ss:$8 sps:$4 sm:$0xff]  }
  0x48   :  { %2639 = vmatpush1.bf16.msra.mxu1 %v4795_v15  ;;  %2599 = vmatprep.subr.bf16.mxu0 %v4800_v16  ;;  %v4887_v15 = vld [vmem:[%s7214_s2 + $0x574] ss:$8 sps:$4 sm:$0xff]   ;;  %v80_v16 = vpack.c.bf16 %v55_v12, %v55_v12 }
  0x49   :  { %2640 = vmatprep.subr.bf16.mxu1 %v4803_v17  ;;  %v82_v17 = vpack.c.bf16 %v57_v13, %v57_v13  ;;  %v4968_v12 = vld [vmem:[%s7214_s2 + $0x494] ss:$8 sps:$4 sm:$0xff]  }
  0x4a   :  { %v4971_v13 = vld [vmem:[%s7214_s2 + $0x594] ss:$8 sps:$4 sm:$0xff]  }
  0x4b   :  { %2600 = vmatpush1.bf16.msra.mxu0 %v4798_v18  ;;  %v4882_v18 = vld [vmem:[%s7214_s2 + $0x470] ss:$8 sps:$4 sm:$0xff]  }
  0x4c   :  { %2641 = vmatpush1.bf16.msra.mxu1 %v4801_v19  ;;  %2601 = vmatprep.subr.bf16.mxu0 %v4806_v20  ;;  %v4885_v19 = vld [vmem:[%s7214_s2 + $0x570] ss:$8 sps:$4 sm:$0xff]   ;;  %v4890_v20 = vld [vmem:[%s7214_s2 + $0x464] ss:$8 sps:$4 sm:$0xff]  }
  0x4d   :  { %2642 = vmatprep.subr.bf16.mxu1 %v4809_v21  ;;  %v4893_v21 = vld [vmem:[%s7214_s2 + $0x564] ss:$8 sps:$4 sm:$0xff]  }
  0x4f   :  { %2602 = vmatpush1.bf16.msra.mxu0 %v4804_v22  ;;  %v60_v22 = vld [vmem:[%s7215_s0 + $0x48] sm:$0xff] }
  0x50   :  { %2643 = vmatpush1.bf16.msra.mxu1 %v4807_v23  ;;  %2603 = vmatprep.subr.bf16.mxu0 %v4812_v24  ;;  %v4888_v23 = vld [vmem:[%s7214_s2 + $0x460] ss:$8 sps:$4 sm:$0xff]  }
  0x51   :  { %2644 = vmatprep.subr.bf16.mxu1 %v4815_v25  ;;  %v4891_v24 = vld [vmem:[%s7214_s2 + $0x560] ss:$8 sps:$4 sm:$0xff]   ;;  %v85_v25 = vpack.c.bf16 %v60_v22, %v60_v22  ;;  %v4980_v22 = vld [vmem:[%s7214_s2 + $0x674] ss:$8 sps:$4 sm:$0xff]  }
  0x53   :  { %2604 = vmatpush1.bf16.msra.mxu0 %v4810_v26  ;;  %v62_v26 = vld [vmem:[%s7215_s0 + $0x58] sm:$0xff] }
  0x54   :  { %2645 = vmatpush1.bf16.msra.mxu1 %v4813_v27  ;;  %2605 = vmatprep.subr.bf16.mxu0 %v4818_v28  ;;  %v4896_v27 = vld [vmem:[%s7214_s2 + $0x454] ss:$8 sps:$4 sm:$0xff]   ;;  %v87_v28 = vpack.c.bf16 %v62_v26, %v62_v26 }
  0x55   :  { %2646 = vmatprep.subr.bf16.mxu1 %v4821_v29  ;;  %v4899_v29 = vld [vmem:[%s7214_s2 + $0x554] ss:$8 sps:$4 sm:$0xff]  }
  0x57   :  { %2606 = vmatpush1.bf16.msra.mxu0 %v4816_v30  ;;  %v4894_v30 = vld [vmem:[%s7214_s2 + $0x450] ss:$8 sps:$4 sm:$0xff]  }
  0x58   :  { %2647 = vmatpush1.bf16.msra.mxu1 %v4819_v31  ;;  %2607 = vmatprep.subr.bf16.mxu0 %v4824_v32  ;;  %v4897_v31 = vld [vmem:[%s7214_s2 + $0x550] ss:$8 sps:$4 sm:$0xff]   ;;  %v4902_v32 = vld [vmem:[%s7214_s2 + $0x444] ss:$8 sps:$4 sm:$0xff]  }
  0x59   :  { %2648 = vmatprep.subr.bf16.mxu1 %v4827_v33  ;;  %v4905_v33 = vld [vmem:[%s7214_s2 + $0x544] ss:$8 sps:$4 sm:$0xff]  }
  0x5b   :  { %2608 = vmatpush1.bf16.msra.mxu0 %v4822_v35  ;;  %v4903_v35 = vld [vmem:[%s7214_s2 + $0x540] ss:$8 sps:$4 sm:$0xff]  }
  0x5c   :  { %2649 = vmatpush1.bf16.msra.mxu1 %v4825_v36  ;;  %2609 = vmatprep.subr.bf16.mxu0 %v4830_v39  ;;  %v4908_v36 = vld [vmem:[%s7214_s2 + $0x434] ss:$8 sps:$4 sm:$0xff]   ;;  %v4909_v39 = vld [vmem:[%s7214_s2 + $0x530] ss:$8 sps:$4 sm:$0xff]  }
  0x5d   :  { %2650 = vmatprep.subr.bf16.mxu1 %v4833_v41  ;;  %v4917_v41 = vld [vmem:[%s7214_s2 + $0x524] ss:$8 sps:$4 sm:$0xff]  }
  0x5f   :  { %2610 = vmatpush1.bf16.msra.mxu0 %v4828_v42  ;;  %v4912_v42 = vld [vmem:[%s7214_s2 + $0x420] ss:$8 sps:$4 sm:$0xff]  }
  0x60   :  { %2651 = vmatpush1.bf16.msra.mxu1 %v4831_v43  ;;  %2611 = vmatprep.subr.bf16.mxu0 %v4836_v44  ;;  %v4915_v43 = vld [vmem:[%s7214_s2 + $0x520] ss:$8 sps:$4 sm:$0xff]   ;;  %v4920_v44 = vld [vmem:[%s7214_s2 + $0x414] ss:$8 sps:$4 sm:$0xff]  }
  0x61   :  { %2652 = vmatprep.subr.bf16.mxu1 %v4839_v45  ;;  %v4923_v45 = vld [vmem:[%s7214_s2 + $0x514] ss:$8 sps:$4 sm:$0xff]  }
  0x63   :  { %2612 = vmatpush2.bf16.msra.mxu0 %v4834_v46  ;;  %v4918_v46 = vld [vmem:[%s7214_s2 + $0x410] ss:$8 sps:$4 sm:$0xff]  }
  0x64   :  { %2653 = vmatpush2.bf16.msra.mxu1 %v4837_v47  ;;  %2613 = vmatprep.subr.bf16.mxu0 %v4842_v48  ;;  %v4921_v47 = vld [vmem:[%s7214_s2 + $0x510] ss:$8 sps:$4 sm:$0xff]   ;;  %v4926_v48 = vld [vmem:[%s7214_s2 + $0x404] ss:$8 sps:$4 sm:$0xff]  }
  0x65   :  { %2654 = vmatprep.subr.bf16.mxu1 %v4845_v49  ;;  %v4929_v49 = vld [vmem:[%s7214_s2 + $0x504] ss:$8 sps:$4 sm:$0xff]  }
  0x67   :  { %2614 = vmatpush2.bf16.msra.mxu0 %v4840_v50  ;;  %v4924_v50 = vld [vmem:[%s7214_s2 + $0x400] ss:$8 sps:$4 sm:$0xff]  }
  0x68   :  { %2655 = vmatpush2.bf16.msra.mxu1 %v4843_v51  ;;  %2615 = vmatprep.subr.bf16.mxu0 %v4848_v52  ;;  %v4927_v51 = vld [vmem:[%s7214_s2 + $0x500] ss:$8 sps:$4 sm:$0xff]   ;;  %v4932_v52 = vld [vmem:[%s7214_s2 + $0x4f4] ss:$8 sps:$4 sm:$0xff]  }
  0x69   :  { %2656 = vmatprep.subr.bf16.mxu1 %v4851_v53  ;;  %v4935_v53 = vld [vmem:[%s7214_s2 + $0x5f4] ss:$8 sps:$4 sm:$0xff]  }
  0x6b   :  { %2616 = vmatpush2.bf16.msra.mxu0 %v4846_v54  ;;  %v4930_v54 = vld [vmem:[%s7214_s2 + $0x4f0] ss:$8 sps:$4 sm:$0xff]  }
  0x6c   :  { %2657 = vmatpush2.bf16.msra.mxu1 %v4849_v55  ;;  %2617 = vmatprep.subr.bf16.mxu0 %v4854_v56  ;;  %v4933_v55 = vld [vmem:[%s7214_s2 + $0x5f0] ss:$8 sps:$4 sm:$0xff]   ;;  %v4938_v56 = vld [vmem:[%s7214_s2 + $0x4e4] ss:$8 sps:$4 sm:$0xff]  }
  0x6d   :  { %2658 = vmatprep.subr.bf16.mxu1 %v4857_v57  ;;  %v4941_v57 = vld [vmem:[%s7214_s2 + $0x5e4] ss:$8 sps:$4 sm:$0xff]  }
  0x6f   :  { %2618 = vmatpush2.bf16.msra.mxu0 %v4852_v58  ;;  %v4936_v58 = vld [vmem:[%s7214_s2 + $0x4e0] ss:$8 sps:$4 sm:$0xff]  }
  0x70   :  { %2659 = vmatpush2.bf16.msra.mxu1 %v4855_v59  ;;  %2619 = vmatprep.subr.bf16.mxu0 %v4860_v60  ;;  %v4939_v59 = vld [vmem:[%s7214_s2 + $0x5e0] ss:$8 sps:$4 sm:$0xff]   ;;  %v4944_v60 = vld [vmem:[%s7214_s2 + $0x4d4] ss:$8 sps:$4 sm:$0xff]  }
  0x71   :  { %2660 = vmatprep.subr.bf16.mxu1 %v4863_v61  ;;  %v4947_v61 = vld [vmem:[%s7214_s2 + $0x5d4] ss:$8 sps:$4 sm:$0xff]  }
  0x73   :  { %2620 = vmatpush2.bf16.msra.mxu0 %v4858_v62  ;;  %v4942_v62 = vld [vmem:[%s7214_s2 + $0x4d0] ss:$8 sps:$4 sm:$0xff]  }
  0x74   :  { %2661 = vmatpush2.bf16.msra.mxu1 %v4861_v63  ;;  %2621 = vmatprep.subr.bf16.mxu0 %v4866_v0  ;;  %v4945_v63 = vld [vmem:[%s7214_s2 + $0x5d0] ss:$8 sps:$4 sm:$0xff]   ;;  %v4950_v0 = vld [vmem:[%s7214_s2 + $0x4c4] ss:$8 sps:$4 sm:$0xff]  }
  0x75   :  { %2662 = vmatprep.subr.bf16.mxu1 %v4869_v1  ;;  %v4953_v1 = vld [vmem:[%s7214_s2 + $0x5c4] ss:$8 sps:$4 sm:$0xff]  }
  0x77   :  { %2622 = vmatpush2.bf16.msra.mxu0 %v4864_v2  ;;  %v4948_v2 = vld [vmem:[%s7214_s2 + $0x4c0] ss:$8 sps:$4 sm:$0xff]  }
  0x78   :  { %2663 = vmatpush2.bf16.msra.mxu1 %v4867_v3  ;;  %2623 = vmatprep.subr.bf16.mxu0 %v4872_v4  ;;  %v4951_v3 = vld [vmem:[%s7214_s2 + $0x5c0] ss:$8 sps:$4 sm:$0xff]   ;;  %v4956_v4 = vld [vmem:[%s7214_s2 + $0x4b4] ss:$8 sps:$4 sm:$0xff]  }
  0x79   :  { %2664 = vmatprep.subr.bf16.mxu1 %v4875_v5  ;;  %v4959_v5 = vld [vmem:[%s7214_s2 + $0x5b4] ss:$8 sps:$4 sm:$0xff]  }
  0x7b   :  { %2624 = vmatpush2.bf16.msra.mxu0 %v4870_v6  ;;  %v4954_v6 = vld [vmem:[%s7214_s2 + $0x4b0] ss:$8 sps:$4 sm:$0xff]  }
  0x7c   :  { %2665 = vmatpush2.bf16.msra.mxu1 %v4873_v7  ;;  %2625 = vmatprep.subr.bf16.mxu0 %v4878_v8  ;;  %v4957_v7 = vld [vmem:[%s7214_s2 + $0x5b0] ss:$8 sps:$4 sm:$0xff]   ;;  %v4962_v8 = vld [vmem:[%s7214_s2 + $0x4a4] ss:$8 sps:$4 sm:$0xff]  }
  0x7d   :  { %2666 = vmatprep.subr.bf16.mxu1 %v4881_v9  ;;  %v4965_v9 = vld [vmem:[%s7214_s2 + $0x5a4] ss:$8 sps:$4 sm:$0xff]  }
  0x7f   :  { %2626 = vmatpush2.bf16.msra.mxu0 %v4876_v10  ;;  %v4960_v10 = vld [vmem:[%s7214_s2 + $0x4a0] ss:$8 sps:$4 sm:$0xff]  }
  0x80   :  { %2667 = vmatpush2.bf16.msra.mxu1 %v4879_v11  ;;  %2677 = vmatprep.subr.bf16.mxu0 %v4884_v14  ;;  %v4963_v11 = vld [vmem:[%s7214_s2 + $0x5a0] ss:$8 sps:$4 sm:$0xff]   ;;  %v4966_v14 = vld [vmem:[%s7214_s2 + $0x490] ss:$8 sps:$4 sm:$0xff]  }
  0x81   :  { %2718 = vmatprep.subr.bf16.mxu1 %v4887_v15  ;;  %v4969_v15 = vld [vmem:[%s7214_s2 + $0x590] ss:$8 sps:$4 sm:$0xff]  }
  0x82   :  { %2628 = vmatmul.mubr.bf16.vlgmr.msra.gmra.mxu0 %v80_v16  ;;  %v4974_v16 = vld [vmem:[%s7214_s2 + $0x484] ss:$8 sps:$4 sm:$0xff]  }
  0x83   :  { %2669 = vmatmul.mubr.bf16.vlgmr.msra.gmra.mxu1 %v82_v17  ;;  %2678 = vmatpush1.bf16.msra.mxu0 %v4882_v18  ;;  %v4977_v17 = vld [vmem:[%s7214_s2 + $0x584] ss:$8 sps:$4 sm:$0xff]   ;;  %v4972_v18 = vld [vmem:[%s7214_s2 + $0x480] ss:$8 sps:$4 sm:$0xff]  }
  0x84   :  { %2719 = vmatpush1.bf16.msra.mxu1 %v4885_v19  ;;  %2679 = vmatprep.subr.bf16.mxu0 %v4890_v20  ;;  %v4975_v19 = vld [vmem:[%s7214_s2 + $0x580] ss:$8 sps:$4 sm:$0xff]  }
  0x85   :  { %2720 = vmatprep.subr.bf16.mxu1 %v4893_v21  ;;  %2709 = vmatprep.mubr.bf16.mxu0 %v85_v25  ;;  %v59_v20 = vld [vmem:[%s7215_s0 + $0x40] sm:$0xff]  ;;  %v61_v21 = vld [vmem:[%s7215_s0 + $0x50] sm:$0xff]  ;;  %v64_v25 = vld [vmem:[%s7215_s0 + $0x68] sm:$0xff] }
  0x86   :  { %2750 = vmatprep.mubr.bf16.mxu1 %v87_v28  ;;  %v84_v26 = vpack.c.bf16 %v59_v20, %v59_v20  ;;  %v66_v28 = vld [vmem:[%s7215_s0 + $0x78] sm:$0xff]  ;;  %v503_v20 = vlaneseq }
  0x87   :  { %2680 = vmatpush1.bf16.msra.mxu0 %v4888_v23  ;;  %v4983_v23 = vld [vmem:[%s7214_s2 + $0x774] ss:$8 sps:$4 sm:$0xff]  }
  0x88   :  { %2721 = vmatpush1.bf16.msra.mxu1 %v4891_v24  ;;  %2681 = vmatprep.subr.bf16.mxu0 %v4896_v27  ;;  %v4978_v24 = vld [vmem:[%s7214_s2 + $0x670] ss:$8 sps:$4 sm:$0xff]   ;;  %v86_v27 = vpack.c.bf16 %v61_v21, %v61_v21  ;;  %v5064_v21 = vld [vmem:[%s7214_s2 + $0x694] ss:$8 sps:$4 sm:$0xff]  }
  0x89   :  { %2722 = vmatprep.subr.bf16.mxu1 %v4899_v29  ;;  %v4981_v29 = vld [vmem:[%s7214_s2 + $0x770] ss:$8 sps:$4 sm:$0xff]  }
  0x8b   :  { %2682 = vmatpush1.bf16.msra.mxu0 %v4894_v30  ;;  %v4986_v30 = vld [vmem:[%s7214_s2 + $0x664] ss:$8 sps:$4 sm:$0xff]  }
  0x8c   :  { %2723 = vmatpush1.bf16.msra.mxu1 %v4897_v31  ;;  %2683 = vmatprep.subr.bf16.mxu0 %v4902_v32  ;;  %v4989_v31 = vld [vmem:[%s7214_s2 + $0x764] ss:$8 sps:$4 sm:$0xff]   ;;  %v89_v32 = vpack.c.bf16 %v64_v25, %v64_v25  ;;  %v504_v25 = vshrl.u32 %v503_v20, 7 }
  0x8d   :  { %2724 = vmatprep.subr.bf16.mxu1 %v4905_v33  ;;  %v91_v33 = vpack.c.bf16 %v66_v28, %v66_v28  ;;  %v5068_v28 = vld [vmem:[%s7214_s2 + $0x680] ss:$8 sps:$4 sm:$0xff]   ;;  %v5121_v20 = vld [vmem:[%s7214_s2 + $0x904] ss:$8 sps:$4 sm:$0xff]  }
  0x8f   :  { %2684 = vmatpush1.bf16.msra.mxu0 %v4900_v34  ;;  %v4984_v34 = vld [vmem:[%s7214_s2 + $0x660] ss:$8 sps:$4 sm:$0xff]  }
  0x90   :  { %2725 = vmatpush1.bf16.msra.mxu1 %v4903_v35  ;;  %2685 = vmatprep.subr.bf16.mxu0 %v4908_v36  ;;  %v4987_v35 = vld [vmem:[%s7214_s2 + $0x760] ss:$8 sps:$4 sm:$0xff]   ;;  %v4992_v36 = vld [vmem:[%s7214_s2 + $0x654] ss:$8 sps:$4 sm:$0xff]  }
  0x91   :  { %2726 = vmatprep.subr.bf16.mxu1 %v4911_v37  ;;  %v4995_v37 = vld [vmem:[%s7214_s2 + $0x754] ss:$8 sps:$4 sm:$0xff]  }
  0x93   :  { %2686 = vmatpush1.bf16.msra.mxu0 %v4906_v38  ;;  %v4990_v38 = vld [vmem:[%s7214_s2 + $0x650] ss:$8 sps:$4 sm:$0xff]  }
  0x94   :  { %2727 = vmatpush1.bf16.msra.mxu1 %v4909_v39  ;;  %2687 = vmatprep.subr.bf16.mxu0 %v4914_v40  ;;  %v4993_v39 = vld [vmem:[%s7214_s2 + $0x750] ss:$8 sps:$4 sm:$0xff]   ;;  %v4998_v40 = vld [vmem:[%s7214_s2 + $0x644] ss:$8 sps:$4 sm:$0xff]  }
  0x95   :  { %2728 = vmatprep.subr.bf16.mxu1 %v4917_v41  ;;  %v5001_v41 = vld [vmem:[%s7214_s2 + $0x744] ss:$8 sps:$4 sm:$0xff]  }
  0x97   :  { %2688 = vmatpush1.bf16.msra.mxu0 %v4912_v42  ;;  %v4996_v42 = vld [vmem:[%s7214_s2 + $0x640] ss:$8 sps:$4 sm:$0xff]  }
  0x98   :  { %2729 = vmatpush1.bf16.msra.mxu1 %v4915_v43  ;;  %2689 = vmatprep.subr.bf16.mxu0 %v4920_v44  ;;  %v4999_v43 = vld [vmem:[%s7214_s2 + $0x740] ss:$8 sps:$4 sm:$0xff]   ;;  %v5004_v44 = vld [vmem:[%s7214_s2 + $0x634] ss:$8 sps:$4 sm:$0xff]  }
  0x99   :  { %2730 = vmatprep.subr.bf16.mxu1 %v4923_v45  ;;  %v5007_v45 = vld [vmem:[%s7214_s2 + $0x734] ss:$8 sps:$4 sm:$0xff]  }
  0x9b   :  { %2690 = vmatpush1.bf16.msra.mxu0 %v4918_v46  ;;  %v5002_v46 = vld [vmem:[%s7214_s2 + $0x630] ss:$8 sps:$4 sm:$0xff]  }
  0x9c   :  { %2731 = vmatpush1.bf16.msra.mxu1 %v4921_v47  ;;  %2691 = vmatprep.subr.bf16.mxu0 %v4926_v48  ;;  %v5005_v47 = vld [vmem:[%s7214_s2 + $0x730] ss:$8 sps:$4 sm:$0xff]   ;;  %v5010_v48 = vld [vmem:[%s7214_s2 + $0x624] ss:$8 sps:$4 sm:$0xff]  }
  0x9d   :  { %2732 = vmatprep.subr.bf16.mxu1 %v4929_v49  ;;  %v5013_v49 = vld [vmem:[%s7214_s2 + $0x724] ss:$8 sps:$4 sm:$0xff]  }
  0x9f   :  { %2692 = vmatpush1.bf16.msra.mxu0 %v4924_v50  ;;  %v5008_v50 = vld [vmem:[%s7214_s2 + $0x620] ss:$8 sps:$4 sm:$0xff]  }
  0xa0   :  { %2733 = vmatpush1.bf16.msra.mxu1 %v4927_v51  ;;  %2693 = vmatprep.subr.bf16.mxu0 %v4932_v52  ;;  %v5011_v51 = vld [vmem:[%s7214_s2 + $0x720] ss:$8 sps:$4 sm:$0xff]   ;;  %v5016_v52 = vld [vmem:[%s7214_s2 + $0x614] ss:$8 sps:$4 sm:$0xff]  }
  0xa1   :  { %2734 = vmatprep.subr.bf16.mxu1 %v4935_v53  ;;  %v5019_v53 = vld [vmem:[%s7214_s2 + $0x714] ss:$8 sps:$4 sm:$0xff]  }
  0xa3   :  { %2694 = vmatpush2.bf16.msra.mxu0 %v4930_v54  ;;  %v5014_v54 = vld [vmem:[%s7214_s2 + $0x610] ss:$8 sps:$4 sm:$0xff]  }
  0xa4   :  { %2735 = vmatpush2.bf16.msra.mxu1 %v4933_v55  ;;  %2695 = vmatprep.subr.bf16.mxu0 %v4938_v56  ;;  %v5017_v55 = vld [vmem:[%s7214_s2 + $0x710] ss:$8 sps:$4 sm:$0xff]   ;;  %v5022_v56 = vld [vmem:[%s7214_s2 + $0x604] ss:$8 sps:$4 sm:$0xff]  }
  0xa5   :  { %2736 = vmatprep.subr.bf16.mxu1 %v4941_v57  ;;  %v5025_v57 = vld [vmem:[%s7214_s2 + $0x704] ss:$8 sps:$4 sm:$0xff]  }
  0xa7   :  { %2696 = vmatpush2.bf16.msra.mxu0 %v4936_v58  ;;  %v5020_v58 = vld [vmem:[%s7214_s2 + $0x600] ss:$8 sps:$4 sm:$0xff]  }
  0xa8   :  { %2737 = vmatpush2.bf16.msra.mxu1 %v4939_v59  ;;  %2697 = vmatprep.subr.bf16.mxu0 %v4944_v60  ;;  %v5023_v59 = vld [vmem:[%s7214_s2 + $0x700] ss:$8 sps:$4 sm:$0xff]   ;;  %v5028_v60 = vld [vmem:[%s7214_s2 + $0x6f4] ss:$8 sps:$4 sm:$0xff]  }
  0xa9   :  { %2738 = vmatprep.subr.bf16.mxu1 %v4947_v61  ;;  %v5031_v61 = vld [vmem:[%s7214_s2 + $0x7f4] ss:$8 sps:$4 sm:$0xff]  }
  0xab   :  { %2698 = vmatpush2.bf16.msra.mxu0 %v4942_v62  ;;  %v5026_v62 = vld [vmem:[%s7214_s2 + $0x6f0] ss:$8 sps:$4 sm:$0xff]  }
  0xac   :  { %2739 = vmatpush2.bf16.msra.mxu1 %v4945_v63  ;;  %2699 = vmatprep.subr.bf16.mxu0 %v4950_v0  ;;  %v5029_v63 = vld [vmem:[%s7214_s2 + $0x7f0] ss:$8 sps:$4 sm:$0xff]   ;;  %v5034_v0 = vld [vmem:[%s7214_s2 + $0x6e4] ss:$8 sps:$4 sm:$0xff]  }
  0xad   :  { %2740 = vmatprep.subr.bf16.mxu1 %v4953_v1  ;;  %v5037_v1 = vld [vmem:[%s7214_s2 + $0x7e4] ss:$8 sps:$4 sm:$0xff]  }
  0xaf   :  { %2700 = vmatpush2.bf16.msra.mxu0 %v4948_v2  ;;  %v5032_v2 = vld [vmem:[%s7214_s2 + $0x6e0] ss:$8 sps:$4 sm:$0xff]  }
  0xb0   :  { %2741 = vmatpush2.bf16.msra.mxu1 %v4951_v3  ;;  %2701 = vmatprep.subr.bf16.mxu0 %v4956_v4  ;;  %v5035_v3 = vld [vmem:[%s7214_s2 + $0x7e0] ss:$8 sps:$4 sm:$0xff]   ;;  %v5040_v4 = vld [vmem:[%s7214_s2 + $0x6d4] ss:$8 sps:$4 sm:$0xff]  }
  0xb1   :  { %2742 = vmatprep.subr.bf16.mxu1 %v4959_v5  ;;  %v5043_v5 = vld [vmem:[%s7214_s2 + $0x7d4] ss:$8 sps:$4 sm:$0xff]  }
  0xb3   :  { %2702 = vmatpush2.bf16.msra.mxu0 %v4954_v6  ;;  %v5038_v6 = vld [vmem:[%s7214_s2 + $0x6d0] ss:$8 sps:$4 sm:$0xff]  }
  0xb4   :  { %2743 = vmatpush2.bf16.msra.mxu1 %v4957_v7  ;;  %2703 = vmatprep.subr.bf16.mxu0 %v4962_v8  ;;  %v5041_v7 = vld [vmem:[%s7214_s2 + $0x7d0] ss:$8 sps:$4 sm:$0xff]   ;;  %v5046_v8 = vld [vmem:[%s7214_s2 + $0x6c4] ss:$8 sps:$4 sm:$0xff]  }
  0xb5   :  { %2744 = vmatprep.subr.bf16.mxu1 %v4965_v9  ;;  %v5049_v9 = vld [vmem:[%s7214_s2 + $0x7c4] ss:$8 sps:$4 sm:$0xff]  }
  0xb7   :  { %2704 = vmatpush2.bf16.msra.mxu0 %v4960_v10  ;;  %v5044_v10 = vld [vmem:[%s7214_s2 + $0x6c0] ss:$8 sps:$4 sm:$0xff]  }
  0xb8   :  { %2745 = vmatpush2.bf16.msra.mxu1 %v4963_v11  ;;  %2705 = vmatprep.subr.bf16.mxu0 %v4968_v12  ;;  %v5047_v11 = vld [vmem:[%s7214_s2 + $0x7c0] ss:$8 sps:$4 sm:$0xff]   ;;  %v5052_v12 = vld [vmem:[%s7214_s2 + $0x6b4] ss:$8 sps:$4 sm:$0xff]  }
  0xb9   :  { %2746 = vmatprep.subr.bf16.mxu1 %v4971_v13  ;;  %v5055_v13 = vld [vmem:[%s7214_s2 + $0x7b4] ss:$8 sps:$4 sm:$0xff]  }
  0xbb   :  { %2706 = vmatpush2.bf16.msra.mxu0 %v4966_v14  ;;  %v5050_v14 = vld [vmem:[%s7214_s2 + $0x6b0] ss:$8 sps:$4 sm:$0xff]  }
  0xbc   :  { %2747 = vmatpush2.bf16.msra.mxu1 %v4969_v15  ;;  %2707 = vmatprep.subr.bf16.mxu0 %v4974_v16  ;;  %v5053_v15 = vld [vmem:[%s7214_s2 + $0x7b0] ss:$8 sps:$4 sm:$0xff]   ;;  %v5058_v16 = vld [vmem:[%s7214_s2 + $0x6a4] ss:$8 sps:$4 sm:$0xff]  }
  0xbd   :  { %2748 = vmatprep.subr.bf16.mxu1 %v4977_v17  ;;  %v5061_v17 = vld [vmem:[%s7214_s2 + $0x7a4] ss:$8 sps:$4 sm:$0xff]  }
  0xbf   :  { %2708 = vmatpush2.bf16.msra.mxu0 %v4972_v18  ;;  %v5056_v18 = vld [vmem:[%s7214_s2 + $0x6a0] ss:$8 sps:$4 sm:$0xff]  }
  0xc0   :  { %2749 = vmatpush2.bf16.msra.mxu1 %v4975_v19  ;;  %2759 = vmatprep.subr.bf16.mxu0 %v4980_v22  ;;  %v5059_v19 = vld [vmem:[%s7214_s2 + $0x7a0] ss:$8 sps:$4 sm:$0xff]   ;;  %v5067_v22 = vld [vmem:[%s7214_s2 + $0x794] ss:$8 sps:$4 sm:$0xff]  }
  0xc1   :  { %2800 = vmatprep.subr.bf16.mxu1 %v4983_v23  ;;  %v5062_v23 = vld [vmem:[%s7214_s2 + $0x690] ss:$8 sps:$4 sm:$0xff]  }
  0xc2   :  { %2710 = vmatmul.mubr.bf16.vlgmr.msra.gmra.mxu0 %v84_v26  ;;  %v5070_v26 = vld [vmem:[%s7214_s2 + $0x684] ss:$8 sps:$4 sm:$0xff]  }
  0xc3   :  { %2751 = vmatmul.mubr.bf16.vlgmr.msra.gmra.mxu1 %v86_v27  ;;  %2760 = vmatpush1.bf16.msra.mxu0 %v4978_v24  ;;  %v5065_v24 = vld [vmem:[%s7214_s2 + $0x790] ss:$8 sps:$4 sm:$0xff]   ;;  %v5073_v27 = vld [vmem:[%s7214_s2 + $0x784] ss:$8 sps:$4 sm:$0xff]  }
  0xc4   :  { %2801 = vmatpush1.bf16.msra.mxu1 %v4981_v29  ;;  %2761 = vmatprep.subr.bf16.mxu0 %v4986_v30  ;;  %v5071_v29 = vld [vmem:[%s7214_s2 + $0x780] ss:$8 sps:$4 sm:$0xff]  }
  0xc5   :  { %2802 = vmatprep.subr.bf16.mxu1 %v4989_v31  ;;  %2791 = vmatprep.mubr.bf16.mxu0 %v89_v32  ;;  %v501_v30 = vld [vmem:[%s7216_s3] sm:$0x3]  ;;  %v6343_v32 = vsub.s32 0, %v504_v25 }
  0xc6   :  { %2832 = vmatprep.mubr.bf16.mxu1 %v91_v33  ;;  %v63_v31 = vld [vmem:[%s7215_s0 + $0x60] sm:$0xff]  ;;  %v65_v33 = vld [vmem:[%s7215_s0 + $0x70] sm:$0xff] }
  0xc7   :  { %2762 = vmatpush1.bf16.msra.mxu0 %v4984_v34  ;;  %v5076_v34 = vld [vmem:[%s7214_s2 + $0x874] ss:$8 sps:$4 sm:$0xff]  }
  0xc8   :  { %2803 = vmatpush1.bf16.msra.mxu1 %v4987_v35  ;;  %2763 = vmatprep.subr.bf16.mxu0 %v4992_v36  ;;  %v5079_v35 = vld [vmem:[%s7214_s2 + $0x974] ss:$8 sps:$4 sm:$0xff]   ;;  %v5074_v36 = vld [vmem:[%s7214_s2 + $0x870] ss:$8 sps:$4 sm:$0xff]  }
  0xc9   :  { %2804 = vmatprep.subr.bf16.mxu1 %v4995_v37  ;;  %v6357_v37 = vsub.s32 1, %v504_v25  ;;  %v5122_v25 = vld [vmem:[%s7214_s2 + $0x8f0] ss:$8 sps:$4 sm:$0xff]  }
  0xcb   :  { %2764 = vmatpush1.bf16.msra.mxu0 %v4990_v38  ;;  %v68_v38 = vld [vmem:[%s7215_s0 + $0x88] sm:$0xff] }
  0xcc   :  { %2805 = vmatpush1.bf16.msra.mxu1 %v4993_v39  ;;  %2765 = vmatprep.subr.bf16.mxu0 %v4998_v40  ;;  %v88_v39 = vpack.c.bf16 %v63_v31, %v63_v31  ;;  %v90_v40 = vpack.c.bf16 %v65_v33, %v65_v33  ;;  %v5136_v31 = vld [vmem:[%s7214_s2 + $0x8d4] ss:$8 sps:$4 sm:$0xff]  }
  0xcd   :  { %2806 = vmatprep.subr.bf16.mxu1 %v5001_v41  ;;  %v70_v41 = vld [vmem:[%s7215_s0 + $0x98] sm:$0xff] }
  0xce   :  { %v5139_v33 = vld [vmem:[%s7214_s2 + $0x9d4] ss:$8 sps:$4 sm:$0xff]  }
  0xcf   :  { %2766 = vmatpush1.bf16.msra.mxu0 %v4996_v42  ;;  %v506_v42 = vrot.slane %v501_v30, %v6343_v32 }
  0xd0   :  { %2807 = vmatpush1.bf16.msra.mxu1 %v4999_v43  ;;  %2767 = vmatprep.subr.bf16.mxu0 %v5004_v44  ;;  %v5077_v43 = vld [vmem:[%s7214_s2 + $0x970] ss:$8 sps:$4 sm:$0xff]   ;;  %v5082_v44 = vld [vmem:[%s7214_s2 + $0x864] ss:$8 sps:$4 sm:$0xff]  }
  0xd1   :  { %2808 = vmatprep.subr.bf16.mxu1 %v5007_v45  ;;  %v5085_v45 = vld [vmem:[%s7214_s2 + $0x964] ss:$8 sps:$4 sm:$0xff]  }
  0xd3   :  { %2768 = vmatpush1.bf16.msra.mxu0 %v5002_v46  ;;  %v510_v46 = vrot.slane %v501_v30, %v6357_v37  ;;  %v5131_v30 = vld [vmem:[%s7214_s2 + $0x9e0] ss:$8 sps:$4 sm:$0xff]  }
  0xd4   :  { %2809 = vmatpush1.bf16.msra.mxu1 %v5005_v47  ;;  %2769 = vmatprep.subr.bf16.mxu0 %v5010_v48  ;;  %v93_v47 = vpack.c.bf16 %v68_v38, %v68_v38  ;;  %v95_v48 = vpack.c.bf16 %v70_v41, %v70_v41  ;;  %v5145_v38 = vld [vmem:[%s7214_s2 + $0x9c4] ss:$8 sps:$4 sm:$0xff]   ;;  %v5148_v41 = vld [vmem:[%s7214_s2 + $0x8b4] ss:$8 sps:$4 sm:$0xff]  }
  0xd5   :  { %2810 = vmatprep.subr.bf16.mxu1 %v5013_v49 }
  0xd7   :  { %2770 = vmatpush1.bf16.msra.mxu0 %v5008_v50 }
  0xd8   :  { %2811 = vmatpush1.bf16.msra.mxu1 %v5011_v51  ;;  %2771 = vmatprep.subr.bf16.mxu0 %v5016_v52  ;;  %v5080_v51 = vld [vmem:[%s7214_s2 + $0x860] ss:$8 sps:$4 sm:$0xff]  }
  0xd9   :  { %2812 = vmatprep.subr.bf16.mxu1 %v5019_v53  ;;  %v5083_v53 = vld [vmem:[%s7214_s2 + $0x960] ss:$8 sps:$4 sm:$0xff]  }
  0xdb   :  { %2772 = vmatpush1.bf16.msra.mxu0 %v5014_v54 }
  0xdc   :  { %2813 = vmatpush1.bf16.msra.mxu1 %v5017_v55  ;;  %2773 = vmatprep.subr.bf16.mxu0 %v5022_v56  ;;  %v5088_v56 = vld [vmem:[%s7214_s2 + $0x854] ss:$8 sps:$4 sm:$0xff]  }
  0xdd   :  { %2814 = vmatprep.subr.bf16.mxu1 %v5025_v57  ;;  %v5091_v57 = vld [vmem:[%s7214_s2 + $0x954] ss:$8 sps:$4 sm:$0xff]  }
  0xdf   :  { %2774 = vmatpush1.bf16.msra.mxu0 %v5020_v58 }
  0xe0   :  { %2815 = vmatpush1.bf16.msra.mxu1 %v5023_v59  ;;  %2775 = vmatprep.subr.bf16.mxu0 %v5028_v60 }
  0xe1   :  { %2816 = vmatprep.subr.bf16.mxu1 %v5031_v61  ;;  %v5086_v61 = vld [vmem:[%s7214_s2 + $0x850] ss:$8 sps:$4 sm:$0xff]  }
  0xe3   :  { %2776 = vmatpush2.bf16.msra.mxu0 %v5026_v62 }
  0xe4   :  { %2817 = vmatpush2.bf16.msra.mxu1 %v5029_v63  ;;  %2777 = vmatprep.subr.bf16.mxu0 %v5034_v0  ;;  %v5089_v0 = vld [vmem:[%s7214_s2 + $0x950] ss:$8 sps:$4 sm:$0xff]  }
  0xe5   :  { %2818 = vmatprep.subr.bf16.mxu1 %v5037_v1 }
  0xe7   :  { %2778 = vmatpush2.bf16.msra.mxu0 %v5032_v2  ;;  %v5094_v2 = vld [vmem:[%s7214_s2 + $0x844] ss:$8 sps:$4 sm:$0xff]  }
  0xe8   :  { %2819 = vmatpush2.bf16.msra.mxu1 %v5035_v3  ;;  %2779 = vmatprep.subr.bf16.mxu0 %v5040_v4  ;;  %v5097_v3 = vld [vmem:[%s7214_s2 + $0x944] ss:$8 sps:$4 sm:$0xff]  }
  0xe9   :  { %2820 = vmatprep.subr.bf16.mxu1 %v5043_v5  ;;  %v5092_v5 = vld [vmem:[%s7214_s2 + $0x840] ss:$8 sps:$4 sm:$0xff]  }
  0xeb   :  { %2780 = vmatpush2.bf16.msra.mxu0 %v5038_v6  ;;  %v5095_v6 = vld [vmem:[%s7214_s2 + $0x940] ss:$8 sps:$4 sm:$0xff]  }
  0xec   :  { %2821 = vmatpush2.bf16.msra.mxu1 %v5041_v7  ;;  %2781 = vmatprep.subr.bf16.mxu0 %v5046_v8  ;;  %v5100_v7 = vld [vmem:[%s7214_s2 + $0x834] ss:$8 sps:$4 sm:$0xff]  }
  0xed   :  { %2822 = vmatprep.subr.bf16.mxu1 %v5049_v9  ;;  %v5103_v8 = vld [vmem:[%s7214_s2 + $0x934] ss:$8 sps:$4 sm:$0xff]   ;;  %v5098_v9 = vld [vmem:[%s7214_s2 + $0x830] ss:$8 sps:$4 sm:$0xff]  }
  0xef   :  { %2782 = vmatpush2.bf16.msra.mxu0 %v5044_v10  ;;  %v5101_v10 = vld [vmem:[%s7214_s2 + $0x930] ss:$8 sps:$4 sm:$0xff]  }
  0xf0   :  { %2823 = vmatpush2.bf16.msra.mxu1 %v5047_v11  ;;  %2783 = vmatprep.subr.bf16.mxu0 %v5052_v12  ;;  %v5106_v11 = vld [vmem:[%s7214_s2 + $0x824] ss:$8 sps:$4 sm:$0xff]  }
  0xf1   :  { %2824 = vmatprep.subr.bf16.mxu1 %v5055_v13  ;;  %v5109_v12 = vld [vmem:[%s7214_s2 + $0x924] ss:$8 sps:$4 sm:$0xff]   ;;  %v5104_v13 = vld [vmem:[%s7214_s2 + $0x820] ss:$8 sps:$4 sm:$0xff]  }
  0xf3   :  { %2784 = vmatpush2.bf16.msra.mxu0 %v5050_v14  ;;  %v5107_v14 = vld [vmem:[%s7214_s2 + $0x920] ss:$8 sps:$4 sm:$0xff]  }
  0xf4   :  { %2825 = vmatpush2.bf16.msra.mxu1 %v5053_v15  ;;  %2785 = vmatprep.subr.bf16.mxu0 %v5058_v16  ;;  %v5112_v15 = vld [vmem:[%s7214_s2 + $0x814] ss:$8 sps:$4 sm:$0xff]  }
  0xf5   :  { %2826 = vmatprep.subr.bf16.mxu1 %v5061_v17  ;;  %v5115_v16 = vld [vmem:[%s7214_s2 + $0x914] ss:$8 sps:$4 sm:$0xff]   ;;  %v5110_v17 = vld [vmem:[%s7214_s2 + $0x810] ss:$8 sps:$4 sm:$0xff]  }
  0xf7   :  { %2786 = vmatpush2.bf16.msra.mxu0 %v5056_v18  ;;  %v5113_v18 = vld [vmem:[%s7214_s2 + $0x910] ss:$8 sps:$4 sm:$0xff]  }
  0xf8   :  { %2827 = vmatpush2.bf16.msra.mxu1 %v5059_v19  ;;  %2787 = vmatprep.subr.bf16.mxu0 %v5064_v21  ;;  %v5118_v19 = vld [vmem:[%s7214_s2 + $0x804] ss:$8 sps:$4 sm:$0xff]   ;;  %v5116_v21 = vld [vmem:[%s7214_s2 + $0x800] ss:$8 sps:$4 sm:$0xff]  }
  0xf9   :  { %2828 = vmatprep.subr.bf16.mxu1 %v5067_v22  ;;  %v5119_v22 = vld [vmem:[%s7214_s2 + $0x900] ss:$8 sps:$4 sm:$0xff]  }
  0xfb   :  { %2788 = vmatpush2.bf16.msra.mxu0 %v5062_v23  ;;  %v5124_v23 = vld [vmem:[%s7214_s2 + $0x8f4] ss:$8 sps:$4 sm:$0xff]  }
  0xfc   :  { %2829 = vmatpush2.bf16.msra.mxu1 %v5065_v24  ;;  %2789 = vmatprep.subr.bf16.mxu0 %v5070_v26  ;;  %v5127_v24 = vld [vmem:[%s7214_s2 + $0x9f4] ss:$8 sps:$4 sm:$0xff]   ;;  %v5125_v26 = vld [vmem:[%s7214_s2 + $0x9f0] ss:$8 sps:$4 sm:$0xff]  }
  0xfd   :  { %2830 = vmatprep.subr.bf16.mxu1 %v5073_v27  ;;  %v5130_v27 = vld [vmem:[%s7214_s2 + $0x8e4] ss:$8 sps:$4 sm:$0xff]  }
  0xff   :  { %2790 = vmatpush2.bf16.msra.mxu0 %v5068_v28  ;;  %v5133_v28 = vld [vmem:[%s7214_s2 + $0x9e4] ss:$8 sps:$4 sm:$0xff]  }
 0x100   :  { %2831 = vmatpush2.bf16.msra.mxu1 %v5071_v29  ;;  %2841 = vmatprep.subr.bf16.mxu0 %v5076_v34  ;;  %v5128_v29 = vld [vmem:[%s7214_s2 + $0x8e0] ss:$8 sps:$4 sm:$0xff]   ;;  %v5134_v34 = vld [vmem:[%s7214_s2 + $0x8d0] ss:$8 sps:$4 sm:$0xff]  }
 0x101   :  { %2882 = vmatprep.subr.bf16.mxu1 %v5079_v35  ;;  %v5137_v35 = vld [vmem:[%s7214_s2 + $0x9d0] ss:$8 sps:$4 sm:$0xff]  }
 0x102   :  { %v2547_v49 = vpop.f32.mrf.mxu0  ;;  %2792 = vmatmul.mubr.bf16.vlgmr.msra.gmra.mxu0 %v88_v39  ;;  %v5140_v39 = vld [vmem:[%s7214_s2 + $0x8c0] ss:$8 sps:$4 sm:$0xff]  }
 0x103   :  { %v2588_v50 = vpop.f32.mrf.mxu1  ;;  %2833 = vmatmul.mubr.bf16.vlgmr.msra.gmra.mxu1 %v90_v40  ;;  %v2548_v52 = vadd.f32 %v2547_v49, %v506_v42  ;;  %2842 = vmatpush1.bf16.msra.mxu0 %v5074_v36  ;;  %v5142_v36 = vld [vmem:[%s7214_s2 + $0x8c4] ss:$8 sps:$4 sm:$0xff]   ;;  %v5143_v40 = vld [vmem:[%s7214_s2 + $0x9c0] ss:$8 sps:$4 sm:$0xff]   ;;  %v5151_v42 = vld [vmem:[%s7214_s2 + $0x9b4] ss:$8 sps:$4 sm:$0xff]  }
 0x104   :  { %2883 = vmatpush1.bf16.msra.mxu1 %v5077_v43  ;;  %v2549_v54 = vpop.f32.mrf.mxu0  ;;  %2843 = vmatprep.subr.bf16.mxu0 %v5082_v44  ;;  %v5146_v43 = vld [vmem:[%s7214_s2 + $0x8b0] ss:$8 sps:$4 sm:$0xff]   ;;  %v5160_v49 = vld [vmem:[%s7214_s2 + $0x894] ss:$8 sps:$4 sm:$0xff]  }
 0x105   :  { %v2590_v55 = vpop.f32.mrf.mxu1  ;;  %2884 = vmatprep.subr.bf16.mxu1 %v5085_v45  ;;  %v6388_v58 = vadd.f32 %v2588_v50, %v2548_v52  ;;  %v2550_v59 = vadd.f32 %v2549_v54, %v510_v46  ;;  %2873 = vmatprep.mubr.bf16.mxu0 %v93_v47  ;;  %v5149_v44 = vld [vmem:[%s7214_s2 + $0x9b0] ss:$8 sps:$4 sm:$0xff]   ;;  %v5154_v45 = vld [vmem:[%s7214_s2 + $0x8a4] ss:$8 sps:$4 sm:$0xff]   ;;  %v5152_v47 = vld [vmem:[%s7214_s2 + $0x8a0] ss:$8 sps:$4 sm:$0xff]  }
 0x106   :  { %2914 = vmatprep.mubr.bf16.mxu1 %v95_v48  ;;  %v2551_v62 = vpop.f32.mrf.mxu0  ;;  %v5157_v46 = vld [vmem:[%s7214_s2 + $0x9a4] ss:$8 sps:$4 sm:$0xff]   ;;  %v5155_v48 = vld [vmem:[%s7214_s2 + $0x9a0] ss:$8 sps:$4 sm:$0xff]   ;;  %v5163_v50 = vld [vmem:[%s7214_s2 + $0x994] ss:$8 sps:$4 sm:$0xff]  }
 0x107   :  { %v2592_v60 = vpop.f32.mrf.mxu1  ;;  %v6393_v63 = vadd.f32 %v2590_v55, %v2550_v59  ;;  %2844 = vmatpush1.bf16.msra.mxu0 %v5080_v51  ;;  %v5158_v51 = vld [vmem:[%s7214_s2 + $0x890] ss:$8 sps:$4 sm:$0xff]   ;;  %v5169_v54 = vld [vmem:[%s7214_s2 + $0x984] ss:$8 sps:$4 sm:$0xff]   ;;  %v5164_v55 = vld [vmem:[%s7214_s2 + $0x880] ss:$8 sps:$4 sm:$0xff]  }
 0x108   :  { %2885 = vmatpush1.bf16.msra.mxu1 %v5083_v53  ;;  %2845 = vmatprep.subr.bf16.mxu0 %v5088_v56  ;;  %v2552_v4 = vpop.f32.mrf.mxu0  ;;  %v5161_v52 = vld [vmem:[%s7214_s2 + $0x990] ss:$8 sps:$4 sm:$0xff]   ;;  %v5166_v53 = vld [vmem:[%s7214_s2 + $0x884] ss:$8 sps:$4 sm:$0xff]   ;;  %v5167_v56 = vld [vmem:[%s7214_s2 + $0x980] ss:$8 sps:$4 sm:$0xff]  }
 0x109   :  { %v2593_v1 = vpop.f32.mrf.mxu1  ;;  %2886 = vmatprep.subr.bf16.mxu1 %v5091_v57  ;;  %v67_v57 = vld [vmem:[%s7215_s0 + $0x80] sm:$0xff]  ;;  %v69_v59 = vld [vmem:[%s7215_s0 + $0x90] sm:$0xff] }
 0x10a   :  { %v5172_v60 = vld [vmem:[%s7214_s2 + $0xa74] ss:$8 sps:$4 sm:$0xff]   ;;  %v92_v62 = vpack.c.bf16 %v67_v57, %v67_v57  ;;  %v72_v1 = vld [vmem:[%s7215_s0 + $0xa8] sm:$0xff]  ;;  %v5173_v4 = vld [vmem:[%s7214_s2 + $0xb70] ss:$8 sps:$4 sm:$0xff]  }
 0x10b   :  { %2846 = vmatpush1.bf16.msra.mxu0 %v5086_v61  ;;  %v5175_v61 = vld [vmem:[%s7214_s2 + $0xb74] ss:$8 sps:$4 sm:$0xff]   ;;  %v5230_v57 = vld [vmem:[%s7214_s2 + $0xad0] ss:$8 sps:$4 sm:$0xff]  }
 0x10c   :  { %2887 = vmatpush1.bf16.msra.mxu1 %v5089_v0  ;;  %2847 = vmatprep.subr.bf16.mxu0 %v5094_v2  ;;  %v94_v0 = vpack.c.bf16 %v69_v59, %v69_v59  ;;  %v74_v2 = vld [vmem:[%s7215_s0 + $0xb8] sm:$0xff] }
 0x10d   :  { %2888 = vmatprep.subr.bf16.mxu1 %v5097_v3  ;;  %v5170_v3 = vld [vmem:[%s7214_s2 + $0xa70] ss:$8 sps:$4 sm:$0xff]  }
 0x10e   :  { %v5233_v59 = vld [vmem:[%s7214_s2 + $0xbd0] ss:$8 sps:$4 sm:$0xff]  }
 0x10f   :  { %2848 = vmatpush1.bf16.msra.mxu0 %v5092_v5  ;;  %v5178_v5 = vld [vmem:[%s7214_s2 + $0xa64] ss:$8 sps:$4 sm:$0xff]  }
 0x110   :  { %2889 = vmatpush1.bf16.msra.mxu1 %v5095_v6  ;;  %2849 = vmatprep.subr.bf16.mxu0 %v5100_v7  ;;  %v5181_v6 = vld [vmem:[%s7214_s2 + $0xb64] ss:$8 sps:$4 sm:$0xff]   ;;  %v97_v7 = vpack.c.bf16 %v72_v1, %v72_v1  ;;  %v5244_v1 = vld [vmem:[%s7214_s2 + $0xab4] ss:$8 sps:$4 sm:$0xff]  }
 0x111   :  { %2890 = vmatprep.subr.bf16.mxu1 %v5103_v8  ;;  %v99_v8 = vpack.c.bf16 %v74_v2, %v74_v2  ;;  %v5247_v2 = vld [vmem:[%s7214_s2 + $0xbb4] ss:$8 sps:$4 sm:$0xff]  }
 0x113   :  { %2850 = vmatpush1.bf16.msra.mxu0 %v5098_v9 }
 0x114   :  { %2891 = vmatpush1.bf16.msra.mxu1 %v5101_v10  ;;  %2851 = vmatprep.subr.bf16.mxu0 %v5106_v11 }
 0x115   :  { %2892 = vmatprep.subr.bf16.mxu1 %v5109_v12  ;;  %v5176_v12 = vld [vmem:[%s7214_s2 + $0xa60] ss:$8 sps:$4 sm:$0xff]  }
 0x117   :  { %2852 = vmatpush1.bf16.msra.mxu0 %v5104_v13  ;;  %v5179_v13 = vld [vmem:[%s7214_s2 + $0xb60] ss:$8 sps:$4 sm:$0xff]  }
 0x118   :  { %2893 = vmatpush1.bf16.msra.mxu1 %v5107_v14  ;;  %2853 = vmatprep.subr.bf16.mxu0 %v5112_v15 }
 0x119   :  { %2894 = vmatprep.subr.bf16.mxu1 %v5115_v16  ;;  %v5184_v16 = vld [vmem:[%s7214_s2 + $0xa54] ss:$8 sps:$4 sm:$0xff]  }
 0x11b   :  { %2854 = vmatpush1.bf16.msra.mxu0 %v5110_v17 }
 0x11c   :  { %2895 = vmatpush1.bf16.msra.mxu1 %v5113_v18  ;;  %2855 = vmatprep.subr.bf16.mxu0 %v5118_v19 }
 0x11d   :  { %2896 = vmatprep.subr.bf16.mxu1 %v5121_v20 }
 0x11f   :  { %2856 = vmatpush1.bf16.msra.mxu0 %v5116_v21 }
 0x120   :  { %2897 = vmatpush1.bf16.msra.mxu1 %v5119_v22  ;;  %2857 = vmatprep.subr.bf16.mxu0 %v5124_v23  ;;  %v5182_v22 = vld [vmem:[%s7214_s2 + $0xa50] ss:$8 sps:$4 sm:$0xff]  }
 0x121   :  { %2898 = vmatprep.subr.bf16.mxu1 %v5127_v24  ;;  %v5185_v23 = vld [vmem:[%s7214_s2 + $0xb50] ss:$8 sps:$4 sm:$0xff]  }
 0x123   :  { %2858 = vmatpush2.bf16.msra.mxu0 %v5122_v25  ;;  %v5193_v25 = vld [vmem:[%s7214_s2 + $0xb44] ss:$8 sps:$4 sm:$0xff]  }
 0x124   :  { %2899 = vmatpush2.bf16.msra.mxu1 %v5125_v26  ;;  %2859 = vmatprep.subr.bf16.mxu0 %v5130_v27  ;;  %v5188_v27 = vld [vmem:[%s7214_s2 + $0xa40] ss:$8 sps:$4 sm:$0xff]  }
 0x125   :  { %2900 = vmatprep.subr.bf16.mxu1 %v5133_v28  ;;  %v5191_v28 = vld [vmem:[%s7214_s2 + $0xb40] ss:$8 sps:$4 sm:$0xff]  }
 0x127   :  { %2860 = vmatpush2.bf16.msra.mxu0 %v5128_v29  ;;  %v5196_v29 = vld [vmem:[%s7214_s2 + $0xa34] ss:$8 sps:$4 sm:$0xff]  }
 0x128   :  { %2901 = vmatpush2.bf16.msra.mxu1 %v5131_v30  ;;  %2861 = vmatprep.subr.bf16.mxu0 %v5136_v31  ;;  %v5199_v30 = vld [vmem:[%s7214_s2 + $0xb34] ss:$8 sps:$4 sm:$0xff]   ;;  %v5194_v31 = vld [vmem:[%s7214_s2 + $0xa30] ss:$8 sps:$4 sm:$0xff]  }
 0x129   :  { %2902 = vmatprep.subr.bf16.mxu1 %v5139_v33  ;;  %v5197_v33 = vld [vmem:[%s7214_s2 + $0xb30] ss:$8 sps:$4 sm:$0xff]  }
 0x12b   :  { %2862 = vmatpush2.bf16.msra.mxu0 %v5134_v34  ;;  %v5202_v34 = vld [vmem:[%s7214_s2 + $0xa24] ss:$8 sps:$4 sm:$0xff]  }
 0x12c   :  { %2903 = vmatpush2.bf16.msra.mxu1 %v5137_v35  ;;  %2863 = vmatprep.subr.bf16.mxu0 %v5142_v36  ;;  %v5205_v35 = vld [vmem:[%s7214_s2 + $0xb24] ss:$8 sps:$4 sm:$0xff]   ;;  %v5200_v36 = vld [vmem:[%s7214_s2 + $0xa20] ss:$8 sps:$4 sm:$0xff]  }
 0x12d   :  { %2904 = vmatprep.subr.bf16.mxu1 %v5145_v38  ;;  %v5203_v38 = vld [vmem:[%s7214_s2 + $0xb20] ss:$8 sps:$4 sm:$0xff]  }
 0x12f   :  { %2864 = vmatpush2.bf16.msra.mxu0 %v5140_v39  ;;  %v5208_v39 = vld [vmem:[%s7214_s2 + $0xa14] ss:$8 sps:$4 sm:$0xff]  }
 0x130   :  { %2905 = vmatpush2.bf16.msra.mxu1 %v5143_v40  ;;  %2865 = vmatprep.subr.bf16.mxu0 %v5148_v41  ;;  %v5211_v40 = vld [vmem:[%s7214_s2 + $0xb14] ss:$8 sps:$4 sm:$0xff]   ;;  %v5206_v41 = vld [vmem:[%s7214_s2 + $0xa10] ss:$8 sps:$4 sm:$0xff]  }
 0x131   :  { %2906 = vmatprep.subr.bf16.mxu1 %v5151_v42  ;;  %v5209_v42 = vld [vmem:[%s7214_s2 + $0xb10] ss:$8 sps:$4 sm:$0xff]  }
 0x133   :  { %2866 = vmatpush2.bf16.msra.mxu0 %v5146_v43  ;;  %v5214_v43 = vld [vmem:[%s7214_s2 + $0xa04] ss:$8 sps:$4 sm:$0xff]  }
 0x134   :  { %2907 = vmatpush2.bf16.msra.mxu1 %v5149_v44  ;;  %2867 = vmatprep.subr.bf16.mxu0 %v5154_v45  ;;  %v5217_v44 = vld [vmem:[%s7214_s2 + $0xb04] ss:$8 sps:$4 sm:$0xff]   ;;  %v5212_v45 = vld [vmem:[%s7214_s2 + $0xa00] ss:$8 sps:$4 sm:$0xff]  }
 0x135   :  { %2908 = vmatprep.subr.bf16.mxu1 %v5157_v46  ;;  %v5215_v46 = vld [vmem:[%s7214_s2 + $0xb00] ss:$8 sps:$4 sm:$0xff]  }
 0x137   :  { %2868 = vmatpush2.bf16.msra.mxu0 %v5152_v47  ;;  %v5220_v47 = vld [vmem:[%s7214_s2 + $0xaf4] ss:$8 sps:$4 sm:$0xff]  }
 0x138   :  { %2909 = vmatpush2.bf16.msra.mxu1 %v5155_v48  ;;  %2869 = vmatprep.subr.bf16.mxu0 %v5160_v49  ;;  %v5223_v48 = vld [vmem:[%s7214_s2 + $0xbf4] ss:$8 sps:$4 sm:$0xff]   ;;  %v5218_v49 = vld [vmem:[%s7214_s2 + $0xaf0] ss:$8 sps:$4 sm:$0xff]  }
 0x139   :  { %2910 = vmatprep.subr.bf16.mxu1 %v5163_v50  ;;  %v5221_v50 = vld [vmem:[%s7214_s2 + $0xbf0] ss:$8 sps:$4 sm:$0xff]  }
 0x13b   :  { %2870 = vmatpush2.bf16.msra.mxu0 %v5158_v51  ;;  %v5226_v51 = vld [vmem:[%s7214_s2 + $0xae4] ss:$8 sps:$4 sm:$0xff]  }
 0x13c   :  { %2911 = vmatpush2.bf16.msra.mxu1 %v5161_v52  ;;  %2871 = vmatprep.subr.bf16.mxu0 %v5166_v53  ;;  %v5229_v52 = vld [vmem:[%s7214_s2 + $0xbe4] ss:$8 sps:$4 sm:$0xff]   ;;  %v5224_v53 = vld [vmem:[%s7214_s2 + $0xae0] ss:$8 sps:$4 sm:$0xff]  }
 0x13d   :  { %2912 = vmatprep.subr.bf16.mxu1 %v5169_v54  ;;  %v5227_v54 = vld [vmem:[%s7214_s2 + $0xbe0] ss:$8 sps:$4 sm:$0xff]  }
 0x13f   :  { %2872 = vmatpush2.bf16.msra.mxu0 %v5164_v55  ;;  %v5232_v55 = vld [vmem:[%s7214_s2 + $0xad4] ss:$8 sps:$4 sm:$0xff]  }
 0x140   :  { %2913 = vmatpush2.bf16.msra.mxu1 %v5167_v56  ;;  %2923 = vmatprep.subr.bf16.mxu0 %v5172_v60  ;;  %v5235_v56 = vld [vmem:[%s7214_s2 + $0xbd4] ss:$8 sps:$4 sm:$0xff]   ;;  %v5238_v60 = vld [vmem:[%s7214_s2 + $0xac4] ss:$8 sps:$4 sm:$0xff]  }
 0x141   :  { %2964 = vmatprep.subr.bf16.mxu1 %v5175_v61  ;;  %v5241_v61 = vld [vmem:[%s7214_s2 + $0xbc4] ss:$8 sps:$4 sm:$0xff]  }
 0x142   :  { %v2629_v9 = vpop.f32.mrf.mxu0  ;;  %2874 = vmatmul.mubr.bf16.vlgmr.msra.gmra.mxu0 %v92_v62  ;;  %v5236_v62 = vld [vmem:[%s7214_s2 + $0xac0] ss:$8 sps:$4 sm:$0xff]  }
 0x143   :  { %v2670_v10 = vpop.f32.mrf.mxu1  ;;  %2915 = vmatmul.mubr.bf16.vlgmr.msra.gmra.mxu1 %v94_v0  ;;  %v2630_v11 = vadd.f32 %v2629_v9, %v6388_v58  ;;  %2924 = vmatpush1.bf16.msra.mxu0 %v5170_v3  ;;  %v5187_v58 = vld [vmem:[%s7214_s2 + $0xb54] ss:$8 sps:$4 sm:$0xff]   ;;  %v5239_v0 = vld [vmem:[%s7214_s2 + $0xbc0] ss:$8 sps:$4 sm:$0xff]   ;;  %v5242_v3 = vld [vmem:[%s7214_s2 + $0xab0] ss:$8 sps:$4 sm:$0xff]  }
 0x144   :  { %2965 = vmatpush1.bf16.msra.mxu1 %v5173_v4  ;;  %v2631_v14 = vpop.f32.mrf.mxu0  ;;  %2925 = vmatprep.subr.bf16.mxu0 %v5178_v5  ;;  %v5245_v4 = vld [vmem:[%s7214_s2 + $0xbb0] ss:$8 sps:$4 sm:$0xff]   ;;  %v5250_v5 = vld [vmem:[%s7214_s2 + $0xaa4] ss:$8 sps:$4 sm:$0xff]   ;;  %v5256_v9 = vld [vmem:[%s7214_s2 + $0xa94] ss:$8 sps:$4 sm:$0xff]  }
 0x145   :  { %v2672_v15 = vpop.f32.mrf.mxu1  ;;  %2966 = vmatprep.subr.bf16.mxu1 %v5181_v6  ;;  %v6597_v17 = vadd.f32 %v2670_v10, %v2630_v11  ;;  %v2632_v18 = vadd.f32 %v2631_v14, %v6393_v63  ;;  %2955 = vmatprep.mubr.bf16.mxu0 %v97_v7  ;;  %v5190_v63 = vld [vmem:[%s7214_s2 + $0xa44] ss:$8 sps:$4 sm:$0xff]   ;;  %v5248_v7 = vld [vmem:[%s7214_s2 + $0xaa0] ss:$8 sps:$4 sm:$0xff]   ;;  %v5259_v10 = vld [vmem:[%s7214_s2 + $0xb94] ss:$8 sps:$4 sm:$0xff]  }
 0x146   :  { %2996 = vmatprep.mubr.bf16.mxu1 %v99_v8  ;;  %v2633_v20 = vpop.f32.mrf.mxu0  ;;  %v5253_v6 = vld [vmem:[%s7214_s2 + $0xba4] ss:$8 sps:$4 sm:$0xff]   ;;  %v5251_v8 = vld [vmem:[%s7214_s2 + $0xba0] ss:$8 sps:$4 sm:$0xff]   ;;  %v5254_v11 = vld [vmem:[%s7214_s2 + $0xa90] ss:$8 sps:$4 sm:$0xff]  }
 0x147   :  { %v2674_v19 = vpop.f32.mrf.mxu1  ;;  %v6600_v21 = vadd.f32 %v2672_v15, %v2632_v18  ;;  %2926 = vmatpush1.bf16.msra.mxu0 %v5176_v12  ;;  %v5257_v12 = vld [vmem:[%s7214_s2 + $0xb90] ss:$8 sps:$4 sm:$0xff]   ;;  %v5265_v14 = vld [vmem:[%s7214_s2 + $0xb84] ss:$8 sps:$4 sm:$0xff]   ;;  %v5260_v15 = vld [vmem:[%s7214_s2 + $0xa80] ss:$8 sps:$4 sm:$0xff]  }
 0x148   :  { %2967 = vmatpush1.bf16.msra.mxu1 %v5179_v13  ;;  %2927 = vmatprep.subr.bf16.mxu0 %v5184_v16  ;;  %v2634_v26 = vpop.f32.mrf.mxu0  ;;  %v5262_v13 = vld [vmem:[%s7214_s2 + $0xa84] ss:$8 sps:$4 sm:$0xff]   ;;  %v5263_v16 = vld [vmem:[%s7214_s2 + $0xb80] ss:$8 sps:$4 sm:$0xff]   ;;  %v73_v18 = vld [vmem:[%s7215_s0 + $0xb0] sm:$0xff] }
 0x149   :  { %v2675_v24 = vpop.f32.mrf.mxu1  ;;  %2968 = vmatprep.subr.bf16.mxu1 %v5187_v58  ;;  %v71_v58 = vld [vmem:[%s7215_s0 + $0xa0] sm:$0xff]  ;;  %v5268_v19 = vld [vmem:[%s7214_s2 + $0xc74] ss:$8 sps:$4 sm:$0xff]  }
 0x14a   :  { %v96_v20 = vpack.c.bf16 %v71_v58, %v71_v58  ;;  %v5269_v24 = vld [vmem:[%s7217_s4 + $0x38] sm:$0xff]  }
 0x14b   :  { %2928 = vmatpush1.bf16.msra.mxu0 %v5182_v22  ;;  %v98_v22 = vpack.c.bf16 %v73_v18, %v73_v18  ;;  %v5306_v58 = vld [vmem:[%s7219_s6 + $0x54] ss:$8 sps:$4 sm:$0xff]   ;;  %v5304_v18 = vld [vmem:[%s7219_s6 + $0x50] ss:$8 sps:$4 sm:$0xff]  }
 0x14c   :  { %2969 = vmatpush1.bf16.msra.mxu1 %v5185_v23  ;;  %2929 = vmatprep.subr.bf16.mxu0 %v5190_v63  ;;  %v5266_v23 = vld [vmem:[%s7214_s2 + $0xc70] ss:$8 sps:$4 sm:$0xff]   ;;  %v5444_v63 = vmov 0.0  }
 0x14d   :  { %2970 = vmatprep.subr.bf16.mxu1 %v5193_v25  ;;  %v5272_v25 = vld [vmem:[%s7214_s2 + $0xc64] ss:$8 sps:$4 sm:$0xff]  }
 0x14f   :  { %2930 = vmatpush1.bf16.msra.mxu0 %v5188_v27 }
 0x150   :  { %2971 = vmatpush1.bf16.msra.mxu1 %v5191_v28  ;;  %2931 = vmatprep.subr.bf16.mxu0 %v5196_v29  ;;  %v5270_v29 = vld [vmem:[%s7214_s2 + $0xc60] ss:$8 sps:$4 sm:$0xff]  }
 0x151   :  { %2972 = vmatprep.subr.bf16.mxu1 %v5199_v30  ;;  %v5273_v30 = vld [vmem:[%s7217_s4 + $0x30] sm:$0xff]  }
 0x153   :  { %2932 = vmatpush1.bf16.msra.mxu0 %v5194_v31 }
 0x154   :  { %2973 = vmatpush1.bf16.msra.mxu1 %v5197_v33  ;;  %2933 = vmatprep.subr.bf16.mxu0 %v5202_v34  ;;  %v5276_v34 = vld [vmem:[%s7214_s2 + $0xc54] ss:$8 sps:$4 sm:$0xff]  }
 0x155   :  { %2974 = vmatprep.subr.bf16.mxu1 %v5205_v35 }
 0x157   :  { %2934 = vmatpush1.bf16.msra.mxu0 %v5200_v36  ;;  %v5445_v36 = vmov 0  }
 0x158   :  { %2975 = vmatpush1.bf16.msra.mxu1 %v5203_v38  ;;  %2935 = vmatprep.subr.bf16.mxu0 %v5208_v39 }
 0x159   :  { %2976 = vmatprep.subr.bf16.mxu1 %v5211_v40 }
 0x15b   :  { %2936 = vmatpush1.bf16.msra.mxu0 %v5206_v41  ;;  %v5274_v41 = vld [vmem:[%s7214_s2 + $0xc50] ss:$8 sps:$4 sm:$0xff]  }
 0x15c   :  { %2977 = vmatpush1.bf16.msra.mxu1 %v5209_v42  ;;  %2937 = vmatprep.subr.bf16.mxu0 %v5214_v43  ;;  %v5277_v42 = vld [vmem:[%s7217_s4 + $0x28] sm:$0xff]  }
 0x15d   :  { %2978 = vmatprep.subr.bf16.mxu1 %v5217_v44  ;;  %v5280_v43 = vld [vmem:[%s7214_s2 + $0xc44] ss:$8 sps:$4 sm:$0xff]  }
 0x15f   :  { %2938 = vmatpush1.bf16.msra.mxu0 %v5212_v45  ;;  %v5278_v45 = vld [vmem:[%s7214_s2 + $0xc40] ss:$8 sps:$4 sm:$0xff]  }
 0x160   :  { %2979 = vmatpush1.bf16.msra.mxu1 %v5215_v46  ;;  %2939 = vmatprep.subr.bf16.mxu0 %v5220_v47  ;;  %v5281_v46 = vld [vmem:[%s7217_s4 + $0x20] sm:$0xff]   ;;  %v5284_v47 = vld [vmem:[%s7214_s2 + $0xc34] ss:$8 sps:$4 sm:$0xff]  }
 0x161   :  { %2980 = vmatprep.subr.bf16.mxu1 %v5223_v48  ;;  %v5282_v48 = vld [vmem:[%s7214_s2 + $0xc30] ss:$8 sps:$4 sm:$0xff]  }
 0x163   :  { %2940 = vmatpush2.bf16.msra.mxu0 %v5218_v49  ;;  %v5285_v49 = vld [vmem:[%s7217_s4 + $0x18] sm:$0xff]  }
 0x164   :  { %2981 = vmatpush2.bf16.msra.mxu1 %v5221_v50  ;;  %2941 = vmatprep.subr.bf16.mxu0 %v5226_v51  ;;  %v5288_v50 = vld [vmem:[%s7214_s2 + $0xc24] ss:$8 sps:$4 sm:$0xff]   ;;  %v5286_v51 = vld [vmem:[%s7214_s2 + $0xc20] ss:$8 sps:$4 sm:$0xff]  }
 0x165   :  { %2982 = vmatprep.subr.bf16.mxu1 %v5229_v52  ;;  %v5289_v52 = vld [vmem:[%s7217_s4 + $0x10] sm:$0xff]  }
 0x167   :  { %2942 = vmatpush2.bf16.msra.mxu0 %v5224_v53  ;;  %v5292_v53 = vld [vmem:[%s7214_s2 + $0xc14] ss:$8 sps:$4 sm:$0xff]  }
 0x168   :  { %2983 = vmatpush2.bf16.msra.mxu1 %v5227_v54  ;;  %2943 = vmatprep.subr.bf16.mxu0 %v5232_v55  ;;  %v5290_v54 = vld [vmem:[%s7214_s2 + $0xc10] ss:$8 sps:$4 sm:$0xff]   ;;  %v5293_v55 = vld [vmem:[%s7217_s4 + $0x8] sm:$0xff]  }
 0x169   :  { %2984 = vmatprep.subr.bf16.mxu1 %v5235_v56  ;;  %v5296_v56 = vld [vmem:[%s7214_s2 + $0xc04] ss:$8 sps:$4 sm:$0xff]  }
 0x16b   :  { %2944 = vmatpush2.bf16.msra.mxu0 %v5230_v57  ;;  %v5294_v57 = vld [vmem:[%s7214_s2 + $0xc00] ss:$8 sps:$4 sm:$0xff]  }
 0x16c   :  { %2985 = vmatpush2.bf16.msra.mxu1 %v5233_v59  ;;  %2945 = vmatprep.subr.bf16.mxu0 %v5238_v60  ;;  %v5297_v59 = vld [vmem:[%s7217_s4] sm:$0xff]  }
 0x16d   :  { %2986 = vmatprep.subr.bf16.mxu1 %v5241_v61  ;;  %v75_v60 = vld [vmem:[%s7215_s0 + $0xc0] sm:$0xff] }
 0x16e   :  { %v3046_v61 = vld [vmem:[%s7218_s1] sm:$0xff] }
 0x16f   :  { %2946 = vmatpush2.bf16.msra.mxu0 %v5236_v62  ;;  %v100_v62 = vpack.c.bf16 %v75_v60, %v75_v60 }
 0x170   :  { %2987 = vmatpush2.bf16.msra.mxu1 %v5239_v0  ;;  %2947 = vmatprep.subr.bf16.mxu0 %v5244_v1  ;;  %v3047_v0 = vpack.c.bf16 %v3046_v61, %v3046_v61  ;;  %v5393_v61 = vld [vmem:[%s7221_s9 + $0x4] ss:$8 sps:$4 sm:$0xff]  }
 0x171   :  { %2988 = vmatprep.subr.bf16.mxu1 %v5247_v2 }
 0x173   :  { %2948 = vmatpush2.bf16.msra.mxu0 %v5242_v3 }
 0x174   :  { %2989 = vmatpush2.bf16.msra.mxu1 %v5245_v4  ;;  %2949 = vmatprep.subr.bf16.mxu0 %v5250_v5 }
 0x175   :  { %2990 = vmatprep.subr.bf16.mxu1 %v5253_v6 }
 0x177   :  { %2950 = vmatpush2.bf16.msra.mxu0 %v5248_v7 }
 0x178   :  { %2991 = vmatpush2.bf16.msra.mxu1 %v5251_v8  ;;  %2951 = vmatprep.subr.bf16.mxu0 %v5256_v9 }
 0x179   :  { %2992 = vmatprep.subr.bf16.mxu1 %v5259_v10  ;;  %v5300_v10 = vld [vmem:[%s7219_s6 + $0x74] ss:$8 sps:$4 sm:$0xff]  }
 0x17b   :  { %2952 = vmatpush2.bf16.msra.mxu0 %v5254_v11 }
 0x17c   :  { %2993 = vmatpush2.bf16.msra.mxu1 %v5257_v12  ;;  %2953 = vmatprep.subr.bf16.mxu0 %v5262_v13  ;;  %v5298_v12 = vld [vmem:[%s7219_s6 + $0x70] ss:$8 sps:$4 sm:$0xff]  }
 0x17d   :  { %2994 = vmatprep.subr.bf16.mxu1 %v5265_v14 }
 0x17f   :  { %2954 = vmatpush2.bf16.msra.mxu0 %v5260_v15  ;;  %v5303_v15 = vld [vmem:[%s7219_s6 + $0x64] ss:$8 sps:$4 sm:$0xff]  }
 0x180   :  { %2995 = vmatpush2.bf16.msra.mxu1 %v5263_v16  ;;  %3005 = vmatprep.subr.bf16.mxu0 %v5268_v19  ;;  %v5301_v16 = vld [vmem:[%s7219_s6 + $0x60] ss:$8 sps:$4 sm:$0xff]   ;;  %v5309_v19 = vld [vmem:[%s7219_s6 + $0x44] ss:$8 sps:$4 sm:$0xff]  }
 0x181   :  { %4647 = vmatprep.subr.bf16.mxu1 %v5444_v63 }
 0x182   :  { %v2711_v26 = vpop.f32.mrf.mxu0  ;;  %2956 = vmatmul.mubr.bf16.vlgmr.msra.gmra.mxu0 %v96_v20  ;;  %v5307_v20 = vld [vmem:[%s7219_s6 + $0x40] ss:$8 sps:$4 sm:$0xff]  }
 0x183   :  { %v2752_v27 = vpop.f32.mrf.mxu1  ;;  %2997 = vmatmul.mubr.bf16.vlgmr.msra.gmra.mxu1 %v98_v22  ;;  %v2712_v28 = vadd.f32 %v2711_v26, %v6597_v17  ;;  %3006 = vmatpush1.bf16.msra.mxu0 %v5266_v23  ;;  %v5312_v22 = vld [vmem:[%s7219_s6 + $0x34] ss:$8 sps:$4 sm:$0xff]   ;;  %v5310_v23 = vld [vmem:[%s7219_s6 + $0x30] ss:$8 sps:$4 sm:$0xff]  }
 0x184   :  { %4648 = vmatpush3.bf16.msra.mxu1 %v5269_v24  ;;  %v2713_v31 = vpop.f32.mrf.mxu0  ;;  %3007 = vmatprep.subr.bf16.mxu0 %v5272_v25  ;;  %v5315_v24 = vld [vmem:[%s7219_s6 + $0x24] ss:$8 sps:$4 sm:$0xff]   ;;  %v5313_v25 = vld [vmem:[%s7219_s6 + $0x20] ss:$8 sps:$4 sm:$0xff]   ;;  %v5318_v26 = vld [vmem:[%s7219_s6 + $0x14] ss:$8 sps:$4 sm:$0xff]  }
 0x185   :  { %v2754_v33 = vpop.f32.mrf.mxu1  ;;  %4649 = vmatprep.subr.bf16.mxu1 %v5444_v63  ;;  %v6794_v17 = vadd.f32 %v2752_v27, %v2712_v28  ;;  %v2714_v35 = vadd.f32 %v2713_v31, %v6600_v21  ;;  %3037 = vmatprep.mubr.bf16.mxu0 %v5445_v36  ;;  %v5316_v27 = vld [vmem:[%s7219_s6 + $0x10] ss:$8 sps:$4 sm:$0xff]   ;;  %v5321_v28 = vld [vmem:[%s7219_s6 + $0x4] ss:$8 sps:$4 sm:$0xff]  }
 0x186   :  { %4663 = vmatprep.mubr.msk.bf16.mxu1 %vm5446_vm0, %v5444_v63  ;;  %v2715_v39 = vpop.f32.mrf.mxu0 }
 0x187   :  { %v2756_v38 = vpop.f32.mrf.mxu1  ;;  %v2755_v40 = vadd.f32 %v2754_v33, %v2714_v35  ;;  %3008 = vmatpush1.bf16.msra.mxu0 %v5270_v29  ;;  %v5319_v29 = vld [vmem:[%s7219_s6] ss:$8 sps:$4 sm:$0xff]  }
 0x188   :  { %4650 = vmatpush3.bf16.msra.mxu1 %v5273_v30  ;;  %3009 = vmatprep.subr.bf16.mxu0 %v5276_v34  ;;  %v2716_v44 = vpop.f32.mrf.mxu0  ;;  %v5324_v30 = vld [vmem:[%s7220_s8 + $0x74] ss:$8 sps:$4 sm:$0xff]  }
 0x189   :  { %v2757_v21 = vpop.f32.mrf.mxu1  ;;  %4651 = vmatprep.subr.bf16.mxu1 %v5444_v63  ;;  %v5372_v44 = vld [vmem:[%s7221_s9 + $0x74] ss:$8 sps:$4 sm:$0xff]  }
 0x18b   :  { %3010 = vmatpush1.bf16.msra.mxu0 %v5274_v41 }
 0x18c   :  { %4652 = vmatpush3.bf16.msra.mxu1 %v5277_v42  ;;  %3011 = vmatprep.subr.bf16.mxu0 %v5280_v43  ;;  %v5370_v43 = vld [vmem:[%s7221_s9 + $0x70] ss:$8 sps:$4 sm:$0xff]  }
 0x18d   :  { %4653 = vmatprep.subr.bf16.mxu1 %v5444_v63 }
 0x18f   :  { %3012 = vmatpush1.bf16.msra.mxu0 %v5278_v45  ;;  %v5375_v45 = vld [vmem:[%s7221_s9 + $0x64] ss:$8 sps:$4 sm:$0xff]  }
 0x190   :  { %4654 = vmatpush3.bf16.msra.mxu1 %v5281_v46  ;;  %3013 = vmatprep.subr.bf16.mxu0 %v5284_v47  ;;  %v5373_v46 = vld [vmem:[%s7221_s9 + $0x60] ss:$8 sps:$4 sm:$0xff]   ;;  %v5378_v47 = vld [vmem:[%s7221_s9 + $0x54] ss:$8 sps:$4 sm:$0xff]  }
 0x191   :  { %4655 = vmatprep.subr.bf16.mxu1 %v5444_v63 }
 0x193   :  { %3014 = vmatpush1.bf16.msra.mxu0 %v5282_v48  ;;  %v5376_v48 = vld [vmem:[%s7221_s9 + $0x50] ss:$8 sps:$4 sm:$0xff]  }
 0x194   :  { %4656 = vmatpush3.bf16.msra.mxu1 %v5285_v49  ;;  %3015 = vmatprep.subr.bf16.mxu0 %v5288_v50  ;;  %v5381_v49 = vld [vmem:[%s7221_s9 + $0x44] ss:$8 sps:$4 sm:$0xff]   ;;  %v5379_v50 = vld [vmem:[%s7221_s9 + $0x40] ss:$8 sps:$4 sm:$0xff]  }
 0x195   :  { %4657 = vmatprep.subr.bf16.mxu1 %v5444_v63 }
 0x197   :  { %3016 = vmatpush1.bf16.msra.mxu0 %v5286_v51  ;;  %v5384_v51 = vld [vmem:[%s7221_s9 + $0x34] ss:$8 sps:$4 sm:$0xff]  }
 0x198   :  { %4658 = vmatpush3.bf16.msra.mxu1 %v5289_v52  ;;  %3017 = vmatprep.subr.bf16.mxu0 %v5292_v53  ;;  %v5382_v52 = vld [vmem:[%s7221_s9 + $0x30] ss:$8 sps:$4 sm:$0xff]   ;;  %v5387_v53 = vld [vmem:[%s7221_s9 + $0x24] ss:$8 sps:$4 sm:$0xff]  }
 0x199   :  { %4659 = vmatprep.subr.bf16.mxu1 %v5444_v63 }
 0x19b   :  { %3018 = vmatpush1.bf16.msra.mxu0 %v5290_v54  ;;  %v5385_v54 = vld [vmem:[%s7221_s9 + $0x20] ss:$8 sps:$4 sm:$0xff]  }
 0x19c   :  { %4660 = vmatpush3.bf16.msra.mxu1 %v5293_v55  ;;  %3019 = vmatprep.subr.bf16.mxu0 %v5296_v56  ;;  %v5390_v55 = vld [vmem:[%s7221_s9 + $0x14] ss:$8 sps:$4 sm:$0xff]  }
 0x19d   :  { %4661 = vmatprep.subr.bf16.mxu1 %v5444_v63 }
 0x19f   :  { %3020 = vmatpush1.bf16.msra.mxu0 %v5294_v57 }
 0x1a0   :  { %4662 = vmatpush3.bf16.msra.mxu1 %v5297_v59  ;;  %3269 = vmatprep.subr.bf16.mxu0 %v5300_v10  ;;  %v5388_v59 = vld [vmem:[%s7221_s9 + $0x10] ss:$8 sps:$4 sm:$0xff]   ;;  %v5397_v10 = vld [vmem:[%s7221_s9 + $0xe0] ss:$8 sps:$4 sm:$0xff]  }
 0x1a1   :  { %3538 = vmatprep.subr.bf16.mxu1 %v5372_v44  ;;  %v5336_v44 = vld [vmem:[%s7220_s8 + $0x34] ss:$8 sps:$4 sm:$0xff]  }
 0x1a2   :  { %3038 = vmatmul.mubr.bf16.vlgmr.msra.gmra.mxu0 %v100_v62 }
 0x1a3   :  { %4664 = vmatmul.mubr.bf16.vlgmr.msra.gmra.mxu1 %v3047_v0  ;;  %3301 = vmatprep.mubr.bf16.mxu0 %v5445_v36 }
 0x1a4   :  { %3270 = vmatpush1.bf16.msra.mxu0 %v5298_v12  ;;  %3539 = vmatpush1.bf16.msra.mxu1 %v5370_v43  ;;  %v5400_v12 = vld [vmem:[%s7221_s9 + $0xd0] ss:$8 sps:$4 sm:$0xff]   ;;  %v5331_v43 = vld [vmem:[%s7220_s8 + $0x40] ss:$8 sps:$4 sm:$0xff]  }
 0x1a5   :  { %3271 = vmatprep.subr.bf16.mxu0 %v5303_v15  ;;  %3540 = vmatprep.subr.bf16.mxu1 %v5375_v45  ;;  %v5408_v15 = vld [vmem:[%s7221_s9 + $0xb4] ss:$8 sps:$4 sm:$0xff]   ;;  %v5334_v45 = vld [vmem:[%s7220_s8 + $0x30] ss:$8 sps:$4 sm:$0xff]  }
 0x1a8   :  { %3272 = vmatpush1.bf16.msra.mxu0 %v5301_v16  ;;  %3541 = vmatpush1.bf16.msra.mxu1 %v5373_v46  ;;  %v5406_v16 = vld [vmem:[%s7221_s9 + $0xb0] ss:$8 sps:$4 sm:$0xff]   ;;  %v5339_v46 = vld [vmem:[%s7220_s8 + $0x24] ss:$8 sps:$4 sm:$0xff]  }
 0x1a9   :  { %3273 = vmatprep.subr.bf16.mxu0 %v5306_v58  ;;  %3542 = vmatprep.subr.bf16.mxu1 %v5378_v47  ;;  %v5411_v58 = vld [vmem:[%s7221_s9 + $0xa4] ss:$8 sps:$4 sm:$0xff]   ;;  %v5337_v47 = vld [vmem:[%s7220_s8 + $0x20] ss:$8 sps:$4 sm:$0xff]  }
 0x1ac   :  { %3274 = vmatpush1.bf16.msra.mxu0 %v5304_v18  ;;  %3543 = vmatpush1.bf16.msra.mxu1 %v5376_v48  ;;  %v5409_v18 = vld [vmem:[%s7221_s9 + $0xa0] ss:$8 sps:$4 sm:$0xff]   ;;  %v5342_v48 = vld [vmem:[%s7220_s8 + $0x14] ss:$8 sps:$4 sm:$0xff]  }
 0x1ad   :  { %3275 = vmatprep.subr.bf16.mxu0 %v5309_v19  ;;  %3544 = vmatprep.subr.bf16.mxu1 %v5381_v49  ;;  %v5340_v49 = vld [vmem:[%s7220_s8 + $0x10] ss:$8 sps:$4 sm:$0xff]  }
 0x1b0   :  { %3276 = vmatpush1.bf16.msra.mxu0 %v5307_v20  ;;  %3545 = vmatpush1.bf16.msra.mxu1 %v5379_v50  ;;  %v4492_v20 = vld [vmem:[%s7222_s5] ss:$0 sm:$0xff]  ;;  %v5345_v50 = vld [vmem:[%s7220_s8 + $0x4] ss:$8 sps:$4 sm:$0xff]  }
 0x1b1   :  { %3277 = vmatprep.subr.bf16.mxu0 %v5312_v22  ;;  %3546 = vmatprep.subr.bf16.mxu1 %v5384_v51  ;;  %v5343_v51 = vld [vmem:[%s7220_s8] ss:$8 sps:$4 sm:$0xff]  }
 0x1b4   :  { %3278 = vmatpush1.bf16.msra.mxu0 %v5310_v23  ;;  %3547 = vmatpush1.bf16.msra.mxu1 %v5382_v52  ;;  %v5348_v52 = vld [vmem:[%s7220_s8 + $0xf4] ss:$8 sps:$4 sm:$0xff]  }
 0x1b5   :  { %3279 = vmatprep.subr.bf16.mxu0 %v5315_v24  ;;  %3548 = vmatprep.subr.bf16.mxu1 %v5387_v53  ;;  %v5346_v53 = vld [vmem:[%s7220_s8 + $0xf0] ss:$8 sps:$4 sm:$0xff]  }
 0x1b8   :  { %3280 = vmatpush1.bf16.msra.mxu0 %v5313_v25  ;;  %3549 = vmatpush1.bf16.msra.mxu1 %v5385_v54  ;;  %v5351_v54 = vld [vmem:[%s7220_s8 + $0xe4] ss:$8 sps:$4 sm:$0xff]  }
 0x1b9   :  { %3281 = vmatprep.subr.bf16.mxu0 %v5318_v26  ;;  %3550 = vmatprep.subr.bf16.mxu1 %v5390_v55  ;;  %v5349_v55 = vld [vmem:[%s7220_s8 + $0xe0] ss:$8 sps:$4 sm:$0xff]  }
 0x1bc   :  { %3282 = vmatpush1.bf16.msra.mxu0 %v5316_v27  ;;  %3551 = vmatpush1.bf16.msra.mxu1 %v5388_v59  ;;  %v5357_v59 = vld [vmem:[%s7220_s8 + $0xc4] ss:$8 sps:$4 sm:$0xff]  }
 0x1bd   :  { %3283 = vmatprep.subr.bf16.mxu0 %v5321_v28  ;;  %3552 = vmatprep.subr.bf16.mxu1 %v5393_v61  ;;  %v5360_v61 = vld [vmem:[%s7220_s8 + $0xb4] ss:$8 sps:$4 sm:$0xff]  }
 0x1c0   :  { %3284 = vmatpush1.bf16.msra.mxu0 %v5319_v29 }
 0x1c1   :  { %3739 = vmatprep.subr.bf16.mxu0 %v5324_v30 }
 0x1c2   :  { %v2793_v1 = vpop.f32.mrf.mxu0 }
 0x1c3   :  { %v2834_v2 = vpop.f32.mrf.mxu1  ;;  %v2794_v3 = vadd.f32 %v2793_v1, %v6794_v17 }
 0x1c4   :  { %v2795_v4 = vpop.f32.mrf.mxu0 }
 0x1c5   :  { %v2836_v5 = vpop.f32.mrf.mxu1  ;;  %v2835_v6 = vadd.f32 %v2834_v2, %v2794_v3  ;;  %v2796_v7 = vadd.f32 %v2795_v4, %v2755_v40  ;;  %v5391_v4 = vld [vmem:[%s7221_s9] ss:$8 sps:$4 sm:$0xff]  }
 0x1c6   :  { %v2797_v9 = vpop.f32.mrf.mxu0  ;;  %3553 = vmatpush1.bf16.msra.mxu1 %v5391_v4  ;;  %v5369_v4 = vld [vmem:[%s7220_s8 + $0x84] ss:$8 sps:$4 sm:$0xff]  }
 0x1c7   :  { %v2838_v8 = vpop.f32.mrf.mxu1  ;;  %v2837_v11 = vadd.f32 %v2836_v5, %v2796_v7  ;;  %v5396_v5 = vld [vmem:[%s7221_s9 + $0xf4] ss:$8 sps:$4 sm:$0xff]   ;;  %v5399_v9 = vld [vmem:[%s7221_s9 + $0xe4] ss:$8 sps:$4 sm:$0xff]  }
 0x1c8   :  { %v2798_v14 = vpop.f32.mrf.mxu0  ;;  %v5394_v8 = vld [vmem:[%s7221_s9 + $0xf0] ss:$8 sps:$4 sm:$0xff]   ;;  %3554 = vmatprep.subr.bf16.mxu1 %v5396_v5  ;;  %v5367_v5 = vld [vmem:[%s7220_s8 + $0x80] ss:$8 sps:$4 sm:$0xff]  }
 0x1c9   :  { %v2839_v13 = vpop.f32.mrf.mxu1  ;;  %v5403_v14 = vld [vmem:[%s7221_s9 + $0xc0] ss:$8 sps:$4 sm:$0xff]  }
 0x1ca   :  { %3555 = vmatpush2.bf16.msra.mxu1 %v5394_v8  ;;  %v5405_v13 = vld [vmem:[%s7221_s9 + $0xc4] ss:$8 sps:$4 sm:$0xff]   ;;  %v5412_v8 = vld [vmem:[%s7221_s9 + $0x90] ss:$8 sps:$4 sm:$0xff]  }
 0x1cb   :  { %3556 = vmatprep.subr.bf16.mxu1 %v5399_v9  ;;  %v5417_v9 = vld [vmem:[%s7221_s9 + $0x84] ss:$8 sps:$4 sm:$0xff]  }
 0x1ce   :  { %3557 = vmatpush2.bf16.msra.mxu1 %v5397_v10  ;;  %v5415_v10 = vld [vmem:[%s7221_s9 + $0x80] ss:$8 sps:$4 sm:$0xff]  }
 0x202   :  { %v2875_v31 = vpop.f32.mrf.mxu0 }
 0x203   :  { %v2916_v33 = vpop.f32.mrf.mxu1  ;;  %v2876_v34 = vadd.f32 %v2875_v31, %v2835_v6 }
 0x204   :  { %v2877_v17 = vpop.f32.mrf.mxu0 }
 0x205   :  { %v2918_v35 = vpop.f32.mrf.mxu1  ;;  %v2917_v36 = vadd.f32 %v2916_v33, %v2876_v34  ;;  %v2878_v38 = vadd.f32 %v2877_v17, %v2837_v11  ;;  %v5402_v11 = vld [vmem:[%s7221_s9 + $0xd4] ss:$8 sps:$4 sm:$0xff]   ;;  %v5322_v33 = vld [vmem:[%s7220_s8 + $0x70] ss:$8 sps:$4 sm:$0xff]  }
 0x206   :  { %v2879_v40 = vpop.f32.mrf.mxu0  ;;  %3558 = vmatprep.subr.bf16.mxu1 %v5402_v11  ;;  %v5418_v11 = vld [vmem:[%s7223_s11 + $0x78] sm:$0xff]  }
 0x207   :  { %v2920_v39 = vpop.f32.mrf.mxu1  ;;  %v6914_v41 = vadd.f32 %v2918_v35, %v2878_v38  ;;  %3559 = vmatpush2.bf16.msra.mxu1 %v5400_v12  ;;  %v5325_v40 = vld [vmem:[%s7220_s8 + $0x60] ss:$8 sps:$4 sm:$0xff]  }
 0x208   :  { %v2880_v21 = vpop.f32.mrf.mxu0  ;;  %3560 = vmatprep.subr.bf16.mxu1 %v5405_v13  ;;  %v3177_v12 = vld [vmem:[%s7224_s7] sm:$0x3] }
 0x209   :  { %v2921_v42 = vpop.f32.mrf.mxu1  ;;  %v5333_v21 = vld [vmem:[%s7220_s8 + $0x44] ss:$8 sps:$4 sm:$0xff]   ;;  %v3182_v13 = vrot.slane %v3177_v12, %v6343_v32 }
 0x20a   :  { %v5328_v42 = vld [vmem:[%s7220_s8 + $0x50] ss:$8 sps:$4 sm:$0xff]  }
 0x20b   :  { %3561 = vmatpush2.bf16.msra.mxu1 %v5403_v14  ;;  %v3186_v14 = vrot.slane %v3177_v12, %v6357_v37 }
 0x20c   :  { %3562 = vmatprep.subr.bf16.mxu1 %v5408_v15 }
 0x20f   :  { %3563 = vmatpush2.bf16.msra.mxu1 %v5406_v16 }
 0x210   :  { %3564 = vmatprep.subr.bf16.mxu1 %v5411_v58 }
 0x213   :  { %3565 = vmatpush2.bf16.msra.mxu1 %v5409_v18 }
 0x242   :  { %v2957_v56 = vpop.f32.mrf.mxu0 }
 0x243   :  { %v2998_v57 = vpop.f32.mrf.mxu1  ;;  %v2958_v60 = vadd.f32 %v2957_v56, %v2917_v36  ;;  %v5327_v36 = vld [vmem:[%s7220_s8 + $0x64] ss:$8 sps:$4 sm:$0xff]   ;;  %v5354_v56 = vld [vmem:[%s7220_s8 + $0xd4] ss:$8 sps:$4 sm:$0xff]  }
 0x244   :  { %v2959_v62 = vpop.f32.mrf.mxu0 }
 0x245   :  { %v3000_v0 = vpop.f32.mrf.mxu1  ;;  %v2999_v1 = vadd.f32 %v2998_v57, %v2958_v60  ;;  %v2960_v19 = vadd.f32 %v2959_v62, %v6914_v41  ;;  %v5330_v41 = vld [vmem:[%s7220_s8 + $0x54] ss:$8 sps:$4 sm:$0xff]   ;;  %v5352_v57 = vld [vmem:[%s7220_s8 + $0xd0] ss:$8 sps:$4 sm:$0xff]   ;;  %v5355_v60 = vld [vmem:[%s7220_s8 + $0xc0] ss:$8 sps:$4 sm:$0xff]  }
 0x246   :  { %v2961_v3 = vpop.f32.mrf.mxu0  ;;  %v5358_v62 = vld [vmem:[%s7220_s8 + $0xb0] ss:$8 sps:$4 sm:$0xff]  }
 0x247   :  { %v3002_v2 = vpop.f32.mrf.mxu1  ;;  %v3001_v24 = vadd.f32 %v3000_v0, %v2960_v19  ;;  %v5363_v0 = vld [vmem:[%s7220_s8 + $0xa4] ss:$8 sps:$4 sm:$0xff]   ;;  %v5364_v3 = vld [vmem:[%s7220_s8 + $0x90] ss:$8 sps:$4 sm:$0xff]  }
 0x248   :  { %v2962_v7 = vpop.f32.mrf.mxu0  ;;  %v5366_v2 = vld [vmem:[%s7220_s8 + $0x94] ss:$8 sps:$4 sm:$0xff]  }
 0x249   :  { %v3003_v6 = vpop.f32.mrf.mxu1  ;;  %v5414_v7 = vld [vmem:[%s7221_s9 + $0x94] ss:$8 sps:$4 sm:$0xff]  }
 0x24a   :  { %3566 = vmatprep.subr.bf16.mxu1 %v5414_v7 }
 0x24b   :  { %3567 = vmatpush2.bf16.msra.mxu1 %v5412_v8 }
 0x24c   :  { %3568 = vmatprep.subr.bf16.mxu1 %v5417_v9 }
 0x24f   :  { %3569 = vmatpush2.bf16.msra.mxu1 %v5415_v10 }
 0x250   :  { %4616 = vmatprep.subr.bf16.mxu1 %v5418_v11 }
 0x262   :  { %v3039_v22 = vpop.f32.mrf.mxu0 }
 0x263   :  { %v3153_v23 = vpop.f32.mrf.mxu1  ;;  %v7004_v25 = vadd.f32 %v3039_v22, %v2999_v1  ;;  %v5361_v1 = vld [vmem:[%s7220_s8 + $0xa0] ss:$8 sps:$4 sm:$0xff]   ;;  %v5419_v22 = vld [vmem:[%s7223_s11 + $0x38] sm:$0xff]  }
 0x264   :  { %v3154_v26 = vadd.f32 %v4492_v20, %v3153_v23  ;;  %v3041_v27 = vpop.f32.mrf.mxu0 }
 0x265   :  { %v4665_v28 = vpop.f32.mrf.mxu1  ;;  %v3042_v30 = vadd.f32 %v3041_v27, %v3001_v24  ;;  %v3310_v6 = vpack.c.bf16 %v7004_v25, %v7004_v25  ;;  %v5420_v25 = vld [vmem:[%s7223_s11 + $0x70] sm:$0xff]   ;;  %v5422_v27 = vld [vmem:[%s7223_s11 + $0x68] sm:$0xff]  }
 0x266   :  { %v3159_v29 = vmax.f32 %v3154_v26, 0.0  ;;  %v3043_v34 = vpop.f32.mrf.mxu0  ;;  %v5421_v26 = vld [vmem:[%s7223_s11 + $0x30] sm:$0xff]   ;;  %v5423_v28 = vld [vmem:[%s7223_s11 + $0x28] sm:$0xff]  }
 0x267   :  { %v3156_v31 = vpop.f32.mrf.mxu1  ;;  %v3311_v35 = vpack.c.bf16 %v3042_v30, %v3042_v30  ;;  %v5425_v30 = vld [vmem:[%s7223_s11 + $0x20] sm:$0xff]  }
 0x268   :  { %v3160_v17 = vpack.c.bf16 %v3159_v29, %v3159_v29  ;;  %v3044_v39 = vpop.f32.mrf.mxu0  ;;  %v5424_v29 = vld [vmem:[%s7223_s11 + $0x60] sm:$0xff]   ;;  %v5426_v31 = vld [vmem:[%s7223_s11 + $0x58] sm:$0xff]  }
 0x269   :  { %v4666_v38 = vpop.f32.mrf.mxu1  ;;  %v5429_v39 = vld [vmem:[%s7223_s11 + $0x10] sm:$0xff]  }
 0x26a   :  { %3302 = vmatmul.mubr.bf16.vlgmr.msra.gmra.mxu0 %v3160_v17  ;;  %v5428_v38 = vld [vmem:[%s7223_s11 + $0x50] sm:$0xff]  }
 0x26b   :  { %3740 = vmatpush1.bf16.msra.mxu0 %v5322_v33  ;;  %3771 = vmatprep.mubr.bf16.mxu0 %v3311_v35  ;;  %v5427_v33 = vld [vmem:[%s7223_s11 + $0x18] sm:$0xff]  }
 0x26c   :  { %3741 = vmatprep.subr.bf16.mxu0 %v5327_v36 }
 0x26f   :  { %3742 = vmatpush1.bf16.msra.mxu0 %v5325_v40  ;;  %v5430_v40 = vld [vmem:[%s7223_s11 + $0x48] sm:$0xff]  }
 0x270   :  { %3743 = vmatprep.subr.bf16.mxu0 %v5330_v41  ;;  %v5431_v41 = vld [vmem:[%s7223_s11 + $0x8] sm:$0xff]  }
 0x273   :  { %3744 = vmatpush1.bf16.msra.mxu0 %v5328_v42  ;;  %v5432_v42 = vld [vmem:[%s7223_s11 + $0x40] sm:$0xff]  }
 0x274   :  { %3745 = vmatprep.subr.bf16.mxu0 %v5333_v21  ;;  %v5433_v21 = vld [vmem:[%s7223_s11] sm:$0xff]  }
 0x277   :  { %3746 = vmatpush1.bf16.msra.mxu0 %v5331_v43  ;;  %v5434_v43 = vld [vmem:[%s7225_s13 + $0x38] sm:$0xff]  }
 0x278   :  { %3747 = vmatprep.subr.bf16.mxu0 %v5336_v44  ;;  %v5435_v44 = vld [vmem:[%s7225_s13 + $0x30] sm:$0xff]  }
 0x27b   :  { %3748 = vmatpush1.bf16.msra.mxu0 %v5334_v45  ;;  %v5436_v45 = vld [vmem:[%s7225_s13 + $0x28] sm:$0xff]  }
 0x27c   :  { %3749 = vmatprep.subr.bf16.mxu0 %v5339_v46  ;;  %v5437_v46 = vld [vmem:[%s7225_s13 + $0x20] sm:$0xff]  }
 0x27f   :  { %3750 = vmatpush1.bf16.msra.mxu0 %v5337_v47  ;;  %v5438_v47 = vld [vmem:[%s7225_s13 + $0x18] sm:$0xff]  }
 0x280   :  { %3751 = vmatprep.subr.bf16.mxu0 %v5342_v48  ;;  %v3780_v48 = vld [vmem:[%s7226_s10] sm:$0x3] }
 0x283   :  { %3752 = vmatpush1.bf16.msra.mxu0 %v5340_v49  ;;  %v3785_v49 = vrot.slane %v3780_v48, %v6343_v32  ;;  %v5439_v32 = vld [vmem:[%s7225_s13 + $0x10] sm:$0xff]  }
 0x284   :  { %3753 = vmatprep.subr.bf16.mxu0 %v5345_v50 }
 0x287   :  { %3754 = vmatpush1.bf16.msra.mxu0 %v5343_v51 }
 0x288   :  { %3755 = vmatprep.subr.bf16.mxu0 %v5348_v52  ;;  %v3789_v52 = vrot.slane %v3780_v48, %v6357_v37  ;;  %v5440_v37 = vld [vmem:[%s7225_s13 + $0x8] sm:$0xff]  }
 0x28b   :  { %3756 = vmatpush2.bf16.msra.mxu0 %v5346_v53 }
 0x28c   :  { %3757 = vmatprep.subr.bf16.mxu0 %v5351_v54 }
 0x28f   :  { %3758 = vmatpush2.bf16.msra.mxu0 %v5349_v55 }
 0x290   :  { %3759 = vmatprep.subr.bf16.mxu0 %v5354_v56 }
 0x293   :  { %3760 = vmatpush2.bf16.msra.mxu0 %v5352_v57 }
 0x294   :  { %3761 = vmatprep.subr.bf16.mxu0 %v5357_v59 }
 0x297   :  { %3762 = vmatpush2.bf16.msra.mxu0 %v5355_v60 }
 0x298   :  { %3763 = vmatprep.subr.bf16.mxu0 %v5360_v61 }
 0x29b   :  { %3764 = vmatpush2.bf16.msra.mxu0 %v5358_v62 }
 0x29c   :  { %3765 = vmatprep.subr.bf16.mxu0 %v5363_v0 }
 0x29f   :  { %3766 = vmatpush2.bf16.msra.mxu0 %v5361_v1  ;;  %v5441_v1 = vld [vmem:[%s7225_s13] sm:$0xff]  }
 0x2a0   :  { %3767 = vmatprep.subr.bf16.mxu0 %v5366_v2 }
 0x2a3   :  { %3768 = vmatpush2.bf16.msra.mxu0 %v5364_v3  ;;  %v4581_v3 = vld [vmem:[%s7227_s12] ss:$0 sm:$0xff] }
 0x2a4   :  { %3769 = vmatprep.subr.bf16.mxu0 %v5369_v4 }
 0x2a7   :  { %3770 = vmatpush2.bf16.msra.mxu0 %v5367_v5 }
 0x2a8   :  { %4667 = vmatprep.subr.bf16.mxu0 %v5444_v63 }
 0x2aa   :  { %3772 = vmatmul.mubr.bf16.vlgmr.msra.gmra.mxu0 %v3310_v6 }
 0x2ab   :  { %4683 = vmatprep.mubr.msk.bf16.mxu0 %vm5446_vm0, %v5444_v63  ;;  %4668 = vmatpush3.bf16.msra.mxu0 %v5434_v43 }
 0x2ac   :  { %4669 = vmatprep.subr.bf16.mxu0 %v5444_v63 }
 0x2af   :  { %4670 = vmatpush3.bf16.msra.mxu0 %v5435_v44 }
 0x2b0   :  { %4671 = vmatprep.subr.bf16.mxu0 %v5444_v63 }
 0x2b3   :  { %4672 = vmatpush3.bf16.msra.mxu0 %v5436_v45 }
 0x2b4   :  { %4673 = vmatprep.subr.bf16.mxu0 %v5444_v63 }
 0x2b7   :  { %4674 = vmatpush3.bf16.msra.mxu0 %v5437_v46 }
 0x2b8   :  { %4675 = vmatprep.subr.bf16.mxu0 %v5444_v63 }
 0x2bb   :  { %4676 = vmatpush3.bf16.msra.mxu0 %v5438_v47 }
 0x2bc   :  { %4677 = vmatprep.subr.bf16.mxu0 %v5444_v63 }
 0x2bf   :  { %4678 = vmatpush3.bf16.msra.mxu0 %v5439_v32 }
 0x2c0   :  { %4679 = vmatprep.subr.bf16.mxu0 %v5444_v63 }
 0x2c3   :  { %4680 = vmatpush3.bf16.msra.mxu0 %v5440_v37 }
 0x2c4   :  { %4681 = vmatprep.subr.bf16.mxu0 %v5444_v63  ;;  %v4598_v63 = vld [vmem:[%s7228_s14] ss:$0 sm:$0xff] }
 0x2c7   :  { %4682 = vmatpush3.bf16.msra.mxu0 %v5441_v1 }
 0x32a   :  { %v3303_v15 = vpop.f32.mrf.mxu0 }
 0x32b   :  { %v3304_v16 = vadd.f32 %v3303_v15, %v3182_v13 }
 0x32c   :  { %v3305_v58 = vpop.f32.mrf.mxu0 }
 0x32d   :  { %v3306_v18 = vadd.f32 %v3305_v58, %v3186_v14  ;;  %v3344_v23 = vpack.c.bf16 %v3304_v16, %v3304_v16 }
 0x32e   :  { %v3307_v19 = vpop.f32.mrf.mxu0 }
 0x32f   :  { %v3345_v20 = vpack.c.bf16 %v3306_v18, %v3306_v18 }
 0x330   :  { %v3308_v24 = vpop.f32.mrf.mxu0 }
 0x331   :  { %3570 = vmatprep.mubr.bf16.mxu1 %v3345_v20 }
 0x332   :  { %3571 = vmatmul.mubr.bf16.vlgmr.msra.gmra.mxu1 %v3344_v23 }
 0x333   :  { %4617 = vmatpush3.bf16.msra.mxu1 %v5419_v22 }
 0x334   :  { %4618 = vmatprep.subr.bf16.mxu1 %v5420_v25 }
 0x337   :  { %4619 = vmatpush3.bf16.msra.mxu1 %v5421_v26 }
 0x338   :  { %4620 = vmatprep.subr.bf16.mxu1 %v5422_v27 }
 0x33b   :  { %4621 = vmatpush3.bf16.msra.mxu1 %v5423_v28 }
 0x33c   :  { %4622 = vmatprep.subr.bf16.mxu1 %v5424_v29 }
 0x33f   :  { %4623 = vmatpush3.bf16.msra.mxu1 %v5425_v30 }
 0x340   :  { %4624 = vmatprep.subr.bf16.mxu1 %v5426_v31 }
 0x343   :  { %4625 = vmatpush3.bf16.msra.mxu1 %v5427_v33 }
 0x344   :  { %4626 = vmatprep.subr.bf16.mxu1 %v5428_v38 }
 0x347   :  { %4627 = vmatpush3.bf16.msra.mxu1 %v5429_v39 }
 0x348   :  { %4628 = vmatprep.subr.bf16.mxu1 %v5430_v40 }
 0x34b   :  { %4629 = vmatpush3.bf16.msra.mxu1 %v5431_v41 }
 0x34c   :  { %4630 = vmatprep.subr.bf16.mxu1 %v5432_v42 }
 0x34f   :  { %4631 = vmatpush3.bf16.msra.mxu1 %v5433_v21 }
 0x36a   :  { %v3773_v34 = vpop.f32.mrf.mxu0 }
 0x36c   :  { %v3775_v17 = vpop.f32.mrf.mxu0 }
 0x36e   :  { %v3777_v35 = vpop.f32.mrf.mxu0 }
 0x370   :  { %v3778_v36 = vpop.f32.mrf.mxu0 }
 0x3f2   :  { %v3572_v50 = vpop.f32.mrf.mxu1 }
 0x3f3   :  { %v3774_v51 = vadd.f32 %v3773_v34, %v3572_v50 }
 0x3f4   :  { %v3574_v53 = vpop.f32.mrf.mxu1 }
 0x3f5   :  { %v3792_v54 = vadd.f32 %v3785_v49, %v3774_v51  ;;  %v3776_v55 = vadd.f32 %v3775_v17, %v3574_v53 }
 0x3f6   :  { %v3576_v56 = vpop.f32.mrf.mxu1 }
 0x3f7   :  { %v3793_v57 = vadd.f32 %v3789_v52, %v3776_v55  ;;  %v3794_v59 = vmax.f32 %v3792_v54, 0.0 }
 0x3f8   :  { %v3577_v60 = vpop.f32.mrf.mxu1 }
 0x3f9   :  { %v3795_v61 = vmax.f32 %v3793_v57, 0.0  ;;  %v3796_v0 = vpack.c.bf16 %v3794_v59, %v3794_v59 }
 0x3fb   :  { %v3797_v62 = vpack.c.bf16 %v3795_v61, %v3795_v61 }
 0x3fd   :  { %3965 = vmatprep.mubr.bf16.mxu1 %v3797_v62 }
 0x3fe   :  { %3966 = vmatmul.mubr.bf16.vlgmr.msra.gmra.mxu1 %v3796_v0 }
 0x4be   :  { %v4632_v2 = vpop.f32.mrf.mxu1 }
 0x4c0   :  { %v4633_v4 = vpop.f32.mrf.mxu1 }
 0x4c1   :  { %v4634_v5 = vadd.f32 %v4633_v4, %v4632_v2 }
 0x4c2   :  { %v4635_v6 = vpop.f32.mrf.mxu1 }
 0x4c3   :  { %v3968_v7 = vadd.f32 %v4634_v5, %v4581_v3 }
 0x4c4   :  { %v4636_v8 = vpop.f32.mrf.mxu1 }
 0x4c5   :  { %v3973_v9 = vmax.f32 %v3968_v7, 0.0 }
 0x4c7   :  { %v3974_v10 = vpack.c.bf16 %v3973_v9, %v3973_v9 }
 0x4c9   :  { %4684 = vmatmul.mubr.bf16.vlgmr.msra.gmra.mxu0 %v3974_v10 }
 0x589   :  { %v4080_v11 = vpop.f32.mrf.mxu0 }
 0x58a   :  { %v4081_v12 = vadd.f32 %v4598_v63, %v4080_v11 }
 0x58b   :  { %v4685_v13 = vpop.f32.mrf.mxu0 }
 0x58c   :  { %5442 = vtanh.f32 %v4081_v12 }
 0x58d   :  { %v4083_v14 = vpop.f32.mrf.mxu0 }
 0x58f   :  { %v4686_v15 = vpop.f32.mrf.mxu0 }
 0x599   :  { %v5443_v16 = vpop.eup %5442 }
 0x59a   :  { %4087 = vst [vmem:[%s7229_s15] sm:$0xff] %v5443_v16 }

</bundles_post_ra>
